<compile_context>
chip_gen: v6e
topology: v6e:2x2x1
jax: 0.10.0
libtpu: 0.0.40
codegen_flags: <defaults>
</compile_context>

<pallas_src>
import functools

import jax
import jax.numpy as jnp
from jax.experimental import pallas as pl
from jax.experimental.pallas import tpu as pltpu

# ---------------------------------------------------------------------------
# Layout constants (lane-aligned padded dims)
# ---------------------------------------------------------------------------
_KRAW = 49 * 25        # 1225: im2col contraction dim per 2x2 pool-window slot
_KPAD = 1280           # 10 * 128 (lane-aligned contraction dim)
_NRAW = 49 * 8         # 392:  conv-output / flattened fc1-input dim
_NPAD = 512            # 4 * 128 (lane-aligned)
_NGROUPS = 4           # 2x2 pool-window slots


# ---------------------------------------------------------------------------
# Fused kernel.  Shapes per grid step (tb = batch tile):
#   p    : (tb, 4*1280) bf16  concatenated pool-grouped im2col patches
#   wbig : (1280, 512)  bf16  block-diagonal conv weight (49 copies of (25, 8)),
#                             zero-padded rows/cols
#   bcb  : (1, 512)     f32   conv bias tiled to (p, c) layout, zero-padded
#   w1p  : (512, 50)    bf16  fc1 weight, rows permuted to (p, c) flatten order
#   b1   : (1, 50)      f32
#   w2t  : (50, 10)     bf16
#   b2   : (1, 10)      f32
#   out  : (tb, 10)     f32   log-probabilities
# ---------------------------------------------------------------------------
def fused_forward_kernel(p_ref, wbig_ref, bcb_ref, w1_ref, b1_ref, w2_ref,
                         b2_ref, o_ref):
    wbig = wbig_ref[...]                                       # (1280, 512) bf16

    def conv_group(g):
        # (tb, 1280) bf16 @ (1280, 512) bf16 -> f32 accumulation on the MXU.
        # Column layout is already (p*8 + c) with p = pooled location.
        return jnp.dot(p_ref[:, g * _KPAD:(g + 1) * _KPAD], wbig,
                       preferred_element_type=jnp.float32)

    # 2x2 max-pool == running elementwise max over the 4 window positions.
    # Bias is identical across positions -> add once after the max;
    # relu(maxpool(x)) == maxpool(relu(x)) -> one relu after the max.
    s = conv_group(0)
    s = jnp.maximum(s, conv_group(1))
    s = jnp.maximum(s, conv_group(2))
    s = jnp.maximum(s, conv_group(3))
    h = jnp.maximum(s + bcb_ref[...], 0.0)                     # (tb, 512) f32

    z1 = jnp.dot(h.astype(jnp.bfloat16), w1_ref[...],
                 preferred_element_type=jnp.float32) + b1_ref[...]
    z1 = jnp.maximum(z1, 0.0)                                  # (tb, 50) f32
    z2 = jnp.dot(z1.astype(jnp.bfloat16), w2_ref[...],
                 preferred_element_type=jnp.float32) + b2_ref[...]   # (tb, 10)

    # numerically stable log_softmax
    m = jnp.max(z2, axis=-1, keepdims=True)
    lse = m + jnp.log(jnp.sum(jnp.exp(z2 - m), axis=-1, keepdims=True))
    o_ref[...] = z2 - lse


# ---------------------------------------------------------------------------
# Wrapper-side data / weight preparation (gather-free; weight prep amortized)
# ---------------------------------------------------------------------------
def _pool_grouped_patches(x):
    """x: (B, 1, 28, 28) f32 -> (B, 4*1280) bf16 concatenated patch matrix.

    For pool-window slot g = (gy, gx):
      patches[b, g*1280 + (ph*7 + pw)*25 + dy*5 + dx]
          = xpad[b, 4*ph + 2*gy + dy, 4*pw + 2*gx + dx]
    i.e. the 5x5 receptive field of conv-output location (2*ph+gy, 2*pw+gx)
    (conv: 5x5, stride 2, pad 2 -> 14x14; pool 2x2 -> 7x7).  Per-group columns
    1225..1279 are zero padding (lane alignment).  Built from 100 static
    strided slices — no gather.
    """
    B = x.shape[0]
    xp = jnp.pad(x[:, 0], ((0, 0), (2, 2), (2, 2)))            # (B, 32, 32)
    groups = []
    for gy in range(2):
        for gx in range(2):
            taps = []
            for dy in range(5):
                for dx in range(5):
                    r0 = 2 * gy + dy
                    c0 = 2 * gx + dx
                    s = jax.lax.slice(xp, (0, r0, c0),
                                      (B, r0 + 25, c0 + 25), (1, 4, 4))  # (B,7,7)
                    taps.append(s)
            g = jnp.stack(taps, axis=-1).reshape(B, _KRAW)     # (B, 1225)
            groups.append(jnp.pad(g, ((0, 0), (0, _KPAD - _KRAW))))
    return jnp.concatenate(groups, axis=-1).astype(jnp.bfloat16)  # (B, 5120)


def _prepare_weights(params):
    """One-time weight re-layout; absorbs all activation transposes/padding."""
    wc, bc, w1, b1, w2, b2 = params
    wc_mat = wc.reshape(8, 25).T                               # (25, 8): [dy*5+dx, c]
    eye49 = jnp.eye(49, dtype=wc.dtype)
    # Block-diagonal conv weight: Wbig[p*25 + k, q*8 + c] = (p == q) * wc_mat[k, c]
    wbig = jnp.einsum('pq,kc->pkqc', eye49, wc_mat).reshape(_KRAW, _NRAW)
    wbig = jnp.pad(wbig, ((0, _KPAD - _KRAW), (0, _NPAD - _NRAW)))   # (1280, 512)
    bcb = jnp.pad(jnp.tile(bc, 49), (0, _NPAD - _NRAW)).reshape(1, _NPAD)
    # fc1 weight permuted so that our (p, c) flatten order matches torch's (c, p):
    # w1p[p*8 + c, j] = w1[j, c*49 + p]; zero rows for the padded 392..511 cols of h.
    w1p = w1.reshape(50, 8, 49).transpose(2, 1, 0).reshape(_NRAW, 50)
    w1p = jnp.pad(w1p, ((0, _NPAD - _NRAW), (0, 0)))           # (512, 50)
    return (wbig.astype(jnp.bfloat16), bcb,
            w1p.astype(jnp.bfloat16), b1.reshape(1, 50),
            w2.T.astype(jnp.bfloat16), b2.reshape(1, 10))


@functools.partial(jax.jit, static_argnames=("tile_b",))
def minimal_overfit_forward(x, params, tile_b=512):
    """x: (B, 1, 28, 28) float32 -> (B, 10) log-probs (single fused Pallas kernel)."""
    B = x.shape[0]
    wbig, bcb, w1p, b1r, w2t, b2r = _prepare_weights(params)
    patches = _pool_grouped_patches(x)                         # (B, 5120) bf16

    # Batch tiling:
    #  * tiny batches (<=8) -> one block equal to the full array (still legal
    #    because the block equals the full sublane extent);
    #  * otherwise guarantee >=2 grid steps (v7x has 2 TensorCores and
    #    "parallel" only shards across them with >1 step), capped at tile_b,
    #    rounded to a multiple of 8 and padded so every block is (8,128)-legal.
    if B <= 8:
        tb = B
    else:
        tb = min(tile_b, ((B + 1) // 2 + 7) // 8 * 8)
    Bp = -(-B // tb) * tb
    if Bp != B:
        patches = jnp.pad(patches, ((0, Bp - B), (0, 0)))

    grid = (Bp // tb,)
    patch_spec = pl.BlockSpec((tb, _NGROUPS * _KPAD), lambda i: (i, 0))

    def const_spec(shape):
        # Constant block index -> weight stays VMEM-resident across grid steps.
        return pl.BlockSpec(shape, lambda i: (0, 0))

    out = pl.pallas_call(
        fused_forward_kernel,
        out_shape=jax.ShapeDtypeStruct((Bp, 10), jnp.float32),
        grid_spec=pltpu.PrefetchScalarGridSpec(
            num_scalar_prefetch=0,
            grid=grid,
            in_specs=[patch_spec,
                      const_spec((_KPAD, _NPAD)),
                      const_spec((1, _NPAD)),
                      const_spec((_NPAD, 50)),
                      const_spec((1, 50)),
                      const_spec((50, 10)),
                      const_spec((1, 10))],
            out_specs=pl.BlockSpec((tb, 10), lambda i: (i, 0)),
        ),
        compiler_params=pltpu.CompilerParams(
            dimension_semantics=("parallel",),
            vmem_limit_bytes=32 * 1024 * 1024),
    )(patches, wbig, bcb, w1p, b1r, w2t, b2r)
    return out[:B]


# ---------------------------------------------------------------------------
# Parameters + pure-JAX f32 reference (replicates the PyTorch forward exactly)
# ---------------------------------------------------------------------------
def init_params(key):
    ks = jax.random.split(key, 6)
    wc = jax.random.normal(ks[0], (8, 1, 5, 5), jnp.float32) * 0.2   # conv1.weight
    bc = jax.random.normal(ks[1], (8,), jnp.float32) * 0.1           # conv1.bias
    w1 = jax.random.normal(ks[2], (50, 392), jnp.float32) * 0.05     # fc1.weight
    b1 = jax.random.normal(ks[3], (50,), jnp.float32) * 0.1          # fc1.bias
    w2 = jax.random.normal(ks[4], (10, 50), jnp.float32) * 0.1       # fc2.weight
    b2 = jax.random.normal(ks[5], (10,), jnp.float32) * 0.1          # fc2.bias
    return wc, bc, w1, b1, w2, b2


def reference_forward(x, params):
    wc, bc, w1, b1, w2, b2 = params
    y = jax.lax.conv_general_dilated(
        x, wc, window_strides=(2, 2), padding=((2, 2), (2, 2)),
        dimension_numbers=("NCHW", "OIHW", "NCHW"))
    y = y + bc[None, :, None, None]
    y = jax.nn.relu(y)
    y = jax.lax.reduce_window(y, -jnp.inf, jax.lax.max,
                              (1, 1, 2, 2), (1, 1, 2, 2), "VALID")
    y = y.reshape(y.shape[0], -1)
    y = jax.nn.relu(y @ w1.T + b1)
    y = y @ w2.T + b2
    return jax.nn.log_softmax(y, axis=1)


if __name__ == "__main__":
    key = jax.random.PRNGKey(0)
    k_x, k_p = jax.random.split(key)
    params = init_params(k_p)

    # Small deterministic test (single grid step).
    B = 2
    x = jax.random.normal(k_x, (B, 1, 28, 28), jnp.float32)
    out = jax.block_until_ready(minimal_overfit_forward(x, params))
    ref = jax.block_until_ready(reference_forward(x, params))
    assert out.shape == (B, 10)
    # bf16 MXU operands with f32 accumulation -> looser tolerance vs f32 ref.
    assert jnp.max(jnp.abs(out - ref)) < 1e-1, "mismatch vs JAX reference"

    # Multi-tile test (exercises >=2 "parallel" grid steps + batch padding).
    B2 = 20
    x2 = jax.random.normal(jax.random.PRNGKey(1), (B2, 1, 28, 28), jnp.float32)
    out2 = jax.block_until_ready(minimal_overfit_forward(x2, params))
    ref2 = jax.block_until_ready(reference_forward(x2, params))
    assert out2.shape == (B2, 10)
    assert jnp.max(jnp.abs(out2 - ref2)) < 1e-1, "mismatch vs JAX reference (tiled)"

    print("KERNEL_OK")
</pallas_src>

<mosaic_0001>
module attributes {stable_mosaic.version = 11 : i64} {
  func.func @fused_forward_kernel(%arg0: i32, %arg1: memref<2x5120xbf16, #tpu.memory_space<vmem>>, %arg2: memref<1280x512xbf16, #tpu.memory_space<vmem>>, %arg3: memref<1x512xf32, #tpu.memory_space<vmem>>, %arg4: memref<512x50xbf16, #tpu.memory_space<vmem>>, %arg5: memref<1x50xf32, #tpu.memory_space<vmem>>, %arg6: memref<50x10xbf16, #tpu.memory_space<vmem>>, %arg7: memref<1x10xf32, #tpu.memory_space<vmem>>, %arg8: memref<2x10xf32, #tpu.memory_space<vmem>>) attributes {dimension_semantics = [#tpu.dimension_semantics<parallel>], iteration_bounds = array<i64: 1>, scalar_prefetch = 0 : i64, scratch_operands = 0 : i64, tpu.core_type = #tpu.core_type<tc>, window_params = [{transform_indices = @transform_0, window_bounds = array<i64: 2, 5120>}, {pipeline_mode = #tpu.pipeline_mode<synchronous>, transform_indices = @transform_1, window_bounds = array<i64: 1280, 512>}, {pipeline_mode = #tpu.pipeline_mode<synchronous>, transform_indices = @transform_2, window_bounds = array<i64: 1, 512>}, {pipeline_mode = #tpu.pipeline_mode<synchronous>, transform_indices = @transform_3, window_bounds = array<i64: 512, 50>}, {pipeline_mode = #tpu.pipeline_mode<synchronous>, transform_indices = @transform_4, window_bounds = array<i64: 1, 50>}, {pipeline_mode = #tpu.pipeline_mode<synchronous>, transform_indices = @transform_5, window_bounds = array<i64: 50, 10>}, {pipeline_mode = #tpu.pipeline_mode<synchronous>, transform_indices = @transform_6, window_bounds = array<i64: 1, 10>}, {transform_indices = @transform_7, window_bounds = array<i64: 2, 10>}]} {
    %c0 = arith.constant 0 : index
    %c0_0 = arith.constant 0 : index
    %0 = vector.load %arg2[%c0, %c0_0] : memref<1280x512xbf16, #tpu.memory_space<vmem>>, vector<1280x512xbf16>
    %c0_1 = arith.constant 0 : index
    %c0_2 = arith.constant 0 : index
    %1 = vector.load %arg1[%c0_1, %c0_2] : memref<2x5120xbf16, #tpu.memory_space<vmem>>, vector<2x1280xbf16>
    %cst = arith.constant dense<0.000000e+00> : vector<2x512xf32>
    %2 = tpu.matmul %1, %0, %cst {dimension_numbers = #tpu.dot_dimension_numbers<[1], [0], [0], [1], [0, 0, 1, 1], [], []>} : vector<2x1280xbf16>, vector<1280x512xbf16>, vector<2x512xf32> -> vector<2x512xf32>
    %c0_3 = arith.constant 0 : index
    %c1280 = arith.constant 1280 : index
    %3 = vector.load %arg1[%c0_3, %c1280] : memref<2x5120xbf16, #tpu.memory_space<vmem>>, vector<2x1280xbf16>
    %cst_4 = arith.constant dense<0.000000e+00> : vector<2x512xf32>
    %4 = tpu.matmul %3, %0, %cst_4 {dimension_numbers = #tpu.dot_dimension_numbers<[1], [0], [0], [1], [0, 0, 1, 1], [], []>} : vector<2x1280xbf16>, vector<1280x512xbf16>, vector<2x512xf32> -> vector<2x512xf32>
    %5 = arith.maximumf %2, %4 : vector<2x512xf32>
    %c0_5 = arith.constant 0 : index
    %c2560 = arith.constant 2560 : index
    %6 = vector.load %arg1[%c0_5, %c2560] : memref<2x5120xbf16, #tpu.memory_space<vmem>>, vector<2x1280xbf16>
    %cst_6 = arith.constant dense<0.000000e+00> : vector<2x512xf32>
    %7 = tpu.matmul %6, %0, %cst_6 {dimension_numbers = #tpu.dot_dimension_numbers<[1], [0], [0], [1], [0, 0, 1, 1], [], []>} : vector<2x1280xbf16>, vector<1280x512xbf16>, vector<2x512xf32> -> vector<2x512xf32>
    %8 = arith.maximumf %5, %7 : vector<2x512xf32>
    %c0_7 = arith.constant 0 : index
    %c3840 = arith.constant 3840 : index
    %9 = vector.load %arg1[%c0_7, %c3840] : memref<2x5120xbf16, #tpu.memory_space<vmem>>, vector<2x1280xbf16>
    %cst_8 = arith.constant dense<0.000000e+00> : vector<2x512xf32>
    %10 = tpu.matmul %9, %0, %cst_8 {dimension_numbers = #tpu.dot_dimension_numbers<[1], [0], [0], [1], [0, 0, 1, 1], [], []>} : vector<2x1280xbf16>, vector<1280x512xbf16>, vector<2x512xf32> -> vector<2x512xf32>
    %11 = arith.maximumf %8, %10 : vector<2x512xf32>
    %c0_9 = arith.constant 0 : index
    %c0_10 = arith.constant 0 : index
    %12 = vector.load %arg3[%c0_9, %c0_10] : memref<1x512xf32, #tpu.memory_space<vmem>>, vector<1x512xf32>
    %13 = vector.broadcast %12 : vector<1x512xf32> to vector<2x512xf32>
    %14 = arith.addf %11, %13 : vector<2x512xf32>
    %cst_11 = arith.constant 0.000000e+00 : f32
    %15 = vector.broadcast %cst_11 : f32 to vector<2x512xf32>
    %16 = arith.maximumf %14, %15 : vector<2x512xf32>
    %17 = arith.truncf %16 : vector<2x512xf32> to vector<2x512xbf16>
    %c0_12 = arith.constant 0 : index
    %c0_13 = arith.constant 0 : index
    %18 = vector.load %arg4[%c0_12, %c0_13] : memref<512x50xbf16, #tpu.memory_space<vmem>>, vector<512x50xbf16>
    %cst_14 = arith.constant dense<0.000000e+00> : vector<2x50xf32>
    %19 = tpu.matmul %17, %18, %cst_14 {dimension_numbers = #tpu.dot_dimension_numbers<[1], [0], [0], [1], [0, 0, 1, 1], [], []>} : vector<2x512xbf16>, vector<512x50xbf16>, vector<2x50xf32> -> vector<2x50xf32>
    %c0_15 = arith.constant 0 : index
    %c0_16 = arith.constant 0 : index
    %20 = vector.load %arg5[%c0_15, %c0_16] : memref<1x50xf32, #tpu.memory_space<vmem>>, vector<1x50xf32>
    %21 = vector.broadcast %20 : vector<1x50xf32> to vector<2x50xf32>
    %22 = arith.addf %19, %21 : vector<2x50xf32>
    %cst_17 = arith.constant 0.000000e+00 : f32
    %23 = vector.broadcast %cst_17 : f32 to vector<2x50xf32>
    %24 = arith.maximumf %22, %23 : vector<2x50xf32>
    %25 = arith.truncf %24 : vector<2x50xf32> to vector<2x50xbf16>
    %c0_18 = arith.constant 0 : index
    %c0_19 = arith.constant 0 : index
    %26 = vector.load %arg6[%c0_18, %c0_19] : memref<50x10xbf16, #tpu.memory_space<vmem>>, vector<50x10xbf16>
    %cst_20 = arith.constant dense<0.000000e+00> : vector<2x10xf32>
    %27 = tpu.matmul %25, %26, %cst_20 {dimension_numbers = #tpu.dot_dimension_numbers<[1], [0], [0], [1], [0, 0, 1, 1], [], []>} : vector<2x50xbf16>, vector<50x10xbf16>, vector<2x10xf32> -> vector<2x10xf32>
    %c0_21 = arith.constant 0 : index
    %c0_22 = arith.constant 0 : index
    %28 = vector.load %arg7[%c0_21, %c0_22] : memref<1x10xf32, #tpu.memory_space<vmem>>, vector<1x10xf32>
    %29 = vector.broadcast %28 : vector<1x10xf32> to vector<2x10xf32>
    %30 = arith.addf %27, %29 : vector<2x10xf32>
    %cst_23 = arith.constant dense<0xFF800000> : vector<2xf32>
    %31 = vector.multi_reduction <maximumf>, %30, %cst_23 [1] : vector<2x10xf32> to vector<2xf32>
    %32 = vector.shape_cast %31 : vector<2xf32> to vector<2x1xf32>
    %33 = vector.broadcast %32 : vector<2x1xf32> to vector<2x10xf32>
    %34 = arith.subf %30, %33 : vector<2x10xf32>
    %35 = math.exp %34 : vector<2x10xf32>
    %cst_24 = arith.constant dense<0.000000e+00> : vector<2xf32>
    %36 = vector.multi_reduction <add>, %35, %cst_24 [1] : vector<2x10xf32> to vector<2xf32>
    %37 = vector.shape_cast %36 : vector<2xf32> to vector<2x1xf32>
    %38 = math.log %37 : vector<2x1xf32>
    %39 = arith.addf %32, %38 : vector<2x1xf32>
    %40 = vector.broadcast %39 : vector<2x1xf32> to vector<2x10xf32>
    %41 = arith.subf %30, %40 : vector<2x10xf32>
    %c0_25 = arith.constant 0 : index
    %c0_26 = arith.constant 0 : index
    %42 = vector.load %arg8[%c0_25, %c0_26] : memref<2x10xf32, #tpu.memory_space<vmem>>, vector<2x10xf32>
    tpu.vector_store %arg8[%c0_25, %c0_26], %41 {strides = array<i32>} : memref<2x10xf32, #tpu.memory_space<vmem>>, vector<2x10xf32>,
    return
  }
  func.func @transform_0(%arg0: i32) -> (i32, i32) {
    %c0_i32 = arith.constant 0 : i32
    %c0_i32_0 = arith.constant 0 : i32
    return %arg0, %c0_i32 : i32, i32
  }
  func.func @transform_1(%arg0: i32) -> (i32, i32) {
    %c0_i32 = arith.constant 0 : i32
    %c0_i32_0 = arith.constant 0 : i32
    %c0_i32_1 = arith.constant 0 : i32
    return %c0_i32, %c0_i32_0 : i32, i32
  }
  func.func @transform_2(%arg0: i32) -> (i32, i32) {
    %c0_i32 = arith.constant 0 : i32
    %c0_i32_0 = arith.constant 0 : i32
    %c0_i32_1 = arith.constant 0 : i32
    return %c0_i32, %c0_i32_0 : i32, i32
  }
  func.func @transform_3(%arg0: i32) -> (i32, i32) {
    %c0_i32 = arith.constant 0 : i32
    %c0_i32_0 = arith.constant 0 : i32
    %c0_i32_1 = arith.constant 0 : i32
    return %c0_i32, %c0_i32_0 : i32, i32
  }
  func.func @transform_4(%arg0: i32) -> (i32, i32) {
    %c0_i32 = arith.constant 0 : i32
    %c0_i32_0 = arith.constant 0 : i32
    %c0_i32_1 = arith.constant 0 : i32
    return %c0_i32, %c0_i32_0 : i32, i32
  }
  func.func @transform_5(%arg0: i32) -> (i32, i32) {
    %c0_i32 = arith.constant 0 : i32
    %c0_i32_0 = arith.constant 0 : i32
    %c0_i32_1 = arith.constant 0 : i32
    return %c0_i32, %c0_i32_0 : i32, i32
  }
  func.func @transform_6(%arg0: i32) -> (i32, i32) {
    %c0_i32 = arith.constant 0 : i32
    %c0_i32_0 = arith.constant 0 : i32
    %c0_i32_1 = arith.constant 0 : i32
    return %c0_i32, %c0_i32_0 : i32, i32
  }
  func.func @transform_7(%arg0: i32) -> (i32, i32) {
    %c0_i32 = arith.constant 0 : i32
    %c0_i32_0 = arith.constant 0 : i32
    return %arg0, %c0_i32 : i32, i32
  }
}

</mosaic_0001>

<bundles_post_ra>
// kernel: tile.8
= control target key start
LH: loop header
LB: loop body
LE: loop exit
PB: predicated region body
PF: predicated region fallthrough
CT: control target
= control target key end

     0   :  { %s58_s0 = inlined_call_operand.vmem [shape: f32[8], index: 0, kind: input, shape index: {}]   ;;  %s59_s1 = inlined_call_operand.vmem [shape: f32[49,8], index: 1, kind: output, shape index: {}]  }
   0x1   :  { %v4_v0 = vld [vmem:[%s58_s0] ss:$0 sm:$0xff] }
   0x2   :  { %5 = vst [vmem:[%s59_s1] sm:$0xff] %v4_v0  ;;  %18 = vst [vmem:[%s59_s1 + $0x8] sm:$0xff] %v4_v0 }
   0x3   :  { %19 = vst [vmem:[%s59_s1 + $0x10] sm:$0xff] %v4_v0  ;;  %20 = vst [vmem:[%s59_s1 + $0x18] sm:$0xff] %v4_v0 }
   0x4   :  { %21 = vst [vmem:[%s59_s1 + $0x20] sm:$0xff] %v4_v0  ;;  %22 = vst [vmem:[%s59_s1 + $0x28] sm:$0xff] %v4_v0 }
   0x5   :  { %23 = vst [vmem:[%s59_s1 + $0x30] sm:$0xff] %v4_v0 }

// kernel: tile.9
= control target key start
LH: loop header
LB: loop body
LE: loop exit
PB: predicated region body
PF: predicated region fallthrough
CT: control target
= control target key end

     0   :  { %s11_s6 = smov 3  ;;  %vm15_vm0 = vcmask 1042434   ;;  %s33_s11 = smov 3  ;;  %vm6_vm1 = vcmask 1043458   ;;  %vm8_vm2 = vcmask 64512   ;;  %vm19_vm3 = vcmask 1048512   ;;  %s367_s0 = inlined_call_operand.vmem [shape: f32[49,8], index: 0, kind: input, shape index: {}]   ;;  %s368_s1 = inlined_call_operand.vmem [shape: f32[392], index: 1, kind: output, shape index: {}]  }
   0x1   :  { %v184_v0 = vld [vmem:[%s367_s0 + $0x2d] sm:$0x4]   ;;  %v188_v2 = vld [vmem:[%s367_s0 + $0x2b] sm:$0x4]   ;;  %s22_s16 = smov 3  ;;  %s228_s19 = smov 120  }
   0x2   :  { %v183_v1 = vld [vmem:[%s367_s0 + $0xf] ss:$16 sm:%s11_s6]   ;;  %v187_v4 = vld [vmem:[%s367_s0 + $0xd] ss:$16 sm:%s33_s11]   ;;  %s44_s22 = smov 3  ;;  %s229_s25 = smov 104  }
   0x3   :  { %v16_v3 = vsel %vm15_vm0, %v184_v0, %v183_v1  ;;  %v186_v5 = vld [vmem:[%s367_s0 + $0x2c] sm:$0x4]   ;;  %v38_v6 = vsel %vm15_vm0, %v188_v2, %v187_v4  ;;  %v190_v8 = vld [vmem:[%s367_s0 + $0x2a] sm:$0x4]   ;;  %s55_s28 = smov 3  ;;  %s66_s4 = smov 3 }
   0x4   :  { %17 = vrot.lane.b32.xlu0 %v16_v3, %s228_s19  ;;  %v185_v7 = vld [vmem:[%s367_s0 + $0xe] ss:$16 sm:%s22_s16]   ;;  %39 = vrot.lane.b32.xlu1 %v38_v6, %s229_s25  ;;  %s77_s9 = smov 3  ;;  %s230_s10 = smov 112   ;;  %vm30_vm4 = vcmask 982912   ;;  %vm41_vm5 = vcmask 917312  }
   0x5   :  { %v27_v9 = vsel %vm15_vm0, %v186_v5, %v185_v7  ;;  %v189_v10 = vld [vmem:[%s367_s0 + $0xc] ss:$16 sm:%s44_s22]   ;;  %v191_v12 = vld [vmem:[%s367_s0 + $0xb] ss:$16 sm:%s55_s28]   ;;  %s88_s11 = smov 3  ;;  %s231_s12 = smov 96  }
   0x6   :  { %v49_v11 = vsel %vm15_vm0, %v190_v8, %v189_v10  ;;  %v192_v13 = vld [vmem:[%s367_s0 + $0x29] sm:$0x4]   ;;  %v193_v14 = vld [vmem:[%s367_s0 + $0xa] ss:$16 sm:%s66_s4]   ;;  %v196_v19 = vld [vmem:[%s367_s0 + $0x27] sm:$0x4]  }
   0x7   :  { %v194_v15 = vld [vmem:[%s367_s0 + $0x28] sm:$0x4]   ;;  %v60_v16 = vsel %vm15_vm0, %v192_v13, %v191_v12  ;;  %v195_v18 = vld [vmem:[%s367_s0 + $0x9] ss:$16 sm:%s77_s9]   ;;  %v198_v21 = vld [vmem:[%s367_s0 + $0x26] sm:$0x4]  }
   0x8   :  { %28 = vrot.lane.b32.xlu0 %v27_v9, %s230_s10  ;;  %50 = vrot.lane.b32.xlu1 %v49_v11, %s231_s12  ;;  %v71_v17 = vsel %vm15_vm0, %v194_v15, %v193_v14  ;;  %v197_v20 = vld [vmem:[%s367_s0 + $0x8] ss:$16 sm:%s88_s11]   ;;  %s99_s21 = smov 3  ;;  %s232_s22 = smov 88   ;;  %v82_v22 = vsel %vm15_vm0, %v196_v19, %v195_v18  ;;  %vm52_vm6 = vcmask 851712   ;;  %vm63_vm7 = vcmask 786112  }
   0x9   :  { %s110_s23 = smov 3  ;;  %s233_s24 = smov 80   ;;  %v93_v23 = vsel %vm15_vm0, %v198_v21, %v197_v20  ;;  %v199_v24 = vld [vmem:[%s367_s0 + $0x7] ss:$16 sm:%s99_s21]   ;;  %v202_v27 = vld [vmem:[%s367_s0 + $0x24] sm:$0x4]  }
   0xa   :  { %v200_v25 = vld [vmem:[%s367_s0 + $0x25] sm:$0x4]   ;;  %v201_v26 = vld [vmem:[%s367_s0 + $0x6] ss:$16 sm:%s110_s23]   ;;  %s121_s4 = smov 3  ;;  %s132_s5 = smov 3 }
   0xb   :  { %s234_s6 = smov 72   ;;  %s2_s7 = smov 3  ;;  %v104_v28 = vsel %vm15_vm0, %v200_v25, %v199_v24  ;;  %v204_v29 = vld [vmem:[%s367_s0 + $0x23] sm:$0x4]   ;;  %v115_v31 = vsel %vm15_vm0, %v202_v27, %v201_v26  ;;  %v205_v34 = vld [vmem:[%s367_s0 + $0x4] ss:$16 sm:%s132_s5]  }
   0xc   :  { %61 = vrot.lane.b32.xlu0 %v60_v16, %s232_s22  ;;  %72 = vrot.lane.b32.xlu1 %v71_v17, %s233_s24  ;;  %s4_s8 = smov 12  ;;  %s235_s9 = smov 64   ;;  %v3_v30 = vld [vmem:[%s367_s0] ss:$16 sm:%s2_s7]   ;;  %vm74_vm8 = vcmask 720512   ;;  %vm85_vm9 = vcmask 654912  }
   0xd   :  { %v203_v32 = vld [vmem:[%s367_s0 + $0x5] ss:$16 sm:%s121_s4]   ;;  %v5_v33 = vld [vmem:[%s367_s0] ss:$16 sm:%s4_s8]   ;;  %s143_s22 = smov 3  ;;  %s236_s23 = smov 56  }
   0xe   :  { %v206_v35 = vld [vmem:[%s367_s0 + $0x22] sm:$0x4]   ;;  %v7_v36 = vsel %vm6_vm1, %v5_v33, %v3_v30  ;;  %s154_s24 = smov 3  ;;  %s237_s25 = smov 48   ;;  %v126_v37 = vsel %vm15_vm0, %v204_v29, %v203_v32  ;;  %v207_v39 = vld [vmem:[%s367_s0 + $0x3] ss:$16 sm:%s143_s22]  }
   0xf   :  { %9 = vst.msk [vmem:[#allocation0] sm:$0xf] %vm8_vm2, %v7_v36   ;;  %v137_v38 = vsel %vm15_vm0, %v206_v35, %v205_v34  ;;  %v208_v40 = vld [vmem:[%s367_s0 + $0x21] sm:$0x4]   ;;  %v209_v41 = vld [vmem:[%s367_s0 + $0x2] ss:$16 sm:%s154_s24]  }
  0x10   :  { %83 = vrot.lane.b32.xlu0 %v82_v22, %s234_s6  ;;  %94 = vrot.lane.b32.xlu1 %v93_v23, %s235_s9  ;;  %v210_v42 = vld [vmem:[%s367_s0 + $0x20] sm:$0x4]   ;;  %s165_s5 = smov 3  ;;  %s238_s6 = smov 40   ;;  %v148_v43 = vsel %vm15_vm0, %v208_v40, %v207_v39  ;;  %v212_v46 = vld [vmem:[%s367_s0 + $0x1f] sm:$0x4]  }
  0x11   :  { %s239_s7 = smov 32   ;;  %v159_v44 = vsel %vm15_vm0, %v210_v42, %v209_v41  ;;  %v211_v45 = vld [vmem:[%s367_s0 + $0x1] ss:$16 sm:%s165_s5]   ;;  %s240_s0 = smov 24   ;;  %vm96_vm10 = vcmask 589312   ;;  %vm107_vm11 = vcmask 523712  }
  0x12   :  { %s241_s12 = smov 16   ;;  %v170_v47 = vsel %vm15_vm0, %v212_v46, %v211_v45  ;;  %s242_s13 = smov 8   ;;  %vm118_vm12 = vcmask 458112   ;;  %vm129_vm13 = vcmask 392512   ;;  %vm140_vm14 = vcmask 326912  }
  0x13   :  { %vm151_vm15 = vcmask 261312   ;;  %vm162_vm0 = vcmask 195712   ;;  %vm173_vm1 = vcmask 130112  }
  0x14   :  { %105 = vrot.lane.b32.xlu0 %v104_v28, %s236_s23  ;;  %116 = vrot.lane.b32.xlu1 %v115_v31, %s237_s25 }
  0x18   :  { %127 = vrot.lane.b32.xlu0 %v126_v37, %s238_s6  ;;  %138 = vrot.lane.b32.xlu1 %v137_v38, %s239_s7 }
  0x1c   :  { %149 = vrot.lane.b32.xlu0 %v148_v43, %s240_s0  ;;  %160 = vrot.lane.b32.xlu1 %v159_v44, %s241_s12 }
  0x20   :  { %171 = vrot.lane.b32.xlu0 %v170_v47, %s242_s13 }
  0x76   :  { %v18_v48 = vpop.permute.xlu0 %17   ;;  %v40_v49 = vpop.permute.xlu1 %39  }
  0x77   :  { %20 = vst.msk [vmem:[#allocation0] sm:$0x7] %vm19_vm3, %v18_v48  }
  0x7a   :  { %v29_v50 = vpop.permute.xlu0 %28   ;;  %v51_v51 = vpop.permute.xlu1 %50  }
  0x7b   :  { %31 = vst.msk [vmem:[#allocation0] sm:$0x7] %vm30_vm4, %v29_v50  }
  0x7c   :  { %42 = vst.msk [vmem:[#allocation0] sm:$0x7] %vm41_vm5, %v40_v49  }
  0x7d   :  { %53 = vst.msk [vmem:[#allocation0] sm:$0x7] %vm52_vm6, %v51_v51  }
  0x7e   :  { %v62_v52 = vpop.permute.xlu0 %61   ;;  %v73_v53 = vpop.permute.xlu1 %72  }
  0x7f   :  { %64 = vst.msk [vmem:[#allocation0] sm:$0x7] %vm63_vm7, %v62_v52  }
  0x80   :  { %75 = vst.msk [vmem:[#allocation0] sm:$0x7] %vm74_vm8, %v73_v53  }
  0x82   :  { %v84_v54 = vpop.permute.xlu0 %83   ;;  %v95_v55 = vpop.permute.xlu1 %94  }
  0x83   :  { %86 = vst.msk [vmem:[#allocation0] sm:$0x7] %vm85_vm9, %v84_v54  }
  0x84   :  { %97 = vst.msk [vmem:[#allocation0] sm:$0x7] %vm96_vm10, %v95_v55  }
  0x86   :  { %v106_v56 = vpop.permute.xlu0 %105   ;;  %v117_v57 = vpop.permute.xlu1 %116  }
  0x87   :  { %108 = vst.msk [vmem:[#allocation0] sm:$0x7] %vm107_vm11, %v106_v56  }
  0x88   :  { %119 = vst.msk [vmem:[#allocation0] sm:$0x7] %vm118_vm12, %v117_v57  }
  0x8a   :  { %v128_v58 = vpop.permute.xlu0 %127   ;;  %v139_v59 = vpop.permute.xlu1 %138  }
  0x8b   :  { %130 = vst.msk [vmem:[#allocation0] sm:$0x7] %vm129_vm13, %v128_v58  }
  0x8c   :  { %141 = vst.msk [vmem:[#allocation0] sm:$0x7] %vm140_vm14, %v139_v59  }
  0x8e   :  { %v150_v60 = vpop.permute.xlu0 %149   ;;  %v161_v61 = vpop.permute.xlu1 %160  }
  0x8f   :  { %152 = vst.msk [vmem:[#allocation0] sm:$0x7] %vm151_vm15, %v150_v60  }
  0x90   :  { %163 = vst.msk [vmem:[#allocation0] sm:$0x7] %vm162_vm0, %v161_v61  }
  0x92   :  { %v172_v62 = vpop.permute.xlu0 %171  }
  0x93   :  { %174 = vst.msk [vmem:[#allocation0] sm:$0x7] %vm173_vm1, %v172_v62  }
  0x9a   :  { %v179_v63 = vld [vmem:[#allocation0] sm:$0xf] }
  0x9b   :  { %182 = vst [vmem:[%s368_s1] sm:$0xf] %v179_v63 }

// kernel: minimal_overfit_forward.1
= control target key start
LH: loop header
LB: loop body
LE: loop exit
PB: predicated region body
PF: predicated region fallthrough
CT: control target
= control target key end

     0   :  { %v5965_v36 = vmov 1966171168   ;;  %v356_v38 = vlaneseq  ;;  %s10831_s0 = inlined_call_operand.vmem [shape: bf16[2,5120], index: 0, kind: input, shape index: {}]   ;;  %s10832_s1 = inlined_call_operand.vmem [shape: bf16[1280,512], index: 1, kind: input, shape index: {}]   ;;  %s10833_s2 = inlined_call_operand.vmem [shape: f32[1,512], index: 2, kind: input, shape index: {}]   ;;  %s10834_s3 = inlined_call_operand.vmem [shape: bf16[512,50], index: 3, kind: input, shape index: {}]   ;;  %s10835_s4 = inlined_call_operand.vmem [shape: f32[1,50], index: 4, kind: input, shape index: {}]   ;;  %s10836_s5 = inlined_call_operand.vmem [shape: bf16[50,10], index: 5, kind: input, shape index: {}]   ;;  %s10837_s6 = inlined_call_operand.vmem [shape: f32[1,10], index: 6, kind: input, shape index: {}]   ;;  %s10838_s7 = inlined_call_operand.hbm [shape: f32[2,10], index: 7, kind: output, shape index: {}]  }
   0x1   :  { %v4859_v0 = vld [vmem:[%s10832_s1 + $0xe4] ss:$16 sps:$4 sm:$0xff]   ;;  %v4863_v2 = vld [vmem:[%s10832_s1 + $0xe0] ss:$16 sps:$4 sm:$0xff]   ;;  %v354_v37 = vunpack.c.l.s4 %v5965_v36 }
   0x2   :  { %v4861_v1 = vld [vmem:[%s10832_s1 + $0x2e4] ss:$16 sps:$4 sm:$0xff]   ;;  %2033 = vmatprep.subr.bf16.mxu0 %v4859_v0  ;;  %v4864_v3 = vld [vmem:[%s10832_s1 + $0x2e0] ss:$16 sps:$4 sm:$0xff]   ;;  %v6126_v43 = vshrl.u32 %v356_v38, 7 }
   0x3   :  { %2074 = vmatprep.subr.bf16.mxu1 %v4861_v1  ;;  %v4865_v4 = vld [vmem:[%s10832_s1 + $0xc4] ss:$16 sps:$4 sm:$0xff]   ;;  %2034 = vmatpush1.bf16.msra.mxu0 %v4863_v2  ;;  %v4869_v6 = vld [vmem:[%s10832_s1 + $0xc0] ss:$16 sps:$4 sm:$0xff]   ;;  %v355_v42 = vunpack.c.0.s8 %v354_v37 }
   0x4   :  { %2075 = vmatpush1.bf16.msra.mxu1 %v4864_v3  ;;  %v4867_v5 = vld [vmem:[%s10832_s1 + $0x2c4] ss:$16 sps:$4 sm:$0xff]   ;;  %2035 = vmatprep.subr.bf16.mxu0 %v4865_v4  ;;  %v4870_v7 = vld [vmem:[%s10832_s1 + $0x2c0] ss:$16 sps:$4 sm:$0xff]   ;;  %11153 = vst [vmem:[#allocation5_spill] sm:$0xff] %v6126_v43 }
   0x5   :  { %2076 = vmatprep.subr.bf16.mxu1 %v4867_v5  ;;  %v4871_v8 = vld [vmem:[%s10832_s1 + $0xa4] ss:$16 sps:$4 sm:$0xff]   ;;  %v4875_v10 = vld [vmem:[%s10832_s1 + $0xa0] ss:$16 sps:$4 sm:$0xff]   ;;  %v6144_v49 = vsub.s32 %v355_v42, %v6126_v43 }
   0x6   :  { %v4873_v9 = vld [vmem:[%s10832_s1 + $0x2a4] ss:$16 sps:$4 sm:$0xff]   ;;  %v4876_v11 = vld [vmem:[%s10832_s1 + $0x2a0] ss:$16 sps:$4 sm:$0xff]  }
   0x7   :  { %2036 = vmatpush1.bf16.msra.mxu0 %v4869_v6  ;;  %v4877_v12 = vld [vmem:[%s10832_s1 + $0x84] ss:$16 sps:$4 sm:$0xff]   ;;  %v4881_v14 = vld [vmem:[%s10832_s1 + $0x80] ss:$16 sps:$4 sm:$0xff]  }
   0x8   :  { %2077 = vmatpush1.bf16.msra.mxu1 %v4870_v7  ;;  %2037 = vmatprep.subr.bf16.mxu0 %v4871_v8  ;;  %v4879_v13 = vld [vmem:[%s10832_s1 + $0x284] ss:$16 sps:$4 sm:$0xff]   ;;  %v4882_v15 = vld [vmem:[%s10832_s1 + $0x280] ss:$16 sps:$4 sm:$0xff]  }
   0x9   :  { %2078 = vmatprep.subr.bf16.mxu1 %v4873_v9  ;;  %v4883_v16 = vld [vmem:[%s10832_s1 + $0x64] ss:$16 sps:$4 sm:$0xff]   ;;  %v4887_v18 = vld [vmem:[%s10832_s1 + $0x60] ss:$16 sps:$4 sm:$0xff]  }
   0xa   :  { %v4885_v17 = vld [vmem:[%s10832_s1 + $0x264] ss:$16 sps:$4 sm:$0xff]   ;;  %v4888_v19 = vld [vmem:[%s10832_s1 + $0x260] ss:$16 sps:$4 sm:$0xff]  }
   0xb   :  { %2038 = vmatpush1.bf16.msra.mxu0 %v4875_v10  ;;  %v4889_v20 = vld [vmem:[%s10832_s1 + $0x44] ss:$16 sps:$4 sm:$0xff]   ;;  %v4893_v22 = vld [vmem:[%s10832_s1 + $0x40] ss:$16 sps:$4 sm:$0xff]  }
   0xc   :  { %2079 = vmatpush1.bf16.msra.mxu1 %v4876_v11  ;;  %2039 = vmatprep.subr.bf16.mxu0 %v4877_v12  ;;  %v4891_v21 = vld [vmem:[%s10832_s1 + $0x244] ss:$16 sps:$4 sm:$0xff]   ;;  %v4894_v23 = vld [vmem:[%s10832_s1 + $0x240] ss:$16 sps:$4 sm:$0xff]  }
   0xd   :  { %2080 = vmatprep.subr.bf16.mxu1 %v4879_v13  ;;  %v4895_v24 = vld [vmem:[%s10832_s1 + $0x24] ss:$16 sps:$4 sm:$0xff]   ;;  %v4899_v26 = vld [vmem:[%s10832_s1 + $0x20] ss:$16 sps:$4 sm:$0xff]  }
   0xe   :  { %v4897_v25 = vld [vmem:[%s10832_s1 + $0x224] ss:$16 sps:$4 sm:$0xff]   ;;  %v4900_v27 = vld [vmem:[%s10832_s1 + $0x220] ss:$16 sps:$4 sm:$0xff]  }
   0xf   :  { %2040 = vmatpush1.bf16.msra.mxu0 %v4881_v14  ;;  %v4901_v28 = vld [vmem:[%s10832_s1 + $0x4] ss:$16 sps:$4 sm:$0xff]   ;;  %v4905_v30 = vld [vmem:[%s10832_s1] ss:$16 sps:$4 sm:$0xff]  }
  0x10   :  { %2081 = vmatpush1.bf16.msra.mxu1 %v4882_v15  ;;  %2041 = vmatprep.subr.bf16.mxu0 %v4883_v16  ;;  %v4903_v29 = vld [vmem:[%s10832_s1 + $0x204] ss:$16 sps:$4 sm:$0xff]   ;;  %v4906_v31 = vld [vmem:[%s10832_s1 + $0x200] ss:$16 sps:$4 sm:$0xff]  }
  0x11   :  { %2082 = vmatprep.subr.bf16.mxu1 %v4885_v17  ;;  %v4907_v32 = vld [vmem:[%s10832_s1 + $0x1e4] ss:$16 sps:$4 sm:$0xff]   ;;  %v4911_v34 = vld [vmem:[%s10832_s1 + $0x1e0] ss:$16 sps:$4 sm:$0xff]  }
  0x12   :  { %v4909_v33 = vld [vmem:[%s10832_s1 + $0x3e4] ss:$16 sps:$4 sm:$0xff]   ;;  %v4912_v35 = vld [vmem:[%s10832_s1 + $0x3e0] ss:$16 sps:$4 sm:$0xff]  }
  0x13   :  { %2042 = vmatpush1.bf16.msra.mxu0 %v4887_v18  ;;  %v4913_v39 = vld [vmem:[%s10832_s1 + $0x1c4] ss:$16 sps:$4 sm:$0xff]   ;;  %v4917_v41 = vld [vmem:[%s10832_s1 + $0x1c0] ss:$16 sps:$4 sm:$0xff]  }
  0x14   :  { %2083 = vmatpush1.bf16.msra.mxu1 %v4888_v19  ;;  %2043 = vmatprep.subr.bf16.mxu0 %v4889_v20  ;;  %v4915_v40 = vld [vmem:[%s10832_s1 + $0x3c4] ss:$16 sps:$4 sm:$0xff]   ;;  %v4918_v44 = vld [vmem:[%s10832_s1 + $0x3c0] ss:$16 sps:$4 sm:$0xff]  }
  0x15   :  { %2084 = vmatprep.subr.bf16.mxu1 %v4891_v21  ;;  %v4919_v45 = vld [vmem:[%s10832_s1 + $0x1a4] ss:$16 sps:$4 sm:$0xff]   ;;  %v4923_v47 = vld [vmem:[%s10832_s1 + $0x1a0] ss:$16 sps:$4 sm:$0xff]  }
  0x16   :  { %v4921_v46 = vld [vmem:[%s10832_s1 + $0x3a4] ss:$16 sps:$4 sm:$0xff]   ;;  %v4924_v48 = vld [vmem:[%s10832_s1 + $0x3a0] ss:$16 sps:$4 sm:$0xff]  }
  0x17   :  { %2044 = vmatpush1.bf16.msra.mxu0 %v4893_v22  ;;  %v4925_v50 = vld [vmem:[%s10832_s1 + $0x184] ss:$16 sps:$4 sm:$0xff]   ;;  %v4929_v53 = vld [vmem:[%s10832_s1 + $0x180] ss:$16 sps:$4 sm:$0xff]  }
  0x18   :  { %2085 = vmatpush1.bf16.msra.mxu1 %v4894_v23  ;;  %2045 = vmatprep.subr.bf16.mxu0 %v4895_v24  ;;  %v4927_v51 = vld [vmem:[%s10832_s1 + $0x384] ss:$16 sps:$4 sm:$0xff]   ;;  %v4930_v55 = vld [vmem:[%s10832_s1 + $0x380] ss:$16 sps:$4 sm:$0xff]  }
  0x19   :  { %2086 = vmatprep.subr.bf16.mxu1 %v4897_v25  ;;  %v348_v52 = vld [vmem:[%s10831_s0] sm:$0xff] }
  0x1a   :  { %v359_v54 = vrot.slane %v348_v52, %v6144_v49  ;;  %v4931_v56 = vld [vmem:[%s10832_s1 + $0x164] ss:$16 sps:$4 sm:$0xff]   ;;  %v4935_v59 = vld [vmem:[%s10832_s1 + $0x160] ss:$16 sps:$4 sm:$0xff]   ;;  %v352_v1 = vcombine.high %v348_v52, %v348_v52 }
  0x1b   :  { %2046 = vmatpush1.bf16.msra.mxu0 %v4899_v26  ;;  %v4933_v57 = vld [vmem:[%s10832_s1 + $0x364] ss:$16 sps:$4 sm:$0xff]   ;;  %v4936_v60 = vld [vmem:[%s10832_s1 + $0x360] ss:$16 sps:$4 sm:$0xff]  }
  0x1c   :  { %2087 = vmatpush1.bf16.msra.mxu1 %v4900_v27  ;;  %2047 = vmatprep.subr.bf16.mxu0 %v4901_v28  ;;  %v367_v58 = vcombine.high %v359_v54, %v359_v54  ;;  %v4937_v62 = vld [vmem:[%s10832_s1 + $0x144] ss:$16 sps:$4 sm:$0xff]   ;;  %v4941_v2 = vld [vmem:[%s10832_s1 + $0x140] ss:$16 sps:$4 sm:$0xff]   ;;  %v6202_v6 = vrot.slane %v352_v1, %v6144_v49  ;;  %v6222_v13 = vrot.slane %v359_v54, %v6144_v49 }
  0x1d   :  { %2088 = vmatprep.subr.bf16.mxu1 %v4903_v29  ;;  %v4939_v63 = vld [vmem:[%s10832_s1 + $0x344] ss:$16 sps:$4 sm:$0xff]   ;;  %v4942_v3 = vld [vmem:[%s10832_s1 + $0x340] ss:$16 sps:$4 sm:$0xff]  }
  0x1e   :  { %v6175_v61 = vrot.slane %v367_v58, %v6144_v49  ;;  %v4943_v4 = vld [vmem:[%s10832_s1 + $0x124] ss:$16 sps:$4 sm:$0xff]   ;;  %v4947_v7 = vld [vmem:[%s10832_s1 + $0x120] ss:$16 sps:$4 sm:$0xff]   ;;  %v368_v11 = vcombine.high %v6202_v6, %v6202_v6  ;;  %v6238_v18 = vcombine.high %v6222_v13, %v6222_v13 }
  0x1f   :  { %2048 = vmatpush1.bf16.msra.mxu0 %v4905_v30  ;;  %v4945_v5 = vld [vmem:[%s10832_s1 + $0x324] ss:$16 sps:$4 sm:$0xff]   ;;  %v4948_v8 = vld [vmem:[%s10832_s1 + $0x320] ss:$16 sps:$4 sm:$0xff]  }
  0x20   :  { %2089 = vmatpush1.bf16.msra.mxu1 %v4906_v31  ;;  %2049 = vmatprep.subr.bf16.mxu0 %v4907_v32  ;;  %v6185_v0 = vcombine.high %v6175_v61, %v6175_v61  ;;  %v4949_v9 = vld [vmem:[%s10832_s1 + $0x104] ss:$16 sps:$4 sm:$0xff]   ;;  %v4953_v12 = vld [vmem:[%s10832_s1 + $0x100] ss:$16 sps:$4 sm:$0xff]   ;;  %v6234_v17 = vrot.slane %v368_v11, %v6144_v49 }
  0x21   :  { %2090 = vmatprep.subr.bf16.mxu1 %v4909_v33  ;;  %2065 = vmatprep.mubr.bf16.mxu0 %v6175_v61  ;;  %v4951_v10 = vld [vmem:[%s10832_s1 + $0x304] ss:$16 sps:$4 sm:$0xff]   ;;  %v4954_v14 = vld [vmem:[%s10832_s1 + $0x300] ss:$16 sps:$4 sm:$0xff]  }
  0x22   :  { %2106 = vmatprep.mubr.bf16.mxu1 %v6185_v0  ;;  %v4955_v15 = vld [vmem:[%s10832_s1 + $0x4e4] ss:$16 sps:$4 sm:$0xff]   ;;  %v4959_v19 = vld [vmem:[%s10832_s1 + $0x4e0] ss:$16 sps:$4 sm:$0xff]   ;;  %v6254_v23 = vcombine.high %v6234_v17, %v6234_v17 }
  0x23   :  { %2050 = vmatpush2.bf16.msra.mxu0 %v4911_v34  ;;  %v4957_v16 = vld [vmem:[%s10832_s1 + $0x6e4] ss:$16 sps:$4 sm:$0xff]   ;;  %v4960_v20 = vld [vmem:[%s10832_s1 + $0x6e0] ss:$16 sps:$4 sm:$0xff]  }
  0x24   :  { %2091 = vmatpush2.bf16.msra.mxu1 %v4912_v35  ;;  %2051 = vmatprep.subr.bf16.mxu0 %v4913_v39  ;;  %v4961_v21 = vld [vmem:[%s10832_s1 + $0x4c4] ss:$16 sps:$4 sm:$0xff]   ;;  %v4965_v24 = vld [vmem:[%s10832_s1 + $0x4c0] ss:$16 sps:$4 sm:$0xff]  }
  0x25   :  { %2092 = vmatprep.subr.bf16.mxu1 %v4915_v40  ;;  %v4963_v22 = vld [vmem:[%s10832_s1 + $0x6c4] ss:$16 sps:$4 sm:$0xff]   ;;  %v4966_v25 = vld [vmem:[%s10832_s1 + $0x6c0] ss:$16 sps:$4 sm:$0xff]  }
  0x26   :  { %v4967_v26 = vld [vmem:[%s10832_s1 + $0x4a4] ss:$16 sps:$4 sm:$0xff]   ;;  %v4971_v28 = vld [vmem:[%s10832_s1 + $0x4a0] ss:$16 sps:$4 sm:$0xff]  }
  0x27   :  { %2052 = vmatpush2.bf16.msra.mxu0 %v4917_v41  ;;  %v4969_v27 = vld [vmem:[%s10832_s1 + $0x6a4] ss:$16 sps:$4 sm:$0xff]   ;;  %v4972_v29 = vld [vmem:[%s10832_s1 + $0x6a0] ss:$16 sps:$4 sm:$0xff]  }
  0x28   :  { %2093 = vmatpush2.bf16.msra.mxu1 %v4918_v44  ;;  %2053 = vmatprep.subr.bf16.mxu0 %v4919_v45  ;;  %v4973_v30 = vld [vmem:[%s10832_s1 + $0x484] ss:$16 sps:$4 sm:$0xff]   ;;  %v4977_v32 = vld [vmem:[%s10832_s1 + $0x480] ss:$16 sps:$4 sm:$0xff]  }
  0x29   :  { %2094 = vmatprep.subr.bf16.mxu1 %v4921_v46  ;;  %v4975_v31 = vld [vmem:[%s10832_s1 + $0x684] ss:$16 sps:$4 sm:$0xff]   ;;  %v4978_v33 = vld [vmem:[%s10832_s1 + $0x680] ss:$16 sps:$4 sm:$0xff]  }
  0x2a   :  { %v4979_v34 = vld [vmem:[%s10832_s1 + $0x464] ss:$16 sps:$4 sm:$0xff]   ;;  %v4983_v36 = vld [vmem:[%s10832_s1 + $0x460] ss:$16 sps:$4 sm:$0xff]  }
  0x2b   :  { %2054 = vmatpush2.bf16.msra.mxu0 %v4923_v47  ;;  %v4981_v35 = vld [vmem:[%s10832_s1 + $0x664] ss:$16 sps:$4 sm:$0xff]   ;;  %v4984_v37 = vld [vmem:[%s10832_s1 + $0x660] ss:$16 sps:$4 sm:$0xff]  }
  0x2c   :  { %2095 = vmatpush2.bf16.msra.mxu1 %v4924_v48  ;;  %2055 = vmatprep.subr.bf16.mxu0 %v4925_v50  ;;  %v4985_v38 = vld [vmem:[%s10832_s1 + $0x444] ss:$16 sps:$4 sm:$0xff]   ;;  %v4989_v40 = vld [vmem:[%s10832_s1 + $0x440] ss:$16 sps:$4 sm:$0xff]  }
  0x2d   :  { %2096 = vmatprep.subr.bf16.mxu1 %v4927_v51  ;;  %v4987_v39 = vld [vmem:[%s10832_s1 + $0x644] ss:$16 sps:$4 sm:$0xff]   ;;  %v4990_v41 = vld [vmem:[%s10832_s1 + $0x640] ss:$16 sps:$4 sm:$0xff]  }
  0x2e   :  { %v4991_v42 = vld [vmem:[%s10832_s1 + $0x424] ss:$16 sps:$4 sm:$0xff]   ;;  %v4995_v45 = vld [vmem:[%s10832_s1 + $0x420] ss:$16 sps:$4 sm:$0xff]  }
  0x2f   :  { %2056 = vmatpush2.bf16.msra.mxu0 %v4929_v53  ;;  %v4993_v44 = vld [vmem:[%s10832_s1 + $0x624] ss:$16 sps:$4 sm:$0xff]   ;;  %v4996_v46 = vld [vmem:[%s10832_s1 + $0x620] ss:$16 sps:$4 sm:$0xff]  }
  0x30   :  { %2097 = vmatpush2.bf16.msra.mxu1 %v4930_v55  ;;  %2057 = vmatprep.subr.bf16.mxu0 %v4931_v56  ;;  %v4997_v47 = vld [vmem:[%s10832_s1 + $0x404] ss:$16 sps:$4 sm:$0xff]   ;;  %v5001_v50 = vld [vmem:[%s10832_s1 + $0x400] ss:$16 sps:$4 sm:$0xff]  }
  0x31   :  { %2098 = vmatprep.subr.bf16.mxu1 %v4933_v57  ;;  %v4999_v48 = vld [vmem:[%s10832_s1 + $0x604] ss:$16 sps:$4 sm:$0xff]   ;;  %v5002_v51 = vld [vmem:[%s10832_s1 + $0x600] ss:$16 sps:$4 sm:$0xff]  }
  0x32   :  { %v5003_v52 = vld [vmem:[%s10832_s1 + $0x5e4] ss:$16 sps:$4 sm:$0xff]   ;;  %v5007_v54 = vld [vmem:[%s10832_s1 + $0x5e0] ss:$16 sps:$4 sm:$0xff]  }
  0x33   :  { %2058 = vmatpush2.bf16.msra.mxu0 %v4935_v59  ;;  %v5005_v53 = vld [vmem:[%s10832_s1 + $0x7e4] ss:$16 sps:$4 sm:$0xff]   ;;  %v5008_v55 = vld [vmem:[%s10832_s1 + $0x7e0] ss:$16 sps:$4 sm:$0xff]  }
  0x34   :  { %2099 = vmatpush2.bf16.msra.mxu1 %v4936_v60  ;;  %2059 = vmatprep.subr.bf16.mxu0 %v4937_v62  ;;  %v5009_v56 = vld [vmem:[%s10832_s1 + $0x5c4] ss:$16 sps:$4 sm:$0xff]   ;;  %v5013_v58 = vld [vmem:[%s10832_s1 + $0x5c0] ss:$16 sps:$4 sm:$0xff]  }
  0x35   :  { %2100 = vmatprep.subr.bf16.mxu1 %v4939_v63  ;;  %v5011_v57 = vld [vmem:[%s10832_s1 + $0x7c4] ss:$16 sps:$4 sm:$0xff]   ;;  %v5014_v59 = vld [vmem:[%s10832_s1 + $0x7c0] ss:$16 sps:$4 sm:$0xff]  }
  0x36   :  { %v5015_v60 = vld [vmem:[%s10832_s1 + $0x5a4] ss:$16 sps:$4 sm:$0xff]   ;;  %v5019_v63 = vld [vmem:[%s10832_s1 + $0x5a0] ss:$16 sps:$4 sm:$0xff]  }
  0x37   :  { %2060 = vmatpush2.bf16.msra.mxu0 %v4941_v2  ;;  %v5017_v62 = vld [vmem:[%s10832_s1 + $0x7a4] ss:$16 sps:$4 sm:$0xff]   ;;  %v5020_v1 = vld [vmem:[%s10832_s1 + $0x7a0] ss:$16 sps:$4 sm:$0xff]  }
  0x38   :  { %2101 = vmatpush2.bf16.msra.mxu1 %v4942_v3  ;;  %2061 = vmatprep.subr.bf16.mxu0 %v4943_v4  ;;  %v5021_v2 = vld [vmem:[%s10832_s1 + $0x584] ss:$16 sps:$4 sm:$0xff]   ;;  %v5025_v4 = vld [vmem:[%s10832_s1 + $0x580] ss:$16 sps:$4 sm:$0xff]  }
  0x39   :  { %2102 = vmatprep.subr.bf16.mxu1 %v4945_v5  ;;  %v5023_v3 = vld [vmem:[%s10832_s1 + $0x784] ss:$16 sps:$4 sm:$0xff]   ;;  %v5026_v5 = vld [vmem:[%s10832_s1 + $0x780] ss:$16 sps:$4 sm:$0xff]  }
  0x3a   :  { %v5033_v11 = vld [vmem:[%s10832_s1 + $0x544] ss:$16 sps:$4 sm:$0xff]  }
  0x3b   :  { %2062 = vmatpush2.bf16.msra.mxu0 %v4947_v7  ;;  %v5027_v7 = vld [vmem:[%s10832_s1 + $0x564] ss:$16 sps:$4 sm:$0xff]  }
  0x3c   :  { %2103 = vmatpush2.bf16.msra.mxu1 %v4948_v8  ;;  %2063 = vmatprep.subr.bf16.mxu0 %v4949_v9  ;;  %v5029_v8 = vld [vmem:[%s10832_s1 + $0x764] ss:$16 sps:$4 sm:$0xff]   ;;  %v5031_v9 = vld [vmem:[%s10832_s1 + $0x560] ss:$16 sps:$4 sm:$0xff]  }
  0x3d   :  { %2104 = vmatprep.subr.bf16.mxu1 %v4951_v10  ;;  %v5032_v10 = vld [vmem:[%s10832_s1 + $0x760] ss:$16 sps:$4 sm:$0xff]  }
  0x3f   :  { %2064 = vmatpush2.bf16.msra.mxu0 %v4953_v12  ;;  %v5035_v12 = vld [vmem:[%s10832_s1 + $0x744] ss:$16 sps:$4 sm:$0xff]  }
  0x40   :  { %2105 = vmatpush2.bf16.msra.mxu1 %v4954_v14  ;;  %2115 = vmatprep.subr.bf16.mxu0 %v4955_v15  ;;  %v5037_v14 = vld [vmem:[%s10832_s1 + $0x540] ss:$16 sps:$4 sm:$0xff]  }
  0x41   :  { %2156 = vmatprep.subr.bf16.mxu1 %v4957_v16  ;;  %v5038_v15 = vld [vmem:[%s10832_s1 + $0x740] ss:$16 sps:$4 sm:$0xff]   ;;  %v5039_v16 = vld [vmem:[%s10832_s1 + $0x524] ss:$16 sps:$4 sm:$0xff]  }
  0x42   :  { %2066 = vmatmul.mubr.bf16.vlgmr.msra.gmra.mxu0 %v6222_v13 }
  0x43   :  { %2107 = vmatmul.mubr.bf16.vlgmr.msra.gmra.mxu1 %v6238_v18  ;;  %2116 = vmatpush1.bf16.msra.mxu0 %v4959_v19  ;;  %v5041_v19 = vld [vmem:[%s10832_s1 + $0x724] ss:$16 sps:$4 sm:$0xff]  }
  0x44   :  { %2157 = vmatpush1.bf16.msra.mxu1 %v4960_v20  ;;  %2117 = vmatprep.subr.bf16.mxu0 %v4961_v21  ;;  %v5043_v20 = vld [vmem:[%s10832_s1 + $0x520] ss:$16 sps:$4 sm:$0xff]  }
  0x45   :  { %2158 = vmatprep.subr.bf16.mxu1 %v4963_v22  ;;  %2147 = vmatprep.mubr.bf16.mxu0 %v6234_v17  ;;  %v5044_v21 = vld [vmem:[%s10832_s1 + $0x720] ss:$16 sps:$4 sm:$0xff]   ;;  %v5045_v22 = vld [vmem:[%s10832_s1 + $0x504] ss:$16 sps:$4 sm:$0xff]  }
  0x46   :  { %2188 = vmatprep.mubr.bf16.mxu1 %v6254_v23 }
  0x47   :  { %2118 = vmatpush1.bf16.msra.mxu0 %v4965_v24  ;;  %v5047_v24 = vld [vmem:[%s10832_s1 + $0x704] ss:$16 sps:$4 sm:$0xff]  }
  0x48   :  { %2159 = vmatpush1.bf16.msra.mxu1 %v4966_v25  ;;  %2119 = vmatprep.subr.bf16.mxu0 %v4967_v26  ;;  %v5049_v25 = vld [vmem:[%s10832_s1 + $0x500] ss:$16 sps:$4 sm:$0xff]   ;;  %v6433_v26 = vrot.slane %v6202_v6, %v6144_v49 }
  0x49   :  { %2160 = vmatprep.subr.bf16.mxu1 %v4969_v27  ;;  %v5050_v27 = vld [vmem:[%s10832_s1 + $0x700] ss:$16 sps:$4 sm:$0xff]  }
  0x4a   :  { %v6446_v6 = vcombine.high %v6433_v26, %v6433_v26 }
  0x4b   :  { %2120 = vmatpush1.bf16.msra.mxu0 %v4971_v28  ;;  %v5052_v28 = vld [vmem:[%s10832_s1 + $0x8e4] ss:$16 sps:$4 sm:$0xff]  }
  0x4c   :  { %2161 = vmatpush1.bf16.msra.mxu1 %v4972_v29  ;;  %2121 = vmatprep.subr.bf16.mxu0 %v4973_v30  ;;  %v5054_v29 = vld [vmem:[%s10832_s1 + $0xec] ss:$16 sps:$4 sm:$0xff]   ;;  %v5056_v30 = vld [vmem:[%s10832_s1 + $0x8e0] ss:$16 sps:$4 sm:$0xff]  }
  0x4d   :  { %2162 = vmatprep.subr.bf16.mxu1 %v4975_v31  ;;  %v5057_v31 = vld [vmem:[%s10832_s1 + $0xe8] ss:$16 sps:$4 sm:$0xff]  }
  0x4f   :  { %2122 = vmatpush1.bf16.msra.mxu0 %v4977_v32  ;;  %v5058_v32 = vld [vmem:[%s10832_s1 + $0x8c4] ss:$16 sps:$4 sm:$0xff]  }
  0x50   :  { %2163 = vmatpush1.bf16.msra.mxu1 %v4978_v33  ;;  %2123 = vmatprep.subr.bf16.mxu0 %v4979_v34  ;;  %v6460_v33 = vld.sshfl [vmem:[%s10831_s0 + $0x8] sm:$0x11 pattern:$0x75316420]  ;;  %v5060_v34 = vld [vmem:[%s10832_s1 + $0xcc] ss:$16 sps:$4 sm:$0xff]  }
  0x51   :  { %2164 = vmatprep.subr.bf16.mxu1 %v4981_v35  ;;  %v408_v35 = vcombine.high %v6460_v33, %v6460_v33 }
  0x53   :  { %2124 = vmatpush1.bf16.msra.mxu0 %v4983_v36  ;;  %v5062_v36 = vld [vmem:[%s10832_s1 + $0x8c0] ss:$16 sps:$4 sm:$0xff]  }
  0x54   :  { %2165 = vmatpush1.bf16.msra.mxu1 %v4984_v37  ;;  %2125 = vmatprep.subr.bf16.mxu0 %v4985_v38  ;;  %v6473_v37 = vrot.slane %v408_v35, %v6144_v49  ;;  %v5063_v38 = vld [vmem:[%s10832_s1 + $0xc8] ss:$16 sps:$4 sm:$0xff]   ;;  %v5140_v35 = vld [vmem:[%s10832_s1 + $0x920] ss:$16 sps:$4 sm:$0xff]  }
  0x55   :  { %2166 = vmatprep.subr.bf16.mxu1 %v4987_v39  ;;  %v5064_v39 = vld [vmem:[%s10832_s1 + $0x8a4] ss:$16 sps:$4 sm:$0xff]  }
  0x57   :  { %2126 = vmatpush1.bf16.msra.mxu0 %v4989_v40  ;;  %v5066_v40 = vld [vmem:[%s10832_s1 + $0xac] ss:$16 sps:$4 sm:$0xff]  }
  0x58   :  { %2167 = vmatpush1.bf16.msra.mxu1 %v4990_v41  ;;  %2127 = vmatprep.subr.bf16.mxu0 %v4991_v42  ;;  %v5068_v41 = vld [vmem:[%s10832_s1 + $0x8a0] ss:$16 sps:$4 sm:$0xff]   ;;  %v5069_v42 = vld [vmem:[%s10832_s1 + $0xa8] ss:$16 sps:$4 sm:$0xff]  }
  0x59   :  { %2168 = vmatprep.subr.bf16.mxu1 %v4993_v44  ;;  %v5070_v44 = vld [vmem:[%s10832_s1 + $0x884] ss:$16 sps:$4 sm:$0xff]  }
  0x5b   :  { %2128 = vmatpush1.bf16.msra.mxu0 %v4995_v45  ;;  %v5074_v45 = vld [vmem:[%s10832_s1 + $0x880] ss:$16 sps:$4 sm:$0xff]  }
  0x5c   :  { %2169 = vmatpush1.bf16.msra.mxu1 %v4996_v46  ;;  %2129 = vmatprep.subr.bf16.mxu0 %v4997_v47  ;;  %v5075_v46 = vld [vmem:[%s10832_s1 + $0x88] ss:$16 sps:$4 sm:$0xff]   ;;  %v5076_v47 = vld [vmem:[%s10832_s1 + $0x864] ss:$16 sps:$4 sm:$0xff]  }
  0x5d   :  { %2170 = vmatprep.subr.bf16.mxu1 %v4999_v48  ;;  %v5078_v48 = vld [vmem:[%s10832_s1 + $0x6c] ss:$16 sps:$4 sm:$0xff]  }
  0x5f   :  { %2130 = vmatpush1.bf16.msra.mxu0 %v5001_v50  ;;  %v5080_v50 = vld [vmem:[%s10832_s1 + $0x860] ss:$16 sps:$4 sm:$0xff]  }
  0x60   :  { %2171 = vmatpush1.bf16.msra.mxu1 %v5002_v51  ;;  %2131 = vmatprep.subr.bf16.mxu0 %v5003_v52  ;;  %v5081_v51 = vld [vmem:[%s10832_s1 + $0x68] ss:$16 sps:$4 sm:$0xff]   ;;  %v5082_v52 = vld [vmem:[%s10832_s1 + $0x844] ss:$16 sps:$4 sm:$0xff]  }
  0x61   :  { %2172 = vmatprep.subr.bf16.mxu1 %v5005_v53  ;;  %v5084_v53 = vld [vmem:[%s10832_s1 + $0x4c] ss:$16 sps:$4 sm:$0xff]  }
  0x63   :  { %2132 = vmatpush2.bf16.msra.mxu0 %v5007_v54  ;;  %v5086_v54 = vld [vmem:[%s10832_s1 + $0x840] ss:$16 sps:$4 sm:$0xff]  }
  0x64   :  { %2173 = vmatpush2.bf16.msra.mxu1 %v5008_v55  ;;  %2133 = vmatprep.subr.bf16.mxu0 %v5009_v56  ;;  %v5087_v55 = vld [vmem:[%s10832_s1 + $0x48] ss:$16 sps:$4 sm:$0xff]   ;;  %v5088_v56 = vld [vmem:[%s10832_s1 + $0x824] ss:$16 sps:$4 sm:$0xff]  }
  0x65   :  { %2174 = vmatprep.subr.bf16.mxu1 %v5011_v57  ;;  %v5090_v57 = vld [vmem:[%s10832_s1 + $0x2c] ss:$16 sps:$4 sm:$0xff]  }
  0x67   :  { %2134 = vmatpush2.bf16.msra.mxu0 %v5013_v58  ;;  %v5092_v58 = vld [vmem:[%s10832_s1 + $0x820] ss:$16 sps:$4 sm:$0xff]  }
  0x68   :  { %2175 = vmatpush2.bf16.msra.mxu1 %v5014_v59  ;;  %2135 = vmatprep.subr.bf16.mxu0 %v5015_v60  ;;  %v5093_v59 = vld [vmem:[%s10832_s1 + $0x28] ss:$16 sps:$4 sm:$0xff]   ;;  %v5094_v60 = vld [vmem:[%s10832_s1 + $0x804] ss:$16 sps:$4 sm:$0xff]  }
  0x69   :  { %2176 = vmatprep.subr.bf16.mxu1 %v5017_v62  ;;  %v5096_v62 = vld [vmem:[%s10832_s1 + $0xc] ss:$16 sps:$4 sm:$0xff]  }
  0x6b   :  { %2136 = vmatpush2.bf16.msra.mxu0 %v5019_v63  ;;  %v5098_v63 = vld [vmem:[%s10832_s1 + $0x800] ss:$16 sps:$4 sm:$0xff]  }
  0x6c   :  { %2177 = vmatpush2.bf16.msra.mxu1 %v5020_v1  ;;  %2137 = vmatprep.subr.bf16.mxu0 %v5021_v2  ;;  %v5099_v1 = vld [vmem:[%s10832_s1 + $0x8] ss:$16 sps:$4 sm:$0xff]   ;;  %v5100_v2 = vld [vmem:[%s10832_s1 + $0x9e4] ss:$16 sps:$4 sm:$0xff]  }
  0x6d   :  { %2178 = vmatprep.subr.bf16.mxu1 %v5023_v3  ;;  %v5102_v3 = vld [vmem:[%s10832_s1 + $0x1ec] ss:$16 sps:$4 sm:$0xff]  }
  0x6f   :  { %2138 = vmatpush2.bf16.msra.mxu0 %v5025_v4  ;;  %v5104_v4 = vld [vmem:[%s10832_s1 + $0x9e0] ss:$16 sps:$4 sm:$0xff]  }
  0x70   :  { %2179 = vmatpush2.bf16.msra.mxu1 %v5026_v5  ;;  %2139 = vmatprep.subr.bf16.mxu0 %v5027_v7  ;;  %v5105_v5 = vld [vmem:[%s10832_s1 + $0x1e8] ss:$16 sps:$4 sm:$0xff]   ;;  %v5106_v7 = vld [vmem:[%s10832_s1 + $0x9c4] ss:$16 sps:$4 sm:$0xff]  }
  0x71   :  { %2180 = vmatprep.subr.bf16.mxu1 %v5029_v8  ;;  %v5108_v8 = vld [vmem:[%s10832_s1 + $0x1cc] ss:$16 sps:$4 sm:$0xff]  }
  0x73   :  { %2140 = vmatpush2.bf16.msra.mxu0 %v5031_v9  ;;  %v5110_v9 = vld [vmem:[%s10832_s1 + $0x9c0] ss:$16 sps:$4 sm:$0xff]  }
  0x74   :  { %2181 = vmatpush2.bf16.msra.mxu1 %v5032_v10  ;;  %2141 = vmatprep.subr.bf16.mxu0 %v5033_v11  ;;  %v5111_v10 = vld [vmem:[%s10832_s1 + $0x1c8] ss:$16 sps:$4 sm:$0xff]   ;;  %v5112_v11 = vld [vmem:[%s10832_s1 + $0x9a4] ss:$16 sps:$4 sm:$0xff]  }
  0x75   :  { %2182 = vmatprep.subr.bf16.mxu1 %v5035_v12  ;;  %v5114_v12 = vld [vmem:[%s10832_s1 + $0x1ac] ss:$16 sps:$4 sm:$0xff]  }
  0x77   :  { %2142 = vmatpush2.bf16.msra.mxu0 %v5037_v14  ;;  %v5116_v14 = vld [vmem:[%s10832_s1 + $0x9a0] ss:$16 sps:$4 sm:$0xff]  }
  0x78   :  { %2183 = vmatpush2.bf16.msra.mxu1 %v5038_v15  ;;  %2143 = vmatprep.subr.bf16.mxu0 %v5039_v16  ;;  %v5117_v15 = vld [vmem:[%s10832_s1 + $0x1a8] ss:$16 sps:$4 sm:$0xff]   ;;  %v5118_v16 = vld [vmem:[%s10832_s1 + $0x984] ss:$16 sps:$4 sm:$0xff]  }
  0x79   :  { %2184 = vmatprep.subr.bf16.mxu1 %v5041_v19  ;;  %v5120_v19 = vld [vmem:[%s10832_s1 + $0x18c] ss:$16 sps:$4 sm:$0xff]  }
  0x7b   :  { %2144 = vmatpush2.bf16.msra.mxu0 %v5043_v20  ;;  %v5122_v20 = vld [vmem:[%s10832_s1 + $0x980] ss:$16 sps:$4 sm:$0xff]  }
  0x7c   :  { %2185 = vmatpush2.bf16.msra.mxu1 %v5044_v21  ;;  %2145 = vmatprep.subr.bf16.mxu0 %v5045_v22  ;;  %v5123_v21 = vld [vmem:[%s10832_s1 + $0x188] ss:$16 sps:$4 sm:$0xff]   ;;  %v5124_v22 = vld [vmem:[%s10832_s1 + $0x964] ss:$16 sps:$4 sm:$0xff]  }
  0x7d   :  { %2186 = vmatprep.subr.bf16.mxu1 %v5047_v24  ;;  %v5126_v24 = vld [vmem:[%s10832_s1 + $0x16c] ss:$16 sps:$4 sm:$0xff]  }
  0x7f   :  { %2146 = vmatpush2.bf16.msra.mxu0 %v5049_v25  ;;  %v5128_v25 = vld [vmem:[%s10832_s1 + $0x960] ss:$16 sps:$4 sm:$0xff]  }
  0x80   :  { %2187 = vmatpush2.bf16.msra.mxu1 %v5050_v27  ;;  %2197 = vmatprep.subr.bf16.mxu0 %v5052_v28  ;;  %v5129_v27 = vld [vmem:[%s10832_s1 + $0x168] ss:$16 sps:$4 sm:$0xff]   ;;  %v5130_v28 = vld [vmem:[%s10832_s1 + $0x944] ss:$16 sps:$4 sm:$0xff]  }
  0x81   :  { %2238 = vmatprep.subr.bf16.mxu1 %v5054_v29  ;;  %v5132_v29 = vld [vmem:[%s10832_s1 + $0x14c] ss:$16 sps:$4 sm:$0xff]  }
  0x82   :  { %2148 = vmatmul.mubr.bf16.vlgmr.msra.gmra.mxu0 %v6433_v26 }
  0x83   :  { %2189 = vmatmul.mubr.bf16.vlgmr.msra.gmra.mxu1 %v6446_v6  ;;  %2198 = vmatpush1.bf16.msra.mxu0 %v5056_v30  ;;  %v5134_v30 = vld [vmem:[%s10832_s1 + $0x940] ss:$16 sps:$4 sm:$0xff]  }
  0x84   :  { %2239 = vmatpush1.bf16.msra.mxu1 %v5057_v31  ;;  %2199 = vmatprep.subr.bf16.mxu0 %v5058_v32  ;;  %v5135_v31 = vld [vmem:[%s10832_s1 + $0x148] ss:$16 sps:$4 sm:$0xff]   ;;  %v5136_v32 = vld [vmem:[%s10832_s1 + $0x924] ss:$16 sps:$4 sm:$0xff]  }
  0x85   :  { %2240 = vmatprep.subr.bf16.mxu1 %v5060_v34  ;;  %2229 = vmatprep.mubr.bf16.mxu0 %v6473_v37  ;;  %v5138_v34 = vld [vmem:[%s10832_s1 + $0x12c] ss:$16 sps:$4 sm:$0xff]  }
  0x86   :  { %2270 = vmatprep.mubr.bf16.mxu1 %v6175_v61  ;;  %v5072_v61 = vld [vmem:[%s10832_s1 + $0x8c] ss:$16 sps:$4 sm:$0xff]  }
  0x87   :  { %2200 = vmatpush1.bf16.msra.mxu0 %v5062_v36  ;;  %v5141_v36 = vld [vmem:[%s10832_s1 + $0x128] ss:$16 sps:$4 sm:$0xff]  }
  0x88   :  { %2241 = vmatpush1.bf16.msra.mxu1 %v5063_v38  ;;  %2201 = vmatprep.subr.bf16.mxu0 %v5064_v39  ;;  %v5142_v38 = vld [vmem:[%s10832_s1 + $0x904] ss:$16 sps:$4 sm:$0xff]   ;;  %v5144_v39 = vld [vmem:[%s10832_s1 + $0x10c] ss:$16 sps:$4 sm:$0xff]  }
  0x89   :  { %2242 = vmatprep.subr.bf16.mxu1 %v5066_v40  ;;  %v5146_v40 = vld [vmem:[%s10832_s1 + $0x900] ss:$16 sps:$4 sm:$0xff]  }
  0x8b   :  { %2202 = vmatpush1.bf16.msra.mxu0 %v5068_v41  ;;  %v5147_v41 = vld [vmem:[%s10832_s1 + $0x108] ss:$16 sps:$4 sm:$0xff]  }
  0x8c   :  { %2243 = vmatpush1.bf16.msra.mxu1 %v5069_v42  ;;  %2203 = vmatprep.subr.bf16.mxu0 %v5070_v44  ;;  %v5148_v42 = vld [vmem:[%s10832_s1 + $0x2ec] ss:$16 sps:$4 sm:$0xff]  }
  0x8d   :  { %2244 = vmatprep.subr.bf16.mxu1 %v5072_v61  ;;  %v5150_v44 = vld [vmem:[%s10832_s1 + $0x4ec] ss:$16 sps:$4 sm:$0xff]   ;;  %v6656_v61 = vrot.slane %v6460_v33, %v6144_v49 }
  0x8e   :  { %v5156_v33 = vld [vmem:[%s10832_s1 + $0x4cc] ss:$16 sps:$4 sm:$0xff]  }
  0x8f   :  { %2204 = vmatpush1.bf16.msra.mxu0 %v5074_v45  ;;  %v5152_v45 = vld [vmem:[%s10832_s1 + $0x2e8] ss:$16 sps:$4 sm:$0xff]  }
  0x90   :  { %2245 = vmatpush1.bf16.msra.mxu1 %v5075_v46  ;;  %2205 = vmatprep.subr.bf16.mxu0 %v5076_v47  ;;  %v5153_v46 = vld [vmem:[%s10832_s1 + $0x4e8] ss:$16 sps:$4 sm:$0xff]   ;;  %v5154_v47 = vld [vmem:[%s10832_s1 + $0x2cc] ss:$16 sps:$4 sm:$0xff]  }
  0x91   :  { %2246 = vmatprep.subr.bf16.mxu1 %v5078_v48  ;;  %v5158_v48 = vld [vmem:[%s10832_s1 + $0x2c8] ss:$16 sps:$4 sm:$0xff]  }
  0x93   :  { %2206 = vmatpush1.bf16.msra.mxu0 %v5080_v50  ;;  %v5159_v50 = vld [vmem:[%s10832_s1 + $0x4c8] ss:$16 sps:$4 sm:$0xff]  }
  0x94   :  { %2247 = vmatpush1.bf16.msra.mxu1 %v5081_v51  ;;  %2207 = vmatprep.subr.bf16.mxu0 %v5082_v52  ;;  %v5160_v51 = vld [vmem:[%s10832_s1 + $0x2ac] ss:$16 sps:$4 sm:$0xff]   ;;  %v5164_v52 = vld [vmem:[%s10832_s1 + $0x2a8] ss:$16 sps:$4 sm:$0xff]  }
  0x95   :  { %2248 = vmatprep.subr.bf16.mxu1 %v5084_v53  ;;  %v5165_v53 = vld [vmem:[%s10832_s1 + $0x4a8] ss:$16 sps:$4 sm:$0xff]  }
  0x97   :  { %2208 = vmatpush1.bf16.msra.mxu0 %v5086_v54  ;;  %v5166_v54 = vld [vmem:[%s10832_s1 + $0x28c] ss:$16 sps:$4 sm:$0xff]  }
  0x98   :  { %2249 = vmatpush1.bf16.msra.mxu1 %v5087_v55  ;;  %2209 = vmatprep.subr.bf16.mxu0 %v5088_v56  ;;  %v5171_v55 = vld [vmem:[%s10832_s1 + $0x488] ss:$16 sps:$4 sm:$0xff]   ;;  %v5172_v56 = vld [vmem:[%s10832_s1 + $0x26c] ss:$16 sps:$4 sm:$0xff]  }
  0x99   :  { %2250 = vmatprep.subr.bf16.mxu1 %v5090_v57  ;;  %v5174_v57 = vld [vmem:[%s10832_s1 + $0x46c] ss:$16 sps:$4 sm:$0xff]  }
  0x9b   :  { %2210 = vmatpush1.bf16.msra.mxu0 %v5092_v58  ;;  %v5176_v58 = vld [vmem:[%s10832_s1 + $0x268] ss:$16 sps:$4 sm:$0xff]  }
  0x9c   :  { %2251 = vmatpush1.bf16.msra.mxu1 %v5093_v59  ;;  %2211 = vmatprep.subr.bf16.mxu0 %v5094_v60  ;;  %v5177_v59 = vld [vmem:[%s10832_s1 + $0x468] ss:$16 sps:$4 sm:$0xff]   ;;  %v5178_v60 = vld [vmem:[%s10832_s1 + $0x24c] ss:$16 sps:$4 sm:$0xff]  }
  0x9d   :  { %2252 = vmatprep.subr.bf16.mxu1 %v5096_v62  ;;  %v5180_v62 = vld [vmem:[%s10832_s1 + $0x44c] ss:$16 sps:$4 sm:$0xff]  }
  0x9f   :  { %2212 = vmatpush1.bf16.msra.mxu0 %v5098_v63  ;;  %v5182_v63 = vld [vmem:[%s10832_s1 + $0x248] ss:$16 sps:$4 sm:$0xff]  }
  0xa0   :  { %2253 = vmatpush1.bf16.msra.mxu1 %v5099_v1  ;;  %2213 = vmatprep.subr.bf16.mxu0 %v5100_v2  ;;  %v5183_v1 = vld [vmem:[%s10832_s1 + $0x448] ss:$16 sps:$4 sm:$0xff]   ;;  %v5184_v2 = vld [vmem:[%s10832_s1 + $0x22c] ss:$16 sps:$4 sm:$0xff]  }
  0xa1   :  { %2254 = vmatprep.subr.bf16.mxu1 %v5102_v3  ;;  %v5186_v3 = vld [vmem:[%s10832_s1 + $0x42c] ss:$16 sps:$4 sm:$0xff]  }
  0xa3   :  { %2214 = vmatpush2.bf16.msra.mxu0 %v5104_v4  ;;  %v5188_v4 = vld [vmem:[%s10832_s1 + $0x228] ss:$16 sps:$4 sm:$0xff]  }
  0xa4   :  { %2255 = vmatpush2.bf16.msra.mxu1 %v5105_v5  ;;  %2215 = vmatprep.subr.bf16.mxu0 %v5106_v7  ;;  %v5189_v5 = vld [vmem:[%s10832_s1 + $0x428] ss:$16 sps:$4 sm:$0xff]   ;;  %v5190_v7 = vld [vmem:[%s10832_s1 + $0x20c] ss:$16 sps:$4 sm:$0xff]  }
  0xa5   :  { %2256 = vmatprep.subr.bf16.mxu1 %v5108_v8  ;;  %v5192_v8 = vld [vmem:[%s10832_s1 + $0x40c] ss:$16 sps:$4 sm:$0xff]  }
  0xa7   :  { %2216 = vmatpush2.bf16.msra.mxu0 %v5110_v9  ;;  %v5194_v9 = vld [vmem:[%s10832_s1 + $0x208] ss:$16 sps:$4 sm:$0xff]  }
  0xa8   :  { %2257 = vmatpush2.bf16.msra.mxu1 %v5111_v10  ;;  %2217 = vmatprep.subr.bf16.mxu0 %v5112_v11  ;;  %v5195_v10 = vld [vmem:[%s10832_s1 + $0x408] ss:$16 sps:$4 sm:$0xff]   ;;  %v5196_v11 = vld [vmem:[%s10832_s1 + $0x3ec] ss:$16 sps:$4 sm:$0xff]  }
  0xa9   :  { %2258 = vmatprep.subr.bf16.mxu1 %v5114_v12  ;;  %v5198_v12 = vld [vmem:[%s10832_s1 + $0x5ec] ss:$16 sps:$4 sm:$0xff]  }
  0xab   :  { %2218 = vmatpush2.bf16.msra.mxu0 %v5116_v14  ;;  %v5200_v14 = vld [vmem:[%s10832_s1 + $0x3e8] ss:$16 sps:$4 sm:$0xff]  }
  0xac   :  { %2259 = vmatpush2.bf16.msra.mxu1 %v5117_v15  ;;  %2219 = vmatprep.subr.bf16.mxu0 %v5118_v16  ;;  %v5201_v15 = vld [vmem:[%s10832_s1 + $0x5e8] ss:$16 sps:$4 sm:$0xff]   ;;  %v5202_v16 = vld [vmem:[%s10832_s1 + $0x3cc] ss:$16 sps:$4 sm:$0xff]  }
  0xad   :  { %2260 = vmatprep.subr.bf16.mxu1 %v5120_v19  ;;  %v5204_v19 = vld [vmem:[%s10832_s1 + $0x5cc] ss:$16 sps:$4 sm:$0xff]  }
  0xaf   :  { %2220 = vmatpush2.bf16.msra.mxu0 %v5122_v20  ;;  %v5206_v20 = vld [vmem:[%s10832_s1 + $0x3c8] ss:$16 sps:$4 sm:$0xff]  }
  0xb0   :  { %2261 = vmatpush2.bf16.msra.mxu1 %v5123_v21  ;;  %2221 = vmatprep.subr.bf16.mxu0 %v5124_v22  ;;  %v5207_v21 = vld [vmem:[%s10832_s1 + $0x5c8] ss:$16 sps:$4 sm:$0xff]   ;;  %v5208_v22 = vld [vmem:[%s10832_s1 + $0x3ac] ss:$16 sps:$4 sm:$0xff]  }
  0xb1   :  { %2262 = vmatprep.subr.bf16.mxu1 %v5126_v24  ;;  %v5210_v24 = vld [vmem:[%s10832_s1 + $0x5ac] ss:$16 sps:$4 sm:$0xff]  }
  0xb3   :  { %2222 = vmatpush2.bf16.msra.mxu0 %v5128_v25  ;;  %v5212_v25 = vld [vmem:[%s10832_s1 + $0x3a8] ss:$16 sps:$4 sm:$0xff]  }
  0xb4   :  { %2263 = vmatpush2.bf16.msra.mxu1 %v5129_v27  ;;  %2223 = vmatprep.subr.bf16.mxu0 %v5130_v28  ;;  %v5213_v27 = vld [vmem:[%s10832_s1 + $0x5a8] ss:$16 sps:$4 sm:$0xff]   ;;  %v5214_v28 = vld [vmem:[%s10832_s1 + $0x38c] ss:$16 sps:$4 sm:$0xff]  }
  0xb5   :  { %2264 = vmatprep.subr.bf16.mxu1 %v5132_v29  ;;  %v5216_v29 = vld [vmem:[%s10832_s1 + $0x58c] ss:$16 sps:$4 sm:$0xff]  }
  0xb7   :  { %2224 = vmatpush2.bf16.msra.mxu0 %v5134_v30  ;;  %v5218_v30 = vld [vmem:[%s10832_s1 + $0x388] ss:$16 sps:$4 sm:$0xff]  }
  0xb8   :  { %2265 = vmatpush2.bf16.msra.mxu1 %v5135_v31  ;;  %2225 = vmatprep.subr.bf16.mxu0 %v5136_v32  ;;  %v5219_v31 = vld [vmem:[%s10832_s1 + $0x588] ss:$16 sps:$4 sm:$0xff]   ;;  %v6803_v32 = vld [vmem:[%s10832_s1 + $0x36c] ss:$16 sps:$4 sm:$0xff]  }
  0xb9   :  { %2266 = vmatprep.subr.bf16.mxu1 %v5138_v34  ;;  %v6808_v34 = vld [vmem:[%s10832_s1 + $0x56c] ss:$16 sps:$4 sm:$0xff]  }
  0xbb   :  { %2226 = vmatpush2.bf16.msra.mxu0 %v5140_v35 }
  0xbc   :  { %2267 = vmatpush2.bf16.msra.mxu1 %v5141_v36  ;;  %2227 = vmatprep.subr.bf16.mxu0 %v5142_v38 }
  0xbd   :  { %2268 = vmatprep.subr.bf16.mxu1 %v5144_v39 }
  0xbf   :  { %2228 = vmatpush2.bf16.msra.mxu0 %v5146_v40 }
  0xc0   :  { %2269 = vmatpush2.bf16.msra.mxu1 %v5147_v41  ;;  %2279 = vmatprep.subr.bf16.mxu0 %v5148_v42 }
  0xc1   :  { %2320 = vmatprep.subr.bf16.mxu1 %v5150_v44 }
  0xc2   :  { %2230 = vmatmul.mubr.bf16.vlgmr.msra.gmra.mxu0 %v6656_v61 }
  0xc3   :  { %2271 = vmatmul.mubr.bf16.vlgmr.msra.gmra.mxu1 %v6222_v13  ;;  %2280 = vmatpush1.bf16.msra.mxu0 %v5152_v45  ;;  %v5162_v13 = vld [vmem:[%s10832_s1 + $0x4ac] ss:$16 sps:$4 sm:$0xff]  }
  0xc4   :  { %2321 = vmatpush1.bf16.msra.mxu1 %v5153_v46  ;;  %2281 = vmatprep.subr.bf16.mxu0 %v5154_v47 }
  0xc5   :  { %2322 = vmatprep.subr.bf16.mxu1 %v5156_v33  ;;  %2311 = vmatprep.mubr.bf16.mxu0 %v6185_v0  ;;  %v5168_v0 = vld [vmem:[%s10832_s1 + $0x48c] ss:$16 sps:$4 sm:$0xff]  }
  0xc6   :  { %2352 = vmatprep.mubr.bf16.mxu1 %v6234_v17  ;;  %v5170_v17 = vld [vmem:[%s10832_s1 + $0x288] ss:$16 sps:$4 sm:$0xff]  }
  0xc7   :  { %2282 = vmatpush1.bf16.msra.mxu0 %v5158_v48 }
  0xc8   :  { %2323 = vmatpush1.bf16.msra.mxu1 %v5159_v50  ;;  %2283 = vmatprep.subr.bf16.mxu0 %v5160_v51 }
  0xc9   :  { %2324 = vmatprep.subr.bf16.mxu1 %v5162_v13 }
  0xcb   :  { %2284 = vmatpush1.bf16.msra.mxu0 %v5164_v52 }
  0xcc   :  { %2325 = vmatpush1.bf16.msra.mxu1 %v5165_v53  ;;  %2285 = vmatprep.subr.bf16.mxu0 %v5166_v54 }
  0xcd   :  { %2326 = vmatprep.subr.bf16.mxu1 %v5168_v0 }
  0xcf   :  { %2286 = vmatpush1.bf16.msra.mxu0 %v5170_v17 }
  0xd0   :  { %2327 = vmatpush1.bf16.msra.mxu1 %v5171_v55  ;;  %2287 = vmatprep.subr.bf16.mxu0 %v5172_v56 }
  0xd1   :  { %2328 = vmatprep.subr.bf16.mxu1 %v5174_v57 }
  0xd3   :  { %2288 = vmatpush1.bf16.msra.mxu0 %v5176_v58 }
  0xd4   :  { %2329 = vmatpush1.bf16.msra.mxu1 %v5177_v59  ;;  %2289 = vmatprep.subr.bf16.mxu0 %v5178_v60 }
  0xd5   :  { %2330 = vmatprep.subr.bf16.mxu1 %v5180_v62 }
  0xd7   :  { %2290 = vmatpush1.bf16.msra.mxu0 %v5182_v63 }
  0xd8   :  { %2331 = vmatpush1.bf16.msra.mxu1 %v5183_v1  ;;  %2291 = vmatprep.subr.bf16.mxu0 %v5184_v2 }
  0xd9   :  { %2332 = vmatprep.subr.bf16.mxu1 %v5186_v3 }
  0xdb   :  { %2292 = vmatpush1.bf16.msra.mxu0 %v5188_v4 }
  0xdc   :  { %2333 = vmatpush1.bf16.msra.mxu1 %v5189_v5  ;;  %2293 = vmatprep.subr.bf16.mxu0 %v5190_v7 }
  0xdd   :  { %2334 = vmatprep.subr.bf16.mxu1 %v5192_v8 }
  0xdf   :  { %2294 = vmatpush1.bf16.msra.mxu0 %v5194_v9 }
  0xe0   :  { %2335 = vmatpush1.bf16.msra.mxu1 %v5195_v10  ;;  %2295 = vmatprep.subr.bf16.mxu0 %v5196_v11 }
  0xe1   :  { %2336 = vmatprep.subr.bf16.mxu1 %v5198_v12 }
  0xe3   :  { %2296 = vmatpush2.bf16.msra.mxu0 %v5200_v14 }
  0xe4   :  { %2337 = vmatpush2.bf16.msra.mxu1 %v5201_v15  ;;  %2297 = vmatprep.subr.bf16.mxu0 %v5202_v16 }
  0xe5   :  { %2338 = vmatprep.subr.bf16.mxu1 %v5204_v19 }
  0xe7   :  { %2298 = vmatpush2.bf16.msra.mxu0 %v5206_v20 }
  0xe8   :  { %2339 = vmatpush2.bf16.msra.mxu1 %v5207_v21  ;;  %2299 = vmatprep.subr.bf16.mxu0 %v5208_v22 }
  0xe9   :  { %2340 = vmatprep.subr.bf16.mxu1 %v5210_v24 }
  0xeb   :  { %2300 = vmatpush2.bf16.msra.mxu0 %v5212_v25 }
  0xec   :  { %2341 = vmatpush2.bf16.msra.mxu1 %v5213_v27  ;;  %2301 = vmatprep.subr.bf16.mxu0 %v5214_v28 }
  0xed   :  { %2342 = vmatprep.subr.bf16.mxu1 %v5216_v29 }
  0xee   :  { %12 = vsyncpa [#allocation3], 0  ;;  %v6813_v35 = vld [vmem:[%s10832_s1 + $0x368] ss:$16 sps:$4 sm:$0xff]   ;;  %v6825_v38 = vld [vmem:[%s10832_s1 + $0x34c] ss:$16 sps:$4 sm:$0xff]  }
  0xef   :  { %2302 = vmatpush2.bf16.msra.mxu0 %v5218_v30  ;;  %v6818_v36 = vld [vmem:[%s10832_s1 + $0x568] ss:$16 sps:$4 sm:$0xff]   ;;  %v6830_v39 = vld [vmem:[%s10832_s1 + $0x54c] ss:$16 sps:$4 sm:$0xff]   ;;  %vm4358_vm0 = vcmask 1040384   ;;  %vm5967_vm1 = vmmov 0  }
  0xf0   :  { %2343 = vmatpush2.bf16.msra.mxu1 %v5219_v31  ;;  %2303 = vmatprep.subr.bf16.mxu0 %v6803_v32  ;;  %v6837_v40 = vld [vmem:[%s10832_s1 + $0x348] ss:$16 sps:$4 sm:$0xff]   ;;  %v6849_v42 = vld [vmem:[%s10832_s1 + $0x32c] ss:$16 sps:$4 sm:$0xff]   ;;  %vm4354_vm2 = vcmask 408576   ;;  %vm4402_vm3 = vcmask 74752  }
  0xf1   :  { %2344 = vmatprep.subr.bf16.mxu1 %v6808_v34  ;;  %v6842_v41 = vld [vmem:[%s10832_s1 + $0x548] ss:$16 sps:$4 sm:$0xff]   ;;  %v6854_v44 = vld [vmem:[%s10832_s1 + $0x52c] ss:$16 sps:$4 sm:$0xff]  }
  0xf2   :  { %v6861_v45 = vld [vmem:[%s10832_s1 + $0x328] ss:$16 sps:$4 sm:$0xff]   ;;  %v6873_v47 = vld [vmem:[%s10832_s1 + $0x30c] ss:$16 sps:$4 sm:$0xff]  }
  0xf3   :  { %2304 = vmatpush2.bf16.msra.mxu0 %v6813_v35  ;;  %v6866_v46 = vld [vmem:[%s10832_s1 + $0x528] ss:$16 sps:$4 sm:$0xff]   ;;  %v6878_v33 = vld [vmem:[%s10832_s1 + $0x50c] ss:$16 sps:$4 sm:$0xff]  }
  0xf4   :  { %2345 = vmatpush2.bf16.msra.mxu1 %v6818_v36  ;;  %2305 = vmatprep.subr.bf16.mxu0 %v6825_v38  ;;  %v6885_v48 = vld [vmem:[%s10832_s1 + $0x308] ss:$16 sps:$4 sm:$0xff]   ;;  %v6897_v51 = vld [vmem:[%s10832_s1 + $0x6ec] ss:$16 sps:$4 sm:$0xff]  }
  0xf5   :  { %2346 = vmatprep.subr.bf16.mxu1 %v6830_v39  ;;  %v6890_v50 = vld [vmem:[%s10832_s1 + $0x508] ss:$16 sps:$4 sm:$0xff]   ;;  %v6902_v13 = vld [vmem:[%s10832_s1 + $0x8ec] ss:$16 sps:$4 sm:$0xff]  }
  0xf6   :  { %v6909_v52 = vld [vmem:[%s10832_s1 + $0x6e8] ss:$16 sps:$4 sm:$0xff]   ;;  %v6921_v54 = vld [vmem:[%s10832_s1 + $0x6cc] ss:$16 sps:$4 sm:$0xff]  }
  0xf7   :  { %2306 = vmatpush2.bf16.msra.mxu0 %v6837_v40  ;;  %v6914_v53 = vld [vmem:[%s10832_s1 + $0x8e8] ss:$16 sps:$4 sm:$0xff]   ;;  %v6926_v0 = vld [vmem:[%s10832_s1 + $0x8cc] ss:$16 sps:$4 sm:$0xff]  }
  0xf8   :  { %2347 = vmatpush2.bf16.msra.mxu1 %v6842_v41  ;;  %2307 = vmatprep.subr.bf16.mxu0 %v6849_v42  ;;  %v6937_v57 = vld [vmem:[%s10832_s1 + $0x6c8] ss:$16 sps:$4 sm:$0xff]   ;;  %v6954_v60 = vld [vmem:[%s10832_s1 + $0x8ac] ss:$16 sps:$4 sm:$0xff]  }
  0xf9   :  { %2348 = vmatprep.subr.bf16.mxu1 %v6854_v44  ;;  %v6942_v58 = vld [vmem:[%s10832_s1 + $0x8c8] ss:$16 sps:$4 sm:$0xff]   ;;  %v6982_v5 = vld [vmem:[%s10832_s1 + $0x88c] ss:$16 sps:$4 sm:$0xff]  }
  0xfa   :  { %v6965_v2 = vld [vmem:[%s10832_s1 + $0x6a8] ss:$16 sps:$4 sm:$0xff]   ;;  %v7001_v9 = vld [vmem:[%s10832_s1 + $0x66c] ss:$16 sps:$4 sm:$0xff]  }
  0xfb   :  { %2308 = vmatpush2.bf16.msra.mxu0 %v6861_v45  ;;  %v6970_v3 = vld [vmem:[%s10832_s1 + $0x8a8] ss:$16 sps:$4 sm:$0xff]   ;;  %v7006_v10 = vld [vmem:[%s10832_s1 + $0x86c] ss:$16 sps:$4 sm:$0xff]  }
  0xfc   :  { %2349 = vmatpush2.bf16.msra.mxu1 %v6866_v46  ;;  %2309 = vmatprep.subr.bf16.mxu0 %v6873_v47  ;;  %v6989_v7 = vld [vmem:[%s10832_s1 + $0x688] ss:$16 sps:$4 sm:$0xff]   ;;  %v7025_v14 = vld [vmem:[%s10832_s1 + $0x64c] ss:$16 sps:$4 sm:$0xff]  }
  0xfd   :  { %2350 = vmatprep.subr.bf16.mxu1 %v6878_v33  ;;  %v6994_v8 = vld [vmem:[%s10832_s1 + $0x888] ss:$16 sps:$4 sm:$0xff]   ;;  %v7030_v15 = vld [vmem:[%s10832_s1 + $0x84c] ss:$16 sps:$4 sm:$0xff]  }
  0xfe   :  { %v7013_v11 = vld [vmem:[%s10832_s1 + $0x668] ss:$16 sps:$4 sm:$0xff]   ;;  %v7049_v20 = vld [vmem:[%s10832_s1 + $0x62c] ss:$16 sps:$4 sm:$0xff]  }
  0xff   :  { %2310 = vmatpush2.bf16.msra.mxu0 %v6885_v48  ;;  %v7018_v12 = vld [vmem:[%s10832_s1 + $0x868] ss:$16 sps:$4 sm:$0xff]   ;;  %v7054_v21 = vld [vmem:[%s10832_s1 + $0x82c] ss:$16 sps:$4 sm:$0xff]  }
 0x100   :  { %2351 = vmatpush2.bf16.msra.mxu1 %v6890_v50  ;;  %2361 = vmatprep.subr.bf16.mxu0 %v6897_v51  ;;  %v7037_v16 = vld [vmem:[%s10832_s1 + $0x648] ss:$16 sps:$4 sm:$0xff]   ;;  %v7073_v25 = vld [vmem:[%s10832_s1 + $0x60c] ss:$16 sps:$4 sm:$0xff]  }
 0x101   :  { %2402 = vmatprep.subr.bf16.mxu1 %v6902_v13  ;;  %v7042_v19 = vld [vmem:[%s10832_s1 + $0x848] ss:$16 sps:$4 sm:$0xff]   ;;  %11156 = vst [vmem:[#allocation8_spill] sm:$0xff] %v7073_v25  ;;  %v7078_v27 = vld [vmem:[%s10832_s1 + $0x80c] ss:$16 sps:$4 sm:$0xff]  }
 0x102   :  { %v2067_v17 = vpop.f32.mrf.mxu0  ;;  %2312 = vmatmul.mubr.bf16.vlgmr.msra.gmra.mxu0 %v6238_v18  ;;  %v7061_v22 = vld [vmem:[%s10832_s1 + $0x628] ss:$16 sps:$4 sm:$0xff]   ;;  %11157 = vst [vmem:[#allocation9_spill] sm:$0xff] %v7078_v27  ;;  %v7097_v30 = vld [vmem:[%s10832_s1 + $0x7ec] ss:$16 sps:$4 sm:$0xff]  }
 0x103   :  { %v2108_v55 = vpop.f32.mrf.mxu1  ;;  %2353 = vmatmul.mubr.bf16.vlgmr.msra.gmra.mxu1 %v6433_v26  ;;  %2362 = vmatpush1.bf16.msra.mxu0 %v6909_v52  ;;  %v6949_v26 = vld [vmem:[%s10832_s1 + $0x6ac] ss:$16 sps:$4 sm:$0xff]   ;;  %11154 = vst [vmem:[#allocation6_spill] sm:$0xff] %v7061_v22  ;;  %v7066_v24 = vld [vmem:[%s10832_s1 + $0x828] ss:$16 sps:$4 sm:$0xff]   ;;  %11160 = vst [vmem:[#allocation12_spill] sm:$0xff] %v7097_v30 }
 0x104   :  { %v6930_v56 = vadd.f32 %v2108_v55, %v2067_v17  ;;  %2403 = vmatpush1.bf16.msra.mxu1 %v6914_v53  ;;  %v2069_v59 = vpop.f32.mrf.mxu0  ;;  %2363 = vmatprep.subr.bf16.mxu0 %v6921_v54  ;;  %11155 = vst [vmem:[#allocation7_spill] sm:$0xff] %v7066_v24  ;;  %v7085_v28 = vld [vmem:[%s10832_s1 + $0x608] ss:$16 sps:$4 sm:$0xff]   ;;  %v7102_v31 = vld [vmem:[%s10832_s1 + $0x9ec] ss:$16 sps:$4 sm:$0xff]  }
 0x105   :  { %v2110_v18 = vpop.f32.mrf.mxu1  ;;  %2404 = vmatprep.subr.bf16.mxu1 %v6926_v0  ;;  %2393 = vmatprep.mubr.bf16.mxu0 %v6254_v23  ;;  %11158 = vst [vmem:[#allocation10_spill] sm:$0xff] %v7085_v28  ;;  %v7090_v29 = vld [vmem:[%s10832_s1 + $0x808] ss:$16 sps:$4 sm:$0xff]   ;;  %11161 = vst [vmem:[#allocation13_spill] sm:$0xff] %v7102_v31 }
 0x106   :  { %v6956_v62 = vadd.f32 %v2110_v18, %v2069_v59  ;;  %2434 = vmatprep.mubr.bf16.mxu1 %v6473_v37  ;;  %v2071_v63 = vpop.f32.mrf.mxu0  ;;  %v6977_v37 = vld [vmem:[%s10832_s1 + $0x68c] ss:$16 sps:$4 sm:$0xff]   ;;  %11159 = vst [vmem:[#allocation11_spill] sm:$0xff] %v7090_v29  ;;  %v7109_v17 = vld [vmem:[%s10832_s1 + $0x7e8] ss:$16 sps:$4 sm:$0xff]  }
 0x107   :  { %v2112_v1 = vpop.f32.mrf.mxu1  ;;  %2364 = vmatpush1.bf16.msra.mxu0 %v6937_v57  ;;  %11162 = vst [vmem:[#allocation14_spill] sm:$0xff] %v7109_v17  ;;  %v7114_v55 = vld [vmem:[%s10832_s1 + $0x9e8] ss:$16 sps:$4 sm:$0xff]   ;;  %v7121_v59 = vld [vmem:[%s10832_s1 + $0x7cc] ss:$16 sps:$4 sm:$0xff]  }
 0x108   :  { %2405 = vmatpush1.bf16.msra.mxu1 %v6942_v58  ;;  %v2072_v4 = vpop.f32.mrf.mxu0  ;;  %2365 = vmatprep.subr.bf16.mxu0 %v6949_v26  ;;  %11163 = vst [vmem:[#allocation15_spill] sm:$0xff] %v7114_v55  ;;  %11164 = vst [vmem:[#allocation16_spill] sm:$0xff] %v7121_v59  ;;  %v7126_v18 = vld [vmem:[%s10832_s1 + $0x9cc] ss:$16 sps:$4 sm:$0xff]   ;;  %v7133_v63 = vld [vmem:[%s10832_s1 + $0x7c8] ss:$16 sps:$4 sm:$0xff]  }
 0x109   :  { %v2113_v23 = vpop.f32.mrf.mxu1  ;;  %2406 = vmatprep.subr.bf16.mxu1 %v6954_v60  ;;  %11165 = vst [vmem:[#allocation17_spill] sm:$0xff] %v7126_v18  ;;  %11166 = vst [vmem:[#allocation18_spill] sm:$0xff] %v7133_v63  ;;  %v7138_v1 = vld [vmem:[%s10832_s1 + $0x9c8] ss:$16 sps:$4 sm:$0xff]   ;;  %v7145_v4 = vld [vmem:[%s10832_s1 + $0x7ac] ss:$16 sps:$4 sm:$0xff]  }
 0x10a   :  { %11167 = vst [vmem:[#allocation19_spill] sm:$0xff] %v7138_v1  ;;  %11168 = vst [vmem:[#allocation20_spill] sm:$0xff] %v7145_v4  ;;  %v7150_v23 = vld [vmem:[%s10832_s1 + $0x9ac] ss:$16 sps:$4 sm:$0xff]   ;;  %v7157_v43 = vld [vmem:[%s10832_s1 + $0x7a8] ss:$16 sps:$4 sm:$0xff]  }
 0x10b   :  { %2366 = vmatpush1.bf16.msra.mxu0 %v6965_v2  ;;  %11169 = vst [vmem:[#allocation21_spill] sm:$0xff] %v7150_v23  ;;  %11170 = vst [vmem:[#allocation22_spill] sm:$0xff] %v7157_v43 }
 0x10c   :  { %2407 = vmatpush1.bf16.msra.mxu1 %v6970_v3  ;;  %2367 = vmatprep.subr.bf16.mxu0 %v6977_v37 }
 0x10d   :  { %2408 = vmatprep.subr.bf16.mxu1 %v6982_v5 }
 0x10f   :  { %2368 = vmatpush1.bf16.msra.mxu0 %v6989_v7 }
 0x110   :  { %2409 = vmatpush1.bf16.msra.mxu1 %v6994_v8  ;;  %2369 = vmatprep.subr.bf16.mxu0 %v7001_v9 }
 0x111   :  { %2410 = vmatprep.subr.bf16.mxu1 %v7006_v10 }
 0x113   :  { %2370 = vmatpush1.bf16.msra.mxu0 %v7013_v11 }
 0x114   :  { %2411 = vmatpush1.bf16.msra.mxu1 %v7018_v12  ;;  %2371 = vmatprep.subr.bf16.mxu0 %v7025_v14 }
 0x115   :  { %2412 = vmatprep.subr.bf16.mxu1 %v7030_v15 }
 0x117   :  { %2372 = vmatpush1.bf16.msra.mxu0 %v7037_v16 }
 0x118   :  { %2413 = vmatpush1.bf16.msra.mxu1 %v7042_v19  ;;  %2373 = vmatprep.subr.bf16.mxu0 %v7049_v20 }
 0x119   :  { %2414 = vmatprep.subr.bf16.mxu1 %v7054_v21 }
 0x11b   :  { %2374 = vmatpush1.bf16.msra.mxu0 %v7061_v22 }
 0x11c   :  { %2415 = vmatpush1.bf16.msra.mxu1 %v7066_v24  ;;  %2375 = vmatprep.subr.bf16.mxu0 %v7073_v25 }
 0x11d   :  { %2416 = vmatprep.subr.bf16.mxu1 %v7078_v27 }
 0x11f   :  { %2376 = vmatpush1.bf16.msra.mxu0 %v7085_v28 }
 0x120   :  { %2417 = vmatpush1.bf16.msra.mxu1 %v7090_v29  ;;  %2377 = vmatprep.subr.bf16.mxu0 %v7097_v30 }
 0x121   :  { %2418 = vmatprep.subr.bf16.mxu1 %v7102_v31 }
 0x123   :  { %2378 = vmatpush2.bf16.msra.mxu0 %v7109_v17 }
 0x124   :  { %2419 = vmatpush2.bf16.msra.mxu1 %v7114_v55  ;;  %2379 = vmatprep.subr.bf16.mxu0 %v7121_v59  ;;  %v7227_v59 = vld [vmem:[%s10831_s0 + $0xa] sm:$0xff] }
 0x125   :  { %2420 = vmatprep.subr.bf16.mxu1 %v7126_v18  ;;  %v7162_v18 = vld [vmem:[%s10832_s1 + $0x9a8] ss:$16 sps:$4 sm:$0xff]   ;;  %v7255_v55 = vrot.slane %v7227_v59, %v6144_v49 }
 0x126   :  { %11171 = vst [vmem:[#allocation23_spill] sm:$0xff] %v7162_v18 }
 0x127   :  { %2380 = vmatpush2.bf16.msra.mxu0 %v7133_v63  ;;  %v7169_v63 = vld [vmem:[%s10832_s1 + $0x78c] ss:$16 sps:$4 sm:$0xff]   ;;  %v2462_v17 = vcombine.high %v7255_v55, %v7255_v55 }
 0x128   :  { %2421 = vmatpush2.bf16.msra.mxu1 %v7138_v1  ;;  %2381 = vmatprep.subr.bf16.mxu0 %v7145_v4  ;;  %11172 = vst [vmem:[#allocation24_spill] sm:$0xff] %v7169_v63  ;;  %v7174_v1 = vld [vmem:[%s10832_s1 + $0x98c] ss:$16 sps:$4 sm:$0xff]   ;;  %v7181_v4 = vld [vmem:[%s10832_s1 + $0x788] ss:$16 sps:$4 sm:$0xff]  }
 0x129   :  { %2422 = vmatprep.subr.bf16.mxu1 %v7150_v23  ;;  %11173 = vst [vmem:[#allocation25_spill] sm:$0xff] %v7174_v1  ;;  %11174 = vst [vmem:[#allocation26_spill] sm:$0xff] %v7181_v4  ;;  %v7186_v23 = vld [vmem:[%s10832_s1 + $0x988] ss:$16 sps:$4 sm:$0xff]   ;;  %v7298_v31 = vrot.slane %v2462_v17, %v6144_v49 }
 0x12a   :  { %11175 = vst [vmem:[#allocation27_spill] sm:$0xff] %v7186_v23 }
 0x12b   :  { %2382 = vmatpush2.bf16.msra.mxu0 %v7157_v43  ;;  %v7193_v43 = vld [vmem:[%s10832_s1 + $0x76c] ss:$16 sps:$4 sm:$0xff]   ;;  %v7316_v17 = vcombine.high %v7298_v31, %v7298_v31 }
 0x12c   :  { %2423 = vmatpush2.bf16.msra.mxu1 %v7162_v18  ;;  %2383 = vmatprep.subr.bf16.mxu0 %v7169_v63  ;;  %11176 = vst [vmem:[#allocation28_spill] sm:$0xff] %v7193_v43  ;;  %v7198_v18 = vld [vmem:[%s10832_s1 + $0x96c] ss:$16 sps:$4 sm:$0xff]   ;;  %v7205_v63 = vld [vmem:[%s10832_s1 + $0x768] ss:$16 sps:$4 sm:$0xff]  }
 0x12d   :  { %2424 = vmatprep.subr.bf16.mxu1 %v7174_v1  ;;  %11177 = vst [vmem:[#allocation29_spill] sm:$0xff] %v7198_v18  ;;  %11178 = vst [vmem:[#allocation30_spill] sm:$0xff] %v7205_v63  ;;  %v7210_v1 = vld [vmem:[%s10832_s1 + $0x968] ss:$16 sps:$4 sm:$0xff]  }
 0x12e   :  { %11179 = vst [vmem:[#allocation31_spill] sm:$0xff] %v7210_v1 }
 0x12f   :  { %2384 = vmatpush2.bf16.msra.mxu0 %v7181_v4  ;;  %v7217_v4 = vld [vmem:[%s10832_s1 + $0x74c] ss:$16 sps:$4 sm:$0xff]  }
 0x130   :  { %2425 = vmatpush2.bf16.msra.mxu1 %v7186_v23  ;;  %2385 = vmatprep.subr.bf16.mxu0 %v7193_v43  ;;  %11180 = vst [vmem:[#allocation32_spill] sm:$0xff] %v7217_v4  ;;  %v7222_v23 = vld [vmem:[%s10832_s1 + $0x94c] ss:$16 sps:$4 sm:$0xff]   ;;  %v7239_v43 = vld [vmem:[%s10832_s1 + $0x948] ss:$16 sps:$4 sm:$0xff]  }
 0x131   :  { %2426 = vmatprep.subr.bf16.mxu1 %v7198_v18  ;;  %11181 = vst [vmem:[#allocation33_spill] sm:$0xff] %v7222_v23  ;;  %v7234_v18 = vld [vmem:[%s10832_s1 + $0x748] ss:$16 sps:$4 sm:$0xff]   ;;  %11183 = vst [vmem:[#allocation35_spill] sm:$0xff] %v7239_v43 }
 0x132   :  { %11182 = vst [vmem:[#allocation34_spill] sm:$0xff] %v7234_v18 }
 0x133   :  { %2386 = vmatpush2.bf16.msra.mxu0 %v7205_v63  ;;  %v7246_v63 = vld [vmem:[%s10832_s1 + $0x72c] ss:$16 sps:$4 sm:$0xff]  }
 0x134   :  { %2427 = vmatpush2.bf16.msra.mxu1 %v7210_v1  ;;  %2387 = vmatprep.subr.bf16.mxu0 %v7217_v4  ;;  %11184 = vst [vmem:[#allocation36_spill] sm:$0xff] %v7246_v63  ;;  %v7251_v1 = vld [vmem:[%s10832_s1 + $0x92c] ss:$16 sps:$4 sm:$0xff]   ;;  %v7267_v4 = vld [vmem:[%s10832_s1 + $0x928] ss:$16 sps:$4 sm:$0xff]  }
 0x135   :  { %2428 = vmatprep.subr.bf16.mxu1 %v7222_v23  ;;  %11185 = vst [vmem:[#allocation37_spill] sm:$0xff] %v7251_v1  ;;  %v7262_v23 = vld [vmem:[%s10832_s1 + $0x728] ss:$16 sps:$4 sm:$0xff]   ;;  %11187 = vst [vmem:[#allocation39_spill] sm:$0xff] %v7267_v4 }
 0x136   :  { %11186 = vst [vmem:[#allocation38_spill] sm:$0xff] %v7262_v23 }
 0x137   :  { %2388 = vmatpush2.bf16.msra.mxu0 %v7234_v18  ;;  %v7274_v18 = vld [vmem:[%s10832_s1 + $0x70c] ss:$16 sps:$4 sm:$0xff]  }
 0x138   :  { %2429 = vmatpush2.bf16.msra.mxu1 %v7239_v43  ;;  %2389 = vmatprep.subr.bf16.mxu0 %v7246_v63  ;;  %11188 = vst [vmem:[#allocation40_spill] sm:$0xff] %v7274_v18  ;;  %v7279_v43 = vld [vmem:[%s10832_s1 + $0x90c] ss:$16 sps:$4 sm:$0xff]   ;;  %v7293_v63 = vld [vmem:[%s10832_s1 + $0x908] ss:$16 sps:$4 sm:$0xff]  }
 0x139   :  { %2430 = vmatprep.subr.bf16.mxu1 %v7251_v1  ;;  %11189 = vst [vmem:[#allocation41_spill] sm:$0xff] %v7279_v43  ;;  %v7288_v1 = vld [vmem:[%s10832_s1 + $0x708] ss:$16 sps:$4 sm:$0xff]   ;;  %11191 = vst [vmem:[#allocation43_spill] sm:$0xff] %v7293_v63 }
 0x13a   :  { %11190 = vst [vmem:[#allocation42_spill] sm:$0xff] %v7288_v1 }
 0x13b   :  { %2390 = vmatpush2.bf16.msra.mxu0 %v7262_v23 }
 0x13c   :  { %2431 = vmatpush2.bf16.msra.mxu1 %v7267_v4  ;;  %2391 = vmatprep.subr.bf16.mxu0 %v7274_v18  ;;  %v7305_v4 = vld [vmem:[%s10832_s1 + $0xe4] ss:$16 sps:$4 sm:$0xff]  }
 0x13d   :  { %2432 = vmatprep.subr.bf16.mxu1 %v7279_v43  ;;  %11192 = vst [vmem:[#allocation44_spill] sm:$0xff] %v7305_v4  ;;  %v7311_v18 = vld [vmem:[%s10832_s1 + $0x2e4] ss:$16 sps:$4 sm:$0xff]  }
 0x13e   :  { %11193 = vst [vmem:[#allocation45_spill] sm:$0xff] %v7311_v18 }
 0x13f   :  { %2392 = vmatpush2.bf16.msra.mxu0 %v7288_v1 }
 0x140   :  { %2433 = vmatpush2.bf16.msra.mxu1 %v7293_v63  ;;  %2528 = vmatprep.subr.bf16.mxu0 %v7305_v4  ;;  %v7324_v4 = vld [vmem:[%s10832_s1 + $0xe0] ss:$16 sps:$4 sm:$0xff]  }
 0x141   :  { %2569 = vmatprep.subr.bf16.mxu1 %v7311_v18  ;;  %11194 = vst [vmem:[#allocation46_spill] sm:$0xff] %v7324_v4  ;;  %v7330_v18 = vld [vmem:[%s10832_s1 + $0x2e0] ss:$16 sps:$4 sm:$0xff]  }
 0x142   :  { %v2149_v1 = vpop.f32.mrf.mxu0  ;;  %2394 = vmatmul.mubr.bf16.vlgmr.msra.gmra.mxu0 %v6446_v6  ;;  %11195 = vst [vmem:[#allocation47_spill] sm:$0xff] %v7330_v18 }
 0x143   :  { %v2190_v63 = vpop.f32.mrf.mxu1  ;;  %2435 = vmatmul.mubr.bf16.vlgmr.msra.gmra.mxu1 %v6656_v61  ;;  %v2150_v43 = vadd.f32 %v2149_v1, %v6930_v56  ;;  %2529 = vmatpush1.bf16.msra.mxu0 %v7324_v4  ;;  %v7336_v61 = vld [vmem:[%s10832_s1 + $0xc4] ss:$16 sps:$4 sm:$0xff]  }
 0x144   :  { %2570 = vmatpush1.bf16.msra.mxu1 %v7330_v18  ;;  %v2151_v23 = vpop.f32.mrf.mxu0  ;;  %11196 = vst [vmem:[#allocation48_spill] sm:$0xff] %v7336_v61  ;;  %2530 = vmatprep.subr.bf16.mxu0 %v7336_v61  ;;  %v7342_v56 = vld [vmem:[%s10832_s1 + $0x2c4] ss:$16 sps:$4 sm:$0xff]   ;;  %v7355_v61 = vld [vmem:[%s10832_s1 + $0xc0] ss:$16 sps:$4 sm:$0xff]  }
 0x145   :  { %v2192_v6 = vpop.f32.mrf.mxu1  ;;  %11197 = vst [vmem:[#allocation49_spill] sm:$0xff] %v7342_v56  ;;  %2571 = vmatprep.subr.bf16.mxu1 %v7342_v56  ;;  %v7345_v1 = vadd.f32 %v2190_v63, %v2150_v43  ;;  %v2152_v18 = vadd.f32 %v2151_v23, %v6956_v62  ;;  %2560 = vmatprep.mubr.bf16.mxu0 %v7298_v31  ;;  %11198 = vst [vmem:[#allocation50_spill] sm:$0xff] %v7355_v61  ;;  %v7361_v43 = vld [vmem:[%s10832_s1 + $0x2c0] ss:$16 sps:$4 sm:$0xff]  }
 0x146   :  { %2601 = vmatprep.mubr.bf16.mxu1 %v7316_v17  ;;  %v2153_v4 = vpop.f32.mrf.mxu0  ;;  %11199 = vst [vmem:[#allocation51_spill] sm:$0xff] %v7361_v43  ;;  %v7385_v23 = vld [vmem:[%s10832_s1 + $0x2a0] ss:$16 sps:$4 sm:$0xff]  }
 0x147   :  { %v2194_v30 = vpop.f32.mrf.mxu1  ;;  %v7350_v29 = vadd.f32 %v2192_v6, %v2152_v18  ;;  %2531 = vmatpush1.bf16.msra.mxu0 %v7355_v61  ;;  %v7373_v18 = vld [vmem:[%s10832_s1 + $0x2a4] ss:$16 sps:$4 sm:$0xff]   ;;  %v7379_v4 = vld [vmem:[%s10832_s1 + $0xa0] ss:$16 sps:$4 sm:$0xff]   ;;  %11203 = vst [vmem:[#allocation55_spill] sm:$0xff] %v7385_v23 }
 0x148   :  { %2572 = vmatpush1.bf16.msra.mxu1 %v7361_v43  ;;  %v2154_v62 = vpop.f32.mrf.mxu0  ;;  %v7367_v30 = vld [vmem:[%s10832_s1 + $0xa4] ss:$16 sps:$4 sm:$0xff]   ;;  %11201 = vst [vmem:[#allocation53_spill] sm:$0xff] %v7373_v18  ;;  %11202 = vst [vmem:[#allocation54_spill] sm:$0xff] %v7379_v4  ;;  %v7744_v43 = vld [vmem:[%s10832_s1 + $0x4e0] ss:$16 sps:$4 sm:$0xff]  }
 0x149   :  { %v2195_v63 = vpop.f32.mrf.mxu1  ;;  %11200 = vst [vmem:[#allocation52_spill] sm:$0xff] %v7367_v30  ;;  %2532 = vmatprep.subr.bf16.mxu0 %v7367_v30  ;;  %2573 = vmatprep.subr.bf16.mxu1 %v7373_v18  ;;  %v7391_v6 = vld [vmem:[%s10832_s1 + $0x84] ss:$16 sps:$4 sm:$0xff]   ;;  %v7709_v18 = vld [vmem:[%s10832_s1 + $0x100] ss:$16 sps:$4 sm:$0xff]   ;;  %11259 = vst [vmem:[#allocation111_spill] sm:$0xff] %v7744_v43 }
 0x14a   :  { %11204 = vst [vmem:[#allocation56_spill] sm:$0xff] %v7391_v6  ;;  %v7397_v62 = vld [vmem:[%s10832_s1 + $0x284] ss:$16 sps:$4 sm:$0xff]   ;;  %v7403_v63 = vld [vmem:[%s10832_s1 + $0x80] ss:$16 sps:$4 sm:$0xff]   ;;  %11254 = vst [vmem:[#allocation106_spill] sm:$0xff] %v7709_v18 }
 0x14b   :  { %2533 = vmatpush1.bf16.msra.mxu0 %v7379_v4  ;;  %11205 = vst [vmem:[#allocation57_spill] sm:$0xff] %v7397_v62  ;;  %11206 = vst [vmem:[#allocation58_spill] sm:$0xff] %v7403_v63  ;;  %v7678_v4 = vld [vmem:[%s10832_s1 + $0x120] ss:$16 sps:$4 sm:$0xff]  }
 0x14c   :  { %2574 = vmatpush1.bf16.msra.mxu1 %v7385_v23  ;;  %2534 = vmatprep.subr.bf16.mxu0 %v7391_v6  ;;  %v7409_v23 = vld [vmem:[%s10832_s1 + $0x280] ss:$16 sps:$4 sm:$0xff]   ;;  %v7415_v6 = vld [vmem:[%s10832_s1 + $0x64] ss:$16 sps:$4 sm:$0xff]   ;;  %11250 = vst [vmem:[#allocation102_spill] sm:$0xff] %v7678_v4 }
 0x14d   :  { %2575 = vmatprep.subr.bf16.mxu1 %v7397_v62  ;;  %11207 = vst [vmem:[#allocation59_spill] sm:$0xff] %v7409_v23  ;;  %11208 = vst [vmem:[#allocation60_spill] sm:$0xff] %v7415_v6  ;;  %v7421_v62 = vld [vmem:[%s10832_s1 + $0x264] ss:$16 sps:$4 sm:$0xff]  }
 0x14e   :  { %11209 = vst [vmem:[#allocation61_spill] sm:$0xff] %v7421_v62 }
 0x14f   :  { %2535 = vmatpush1.bf16.msra.mxu0 %v7403_v63  ;;  %v7427_v63 = vld [vmem:[%s10832_s1 + $0x60] ss:$16 sps:$4 sm:$0xff]  }
 0x150   :  { %2576 = vmatpush1.bf16.msra.mxu1 %v7409_v23  ;;  %2536 = vmatprep.subr.bf16.mxu0 %v7415_v6  ;;  %11210 = vst [vmem:[#allocation62_spill] sm:$0xff] %v7427_v63  ;;  %v7433_v23 = vld [vmem:[%s10832_s1 + $0x260] ss:$16 sps:$4 sm:$0xff]   ;;  %v7439_v6 = vld [vmem:[%s10832_s1 + $0x44] ss:$16 sps:$4 sm:$0xff]  }
 0x151   :  { %2577 = vmatprep.subr.bf16.mxu1 %v7421_v62  ;;  %11211 = vst [vmem:[#allocation63_spill] sm:$0xff] %v7433_v23  ;;  %11212 = vst [vmem:[#allocation64_spill] sm:$0xff] %v7439_v6  ;;  %v7445_v62 = vld [vmem:[%s10832_s1 + $0x244] ss:$16 sps:$4 sm:$0xff]  }
 0x152   :  { %11213 = vst [vmem:[#allocation65_spill] sm:$0xff] %v7445_v62 }
 0x153   :  { %2537 = vmatpush1.bf16.msra.mxu0 %v7427_v63  ;;  %v7451_v63 = vld [vmem:[%s10832_s1 + $0x40] ss:$16 sps:$4 sm:$0xff]  }
 0x154   :  { %2578 = vmatpush1.bf16.msra.mxu1 %v7433_v23  ;;  %2538 = vmatprep.subr.bf16.mxu0 %v7439_v6  ;;  %11214 = vst [vmem:[#allocation66_spill] sm:$0xff] %v7451_v63  ;;  %v7457_v23 = vld [vmem:[%s10832_s1 + $0x240] ss:$16 sps:$4 sm:$0xff]   ;;  %v7463_v6 = vld [vmem:[%s10832_s1 + $0x24] ss:$16 sps:$4 sm:$0xff]  }
 0x155   :  { %2579 = vmatprep.subr.bf16.mxu1 %v7445_v62  ;;  %11215 = vst [vmem:[#allocation67_spill] sm:$0xff] %v7457_v23  ;;  %11216 = vst [vmem:[#allocation68_spill] sm:$0xff] %v7463_v6  ;;  %v7469_v62 = vld [vmem:[%s10832_s1 + $0x224] ss:$16 sps:$4 sm:$0xff]  }
 0x156   :  { %11217 = vst [vmem:[#allocation69_spill] sm:$0xff] %v7469_v62 }
 0x157   :  { %2539 = vmatpush1.bf16.msra.mxu0 %v7451_v63  ;;  %v7475_v63 = vld [vmem:[%s10832_s1 + $0x20] ss:$16 sps:$4 sm:$0xff]  }
 0x158   :  { %2580 = vmatpush1.bf16.msra.mxu1 %v7457_v23  ;;  %2540 = vmatprep.subr.bf16.mxu0 %v7463_v6  ;;  %11218 = vst [vmem:[#allocation70_spill] sm:$0xff] %v7475_v63  ;;  %v7481_v23 = vld [vmem:[%s10832_s1 + $0x220] ss:$16 sps:$4 sm:$0xff]   ;;  %v7487_v6 = vld [vmem:[%s10832_s1 + $0x4] ss:$16 sps:$4 sm:$0xff]  }
 0x159   :  { %2581 = vmatprep.subr.bf16.mxu1 %v7469_v62  ;;  %11219 = vst [vmem:[#allocation71_spill] sm:$0xff] %v7481_v23  ;;  %11220 = vst [vmem:[#allocation72_spill] sm:$0xff] %v7487_v6  ;;  %v7493_v62 = vld [vmem:[%s10832_s1 + $0x204] ss:$16 sps:$4 sm:$0xff]  }
 0x15a   :  { %11221 = vst [vmem:[#allocation73_spill] sm:$0xff] %v7493_v62 }
 0x15b   :  { %2541 = vmatpush1.bf16.msra.mxu0 %v7475_v63  ;;  %v7499_v63 = vld [vmem:[%s10832_s1] ss:$16 sps:$4 sm:$0xff]  }
 0x15c   :  { %2582 = vmatpush1.bf16.msra.mxu1 %v7481_v23  ;;  %2542 = vmatprep.subr.bf16.mxu0 %v7487_v6  ;;  %11222 = vst [vmem:[#allocation74_spill] sm:$0xff] %v7499_v63  ;;  %v7505_v23 = vld [vmem:[%s10832_s1 + $0x200] ss:$16 sps:$4 sm:$0xff]   ;;  %v7511_v6 = vld [vmem:[%s10832_s1 + $0x1e4] ss:$16 sps:$4 sm:$0xff]  }
 0x15d   :  { %2583 = vmatprep.subr.bf16.mxu1 %v7493_v62  ;;  %11223 = vst [vmem:[#allocation75_spill] sm:$0xff] %v7505_v23  ;;  %11224 = vst [vmem:[#allocation76_spill] sm:$0xff] %v7511_v6  ;;  %v7517_v62 = vld [vmem:[%s10832_s1 + $0x3e4] ss:$16 sps:$4 sm:$0xff]  }
 0x15e   :  { %11225 = vst [vmem:[#allocation77_spill] sm:$0xff] %v7517_v62 }
 0x15f   :  { %2543 = vmatpush1.bf16.msra.mxu0 %v7499_v63  ;;  %v7523_v63 = vld [vmem:[%s10832_s1 + $0x1e0] ss:$16 sps:$4 sm:$0xff]  }
 0x160   :  { %2584 = vmatpush1.bf16.msra.mxu1 %v7505_v23  ;;  %2544 = vmatprep.subr.bf16.mxu0 %v7511_v6  ;;  %11226 = vst [vmem:[#allocation78_spill] sm:$0xff] %v7523_v63  ;;  %v7529_v23 = vld [vmem:[%s10832_s1 + $0x3e0] ss:$16 sps:$4 sm:$0xff]   ;;  %v7535_v6 = vld [vmem:[%s10832_s1 + $0x1c4] ss:$16 sps:$4 sm:$0xff]  }
 0x161   :  { %2585 = vmatprep.subr.bf16.mxu1 %v7517_v62  ;;  %11227 = vst [vmem:[#allocation79_spill] sm:$0xff] %v7529_v23  ;;  %11228 = vst [vmem:[#allocation80_spill] sm:$0xff] %v7535_v6  ;;  %v7541_v62 = vld [vmem:[%s10832_s1 + $0x3c4] ss:$16 sps:$4 sm:$0xff]  }
 0x162   :  { %11229 = vst [vmem:[#allocation81_spill] sm:$0xff] %v7541_v62 }
 0x163   :  { %2545 = vmatpush2.bf16.msra.mxu0 %v7523_v63  ;;  %v7547_v63 = vld [vmem:[%s10832_s1 + $0x1c0] ss:$16 sps:$4 sm:$0xff]  }
 0x164   :  { %2586 = vmatpush2.bf16.msra.mxu1 %v7529_v23  ;;  %2546 = vmatprep.subr.bf16.mxu0 %v7535_v6  ;;  %11230 = vst [vmem:[#allocation82_spill] sm:$0xff] %v7547_v63  ;;  %v7553_v23 = vld [vmem:[%s10832_s1 + $0x3c0] ss:$16 sps:$4 sm:$0xff]   ;;  %v7559_v6 = vld [vmem:[%s10832_s1 + $0x1a4] ss:$16 sps:$4 sm:$0xff]  }
 0x165   :  { %2587 = vmatprep.subr.bf16.mxu1 %v7541_v62  ;;  %11231 = vst [vmem:[#allocation83_spill] sm:$0xff] %v7553_v23  ;;  %11232 = vst [vmem:[#allocation84_spill] sm:$0xff] %v7559_v6  ;;  %v7565_v62 = vld [vmem:[%s10832_s1 + $0x3a4] ss:$16 sps:$4 sm:$0xff]  }
 0x166   :  { %11233 = vst [vmem:[#allocation85_spill] sm:$0xff] %v7565_v62 }
 0x167   :  { %2547 = vmatpush2.bf16.msra.mxu0 %v7547_v63  ;;  %v7571_v63 = vld [vmem:[%s10832_s1 + $0x1a0] ss:$16 sps:$4 sm:$0xff]  }
 0x168   :  { %2588 = vmatpush2.bf16.msra.mxu1 %v7553_v23  ;;  %2548 = vmatprep.subr.bf16.mxu0 %v7559_v6  ;;  %11234 = vst [vmem:[#allocation86_spill] sm:$0xff] %v7571_v63  ;;  %v7577_v23 = vld [vmem:[%s10832_s1 + $0x3a0] ss:$16 sps:$4 sm:$0xff]   ;;  %v7583_v6 = vld [vmem:[%s10832_s1 + $0x184] ss:$16 sps:$4 sm:$0xff]  }
 0x169   :  { %2589 = vmatprep.subr.bf16.mxu1 %v7565_v62  ;;  %11235 = vst [vmem:[#allocation87_spill] sm:$0xff] %v7577_v23  ;;  %11236 = vst [vmem:[#allocation88_spill] sm:$0xff] %v7583_v6  ;;  %v7589_v62 = vld [vmem:[%s10832_s1 + $0x384] ss:$16 sps:$4 sm:$0xff]  }
 0x16a   :  { %11237 = vst [vmem:[#allocation89_spill] sm:$0xff] %v7589_v62 }
 0x16b   :  { %2549 = vmatpush2.bf16.msra.mxu0 %v7571_v63  ;;  %v7595_v63 = vld [vmem:[%s10832_s1 + $0x180] ss:$16 sps:$4 sm:$0xff]  }
 0x16c   :  { %2590 = vmatpush2.bf16.msra.mxu1 %v7577_v23  ;;  %2550 = vmatprep.subr.bf16.mxu0 %v7583_v6  ;;  %11238 = vst [vmem:[#allocation90_spill] sm:$0xff] %v7595_v63  ;;  %v7601_v23 = vld [vmem:[%s10832_s1 + $0x380] ss:$16 sps:$4 sm:$0xff]   ;;  %v7607_v6 = vld [vmem:[%s10832_s1 + $0x164] ss:$16 sps:$4 sm:$0xff]  }
 0x16d   :  { %2591 = vmatprep.subr.bf16.mxu1 %v7589_v62  ;;  %11239 = vst [vmem:[#allocation91_spill] sm:$0xff] %v7601_v23  ;;  %11240 = vst [vmem:[#allocation92_spill] sm:$0xff] %v7607_v6  ;;  %v7613_v62 = vld [vmem:[%s10832_s1 + $0x364] ss:$16 sps:$4 sm:$0xff]  }
 0x16e   :  { %11241 = vst [vmem:[#allocation93_spill] sm:$0xff] %v7613_v62 }
 0x16f   :  { %2551 = vmatpush2.bf16.msra.mxu0 %v7595_v63  ;;  %v2447_v63 = vcombine.high %v7227_v59, %v7227_v59  ;;  %v7639_v59 = vld [vmem:[%s10832_s1 + $0x344] ss:$16 sps:$4 sm:$0xff]  }
 0x170   :  { %2592 = vmatpush2.bf16.msra.mxu1 %v7601_v23  ;;  %2552 = vmatprep.subr.bf16.mxu0 %v7607_v6  ;;  %v7621_v23 = vld [vmem:[%s10832_s1 + $0x160] ss:$16 sps:$4 sm:$0xff]   ;;  %11245 = vst [vmem:[#allocation97_spill] sm:$0xff] %v7639_v59 }
 0x171   :  { %2593 = vmatprep.subr.bf16.mxu1 %v7613_v62  ;;  %11242 = vst [vmem:[#allocation94_spill] sm:$0xff] %v7621_v23  ;;  %v7627_v6 = vld [vmem:[%s10832_s1 + $0x360] ss:$16 sps:$4 sm:$0xff]   ;;  %v7633_v62 = vld [vmem:[%s10832_s1 + $0x144] ss:$16 sps:$4 sm:$0xff]  }
 0x172   :  { %11243 = vst [vmem:[#allocation95_spill] sm:$0xff] %v7627_v6  ;;  %11244 = vst [vmem:[#allocation96_spill] sm:$0xff] %v7633_v62 }
 0x173   :  { %2553 = vmatpush2.bf16.msra.mxu0 %v7621_v23  ;;  %v7643_v23 = vrot.slane %v2447_v63, %v6144_v49  ;;  %v7666_v63 = vld [vmem:[%s10832_s1 + $0x324] ss:$16 sps:$4 sm:$0xff]  }
 0x174   :  { %2594 = vmatpush2.bf16.msra.mxu1 %v7627_v6  ;;  %2554 = vmatprep.subr.bf16.mxu0 %v7633_v62  ;;  %v7648_v6 = vld [vmem:[%s10832_s1 + $0x140] ss:$16 sps:$4 sm:$0xff]   ;;  %11249 = vst [vmem:[#allocation101_spill] sm:$0xff] %v7666_v63 }
 0x175   :  { %2595 = vmatprep.subr.bf16.mxu1 %v7639_v59  ;;  %11246 = vst [vmem:[#allocation98_spill] sm:$0xff] %v7648_v6  ;;  %v7654_v62 = vld [vmem:[%s10832_s1 + $0x340] ss:$16 sps:$4 sm:$0xff]   ;;  %v7660_v59 = vld [vmem:[%s10832_s1 + $0x124] ss:$16 sps:$4 sm:$0xff]  }
 0x176   :  { %11247 = vst [vmem:[#allocation99_spill] sm:$0xff] %v7654_v62  ;;  %11248 = vst [vmem:[#allocation100_spill] sm:$0xff] %v7660_v59 }
 0x177   :  { %2555 = vmatpush2.bf16.msra.mxu0 %v7648_v6  ;;  %v2463_v6 = vcombine.high %v7643_v23, %v7643_v23 }
 0x178   :  { %2596 = vmatpush2.bf16.msra.mxu1 %v7654_v62  ;;  %2556 = vmatprep.subr.bf16.mxu0 %v7660_v59  ;;  %v7673_v62 = vrot.slane %v7255_v55, %v6144_v49  ;;  %v7684_v59 = vld [vmem:[%s10832_s1 + $0x320] ss:$16 sps:$4 sm:$0xff]   ;;  %v7696_v55 = vld [vmem:[%s10832_s1 + $0x304] ss:$16 sps:$4 sm:$0xff]  }
 0x179   :  { %2597 = vmatprep.subr.bf16.mxu1 %v7666_v63  ;;  %11251 = vst [vmem:[#allocation103_spill] sm:$0xff] %v7684_v59  ;;  %v7690_v63 = vld [vmem:[%s10832_s1 + $0x104] ss:$16 sps:$4 sm:$0xff]   ;;  %11253 = vst [vmem:[#allocation105_spill] sm:$0xff] %v7696_v55 }
 0x17a   :  { %11252 = vst [vmem:[#allocation104_spill] sm:$0xff] %v7690_v63 }
 0x17b   :  { %2557 = vmatpush2.bf16.msra.mxu0 %v7678_v4  ;;  %v7700_v4 = vrot.slane %v2463_v6, %v6144_v49  ;;  %v7721_v6 = vld [vmem:[%s10832_s1 + $0x4e4] ss:$16 sps:$4 sm:$0xff]  }
 0x17c   :  { %2598 = vmatpush2.bf16.msra.mxu1 %v7684_v59  ;;  %2558 = vmatprep.subr.bf16.mxu0 %v7690_v63  ;;  %v7704_v59 = vcombine.high %v7673_v62, %v7673_v62  ;;  %v7715_v63 = vld [vmem:[%s10832_s1 + $0x300] ss:$16 sps:$4 sm:$0xff]   ;;  %11256 = vst [vmem:[#allocation108_spill] sm:$0xff] %v7721_v6 }
 0x17d   :  { %2599 = vmatprep.subr.bf16.mxu1 %v7696_v55  ;;  %11255 = vst [vmem:[#allocation107_spill] sm:$0xff] %v7715_v63  ;;  %v7727_v55 = vld [vmem:[%s10832_s1 + $0x6e4] ss:$16 sps:$4 sm:$0xff]  }
 0x17e   :  { %11257 = vst [vmem:[#allocation109_spill] sm:$0xff] %v7727_v55 }
 0x17f   :  { %2559 = vmatpush2.bf16.msra.mxu0 %v7709_v18  ;;  %v7732_v18 = vcombine.high %v7700_v4, %v7700_v4 }
 0x180   :  { %2600 = vmatpush2.bf16.msra.mxu1 %v7715_v63  ;;  %2610 = vmatprep.subr.bf16.mxu0 %v7721_v6 }
 0x181   :  { %2651 = vmatprep.subr.bf16.mxu1 %v7727_v55  ;;  %v7750_v55 = vld [vmem:[%s10832_s1 + $0x6e0] ss:$16 sps:$4 sm:$0xff]  }
 0x182   :  { %v2231_v30 = vpop.f32.mrf.mxu0  ;;  %2561 = vmatmul.mubr.bf16.vlgmr.msra.gmra.mxu0 %v7673_v62  ;;  %11260 = vst [vmem:[#allocation112_spill] sm:$0xff] %v7750_v55 }
 0x183   :  { %v7734_v63 = vpop.f32.mrf.mxu1  ;;  %2602 = vmatmul.mubr.bf16.vlgmr.msra.gmra.mxu1 %v7704_v59  ;;  %v7739_v6 = vadd.f32 %v2231_v30, %v7345_v1  ;;  %2611 = vmatpush1.bf16.msra.mxu0 %v7744_v43  ;;  %v7758_v1 = vld [vmem:[%s10832_s1 + $0x4c4] ss:$16 sps:$4 sm:$0xff]  }
 0x184   :  { %2652 = vmatpush1.bf16.msra.mxu1 %v7750_v55  ;;  %v2233_v61 = vpop.f32.mrf.mxu0  ;;  %11261 = vst [vmem:[#allocation113_spill] sm:$0xff] %v7758_v1  ;;  %2612 = vmatprep.subr.bf16.mxu0 %v7758_v1  ;;  %v7764_v30 = vld [vmem:[%s10832_s1 + $0x6c4] ss:$16 sps:$4 sm:$0xff]   ;;  %v7775_v1 = vld [vmem:[%s10832_s1 + $0x4c0] ss:$16 sps:$4 sm:$0xff]  }
 0x185   :  { %11258 = vst [vmem:[#allocation110_spill] sm:$0xff] %v7739_v6  ;;  %v7753_v56 = vpop.f32.mrf.mxu1  ;;  %11262 = vst [vmem:[#allocation114_spill] sm:$0xff] %v7764_v30  ;;  %2653 = vmatprep.subr.bf16.mxu1 %v7764_v30  ;;  %v7768_v6 = vadd.f32 %v2233_v61, %v7350_v29  ;;  %2642 = vmatprep.mubr.bf16.mxu0 %v7700_v4  ;;  %v7781_v30 = vld [vmem:[%s10832_s1 + $0x6c0] ss:$16 sps:$4 sm:$0xff]  }
 0x186   :  { %2683 = vmatprep.mubr.bf16.mxu1 %v7732_v18  ;;  %v2235_v55 = vpop.f32.mrf.mxu0  ;;  %11264 = vst [vmem:[#allocation116_spill] sm:$0xff] %v7775_v1  ;;  %11265 = vst [vmem:[#allocation117_spill] sm:$0xff] %v7781_v30 }
 0x187   :  { %11263 = vst [vmem:[#allocation115_spill] sm:$0xff] %v7768_v6  ;;  %v2276_v43 = vpop.f32.mrf.mxu1  ;;  %2613 = vmatpush1.bf16.msra.mxu0 %v7775_v1  ;;  %v7793_v55 = vld [vmem:[%s10832_s1 + $0x6a4] ss:$16 sps:$4 sm:$0xff]   ;;  %v8126_v1 = vld [vmem:[%s10832_s1 + $0x500] ss:$16 sps:$4 sm:$0xff]  }
 0x188   :  { %2654 = vmatpush1.bf16.msra.mxu1 %v7781_v30  ;;  %v2236_v29 = vpop.f32.mrf.mxu0  ;;  %v7787_v43 = vld [vmem:[%s10832_s1 + $0x4a4] ss:$16 sps:$4 sm:$0xff]   ;;  %11267 = vst [vmem:[#allocation119_spill] sm:$0xff] %v7793_v55  ;;  %v7799_v30 = vld [vmem:[%s10832_s1 + $0x4a0] ss:$16 sps:$4 sm:$0xff]   ;;  %11321 = vst [vmem:[#allocation173_spill] sm:$0xff] %v8126_v1 }
 0x189   :  { %v2277_v61 = vpop.f32.mrf.mxu1  ;;  %11266 = vst [vmem:[#allocation118_spill] sm:$0xff] %v7787_v43  ;;  %2614 = vmatprep.subr.bf16.mxu0 %v7787_v43  ;;  %2655 = vmatprep.subr.bf16.mxu1 %v7793_v55  ;;  %11268 = vst [vmem:[#allocation120_spill] sm:$0xff] %v7799_v30  ;;  %v7805_v29 = vld [vmem:[%s10832_s1 + $0x6a0] ss:$16 sps:$4 sm:$0xff]   ;;  %v7817_v55 = vld [vmem:[%s10832_s1 + $0x684] ss:$16 sps:$4 sm:$0xff]  }
 0x18a   :  { %11269 = vst [vmem:[#allocation121_spill] sm:$0xff] %v7805_v29  ;;  %v7811_v61 = vld [vmem:[%s10832_s1 + $0x484] ss:$16 sps:$4 sm:$0xff]   ;;  %11271 = vst [vmem:[#allocation123_spill] sm:$0xff] %v7817_v55  ;;  %v8144_v6 = vld [vmem:[%s10832_s1 + $0xec] ss:$16 sps:$4 sm:$0xff]  }
 0x18b   :  { %2615 = vmatpush1.bf16.msra.mxu0 %v7799_v30  ;;  %11270 = vst [vmem:[#allocation122_spill] sm:$0xff] %v7811_v61  ;;  %v7823_v30 = vld [vmem:[%s10832_s1 + $0x480] ss:$16 sps:$4 sm:$0xff]   ;;  %v8114_v43 = vld [vmem:[%s10832_s1 + $0x704] ss:$16 sps:$4 sm:$0xff]   ;;  %11324 = vst [vmem:[#allocation176_spill] sm:$0xff] %v8144_v6 }
 0x18c   :  { %2656 = vmatpush1.bf16.msra.mxu1 %v7805_v29  ;;  %2616 = vmatprep.subr.bf16.mxu0 %v7811_v61  ;;  %11272 = vst [vmem:[#allocation124_spill] sm:$0xff] %v7823_v30  ;;  %v7829_v29 = vld [vmem:[%s10832_s1 + $0x680] ss:$16 sps:$4 sm:$0xff]   ;;  %v7835_v61 = vld [vmem:[%s10832_s1 + $0x464] ss:$16 sps:$4 sm:$0xff]   ;;  %11319 = vst [vmem:[#allocation171_spill] sm:$0xff] %v8114_v43 }
 0x18d   :  { %2657 = vmatprep.subr.bf16.mxu1 %v7817_v55  ;;  %11273 = vst [vmem:[#allocation125_spill] sm:$0xff] %v7829_v29  ;;  %11274 = vst [vmem:[#allocation126_spill] sm:$0xff] %v7835_v61  ;;  %v7841_v55 = vld [vmem:[%s10832_s1 + $0x664] ss:$16 sps:$4 sm:$0xff]  }
 0x18e   :  { %11275 = vst [vmem:[#allocation127_spill] sm:$0xff] %v7841_v55 }
 0x18f   :  { %2617 = vmatpush1.bf16.msra.mxu0 %v7823_v30  ;;  %v7847_v30 = vld [vmem:[%s10832_s1 + $0x460] ss:$16 sps:$4 sm:$0xff]  }
 0x190   :  { %2658 = vmatpush1.bf16.msra.mxu1 %v7829_v29  ;;  %2618 = vmatprep.subr.bf16.mxu0 %v7835_v61  ;;  %11276 = vst [vmem:[#allocation128_spill] sm:$0xff] %v7847_v30  ;;  %v7853_v29 = vld [vmem:[%s10832_s1 + $0x660] ss:$16 sps:$4 sm:$0xff]   ;;  %v7859_v61 = vld [vmem:[%s10832_s1 + $0x444] ss:$16 sps:$4 sm:$0xff]  }
 0x191   :  { %2659 = vmatprep.subr.bf16.mxu1 %v7841_v55  ;;  %11277 = vst [vmem:[#allocation129_spill] sm:$0xff] %v7853_v29  ;;  %11278 = vst [vmem:[#allocation130_spill] sm:$0xff] %v7859_v61  ;;  %v7865_v55 = vld [vmem:[%s10832_s1 + $0x644] ss:$16 sps:$4 sm:$0xff]  }
 0x192   :  { %11279 = vst [vmem:[#allocation131_spill] sm:$0xff] %v7865_v55 }
 0x193   :  { %2619 = vmatpush1.bf16.msra.mxu0 %v7847_v30  ;;  %v7871_v30 = vld [vmem:[%s10832_s1 + $0x440] ss:$16 sps:$4 sm:$0xff]  }
 0x194   :  { %2660 = vmatpush1.bf16.msra.mxu1 %v7853_v29  ;;  %2620 = vmatprep.subr.bf16.mxu0 %v7859_v61  ;;  %11280 = vst [vmem:[#allocation132_spill] sm:$0xff] %v7871_v30  ;;  %v7877_v29 = vld [vmem:[%s10832_s1 + $0x640] ss:$16 sps:$4 sm:$0xff]   ;;  %v7883_v61 = vld [vmem:[%s10832_s1 + $0x424] ss:$16 sps:$4 sm:$0xff]  }
 0x195   :  { %2661 = vmatprep.subr.bf16.mxu1 %v7865_v55  ;;  %11281 = vst [vmem:[#allocation133_spill] sm:$0xff] %v7877_v29  ;;  %11282 = vst [vmem:[#allocation134_spill] sm:$0xff] %v7883_v61  ;;  %v7889_v55 = vld [vmem:[%s10832_s1 + $0x624] ss:$16 sps:$4 sm:$0xff]  }
 0x196   :  { %11283 = vst [vmem:[#allocation135_spill] sm:$0xff] %v7889_v55 }
 0x197   :  { %2621 = vmatpush1.bf16.msra.mxu0 %v7871_v30  ;;  %v7895_v30 = vld [vmem:[%s10832_s1 + $0x420] ss:$16 sps:$4 sm:$0xff]  }
 0x198   :  { %2662 = vmatpush1.bf16.msra.mxu1 %v7877_v29  ;;  %2622 = vmatprep.subr.bf16.mxu0 %v7883_v61  ;;  %11284 = vst [vmem:[#allocation136_spill] sm:$0xff] %v7895_v30  ;;  %v7901_v29 = vld [vmem:[%s10832_s1 + $0x620] ss:$16 sps:$4 sm:$0xff]   ;;  %v7907_v61 = vld [vmem:[%s10832_s1 + $0x404] ss:$16 sps:$4 sm:$0xff]  }
 0x199   :  { %2663 = vmatprep.subr.bf16.mxu1 %v7889_v55  ;;  %11285 = vst [vmem:[#allocation137_spill] sm:$0xff] %v7901_v29  ;;  %11286 = vst [vmem:[#allocation138_spill] sm:$0xff] %v7907_v61  ;;  %v7913_v55 = vld [vmem:[%s10832_s1 + $0x604] ss:$16 sps:$4 sm:$0xff]  }
 0x19a   :  { %11287 = vst [vmem:[#allocation139_spill] sm:$0xff] %v7913_v55 }
 0x19b   :  { %2623 = vmatpush1.bf16.msra.mxu0 %v7895_v30  ;;  %v7919_v30 = vld [vmem:[%s10832_s1 + $0x400] ss:$16 sps:$4 sm:$0xff]  }
 0x19c   :  { %2664 = vmatpush1.bf16.msra.mxu1 %v7901_v29  ;;  %2624 = vmatprep.subr.bf16.mxu0 %v7907_v61  ;;  %11288 = vst [vmem:[#allocation140_spill] sm:$0xff] %v7919_v30  ;;  %v7925_v29 = vld [vmem:[%s10832_s1 + $0x600] ss:$16 sps:$4 sm:$0xff]   ;;  %v7931_v61 = vld [vmem:[%s10832_s1 + $0x5e4] ss:$16 sps:$4 sm:$0xff]  }
 0x19d   :  { %2665 = vmatprep.subr.bf16.mxu1 %v7913_v55  ;;  %11289 = vst [vmem:[#allocation141_spill] sm:$0xff] %v7925_v29  ;;  %11290 = vst [vmem:[#allocation142_spill] sm:$0xff] %v7931_v61  ;;  %v7937_v55 = vld [vmem:[%s10832_s1 + $0x7e4] ss:$16 sps:$4 sm:$0xff]  }
 0x19e   :  { %11291 = vst [vmem:[#allocation143_spill] sm:$0xff] %v7937_v55 }
 0x19f   :  { %2625 = vmatpush1.bf16.msra.mxu0 %v7919_v30  ;;  %v7943_v30 = vld [vmem:[%s10832_s1 + $0x5e0] ss:$16 sps:$4 sm:$0xff]  }
 0x1a0   :  { %2666 = vmatpush1.bf16.msra.mxu1 %v7925_v29  ;;  %2626 = vmatprep.subr.bf16.mxu0 %v7931_v61  ;;  %11292 = vst [vmem:[#allocation144_spill] sm:$0xff] %v7943_v30  ;;  %v7949_v29 = vld [vmem:[%s10832_s1 + $0x7e0] ss:$16 sps:$4 sm:$0xff]   ;;  %v7955_v61 = vld [vmem:[%s10832_s1 + $0x5c4] ss:$16 sps:$4 sm:$0xff]  }
 0x1a1   :  { %2667 = vmatprep.subr.bf16.mxu1 %v7937_v55  ;;  %11293 = vst [vmem:[#allocation145_spill] sm:$0xff] %v7949_v29  ;;  %11294 = vst [vmem:[#allocation146_spill] sm:$0xff] %v7955_v61  ;;  %v7961_v55 = vld [vmem:[%s10832_s1 + $0x7c4] ss:$16 sps:$4 sm:$0xff]  }
 0x1a2   :  { %11295 = vst [vmem:[#allocation147_spill] sm:$0xff] %v7961_v55 }
 0x1a3   :  { %2627 = vmatpush2.bf16.msra.mxu0 %v7943_v30  ;;  %v7967_v30 = vld [vmem:[%s10832_s1 + $0x5c0] ss:$16 sps:$4 sm:$0xff]  }
 0x1a4   :  { %2668 = vmatpush2.bf16.msra.mxu1 %v7949_v29  ;;  %2628 = vmatprep.subr.bf16.mxu0 %v7955_v61  ;;  %11296 = vst [vmem:[#allocation148_spill] sm:$0xff] %v7967_v30  ;;  %v7973_v29 = vld [vmem:[%s10832_s1 + $0x7c0] ss:$16 sps:$4 sm:$0xff]   ;;  %v7979_v61 = vld [vmem:[%s10832_s1 + $0x5a4] ss:$16 sps:$4 sm:$0xff]  }
 0x1a5   :  { %2669 = vmatprep.subr.bf16.mxu1 %v7961_v55  ;;  %11297 = vst [vmem:[#allocation149_spill] sm:$0xff] %v7973_v29  ;;  %11298 = vst [vmem:[#allocation150_spill] sm:$0xff] %v7979_v61  ;;  %v7985_v55 = vld [vmem:[%s10832_s1 + $0x7a4] ss:$16 sps:$4 sm:$0xff]  }
 0x1a6   :  { %11299 = vst [vmem:[#allocation151_spill] sm:$0xff] %v7985_v55 }
 0x1a7   :  { %2629 = vmatpush2.bf16.msra.mxu0 %v7967_v30  ;;  %v7991_v30 = vld [vmem:[%s10832_s1 + $0x5a0] ss:$16 sps:$4 sm:$0xff]  }
 0x1a8   :  { %2670 = vmatpush2.bf16.msra.mxu1 %v7973_v29  ;;  %2630 = vmatprep.subr.bf16.mxu0 %v7979_v61  ;;  %11300 = vst [vmem:[#allocation152_spill] sm:$0xff] %v7991_v30  ;;  %v7997_v29 = vld [vmem:[%s10832_s1 + $0x7a0] ss:$16 sps:$4 sm:$0xff]   ;;  %v8003_v61 = vld [vmem:[%s10832_s1 + $0x584] ss:$16 sps:$4 sm:$0xff]  }
 0x1a9   :  { %2671 = vmatprep.subr.bf16.mxu1 %v7985_v55  ;;  %11301 = vst [vmem:[#allocation153_spill] sm:$0xff] %v7997_v29  ;;  %11302 = vst [vmem:[#allocation154_spill] sm:$0xff] %v8003_v61  ;;  %v8009_v55 = vld [vmem:[%s10832_s1 + $0x784] ss:$16 sps:$4 sm:$0xff]  }
 0x1aa   :  { %11303 = vst [vmem:[#allocation155_spill] sm:$0xff] %v8009_v55 }
 0x1ab   :  { %2631 = vmatpush2.bf16.msra.mxu0 %v7991_v30  ;;  %v8015_v30 = vld [vmem:[%s10832_s1 + $0x580] ss:$16 sps:$4 sm:$0xff]  }
 0x1ac   :  { %2672 = vmatpush2.bf16.msra.mxu1 %v7997_v29  ;;  %2632 = vmatprep.subr.bf16.mxu0 %v8003_v61  ;;  %11304 = vst [vmem:[#allocation156_spill] sm:$0xff] %v8015_v30  ;;  %v8021_v29 = vld [vmem:[%s10832_s1 + $0x780] ss:$16 sps:$4 sm:$0xff]   ;;  %v8027_v61 = vld [vmem:[%s10832_s1 + $0x564] ss:$16 sps:$4 sm:$0xff]  }
 0x1ad   :  { %2673 = vmatprep.subr.bf16.mxu1 %v8009_v55  ;;  %11305 = vst [vmem:[#allocation157_spill] sm:$0xff] %v8021_v29  ;;  %11306 = vst [vmem:[#allocation158_spill] sm:$0xff] %v8027_v61  ;;  %v8033_v55 = vld [vmem:[%s10832_s1 + $0x764] ss:$16 sps:$4 sm:$0xff]  }
 0x1ae   :  { %11307 = vst [vmem:[#allocation159_spill] sm:$0xff] %v8033_v55 }
 0x1af   :  { %2633 = vmatpush2.bf16.msra.mxu0 %v8015_v30  ;;  %v8039_v30 = vld [vmem:[%s10832_s1 + $0x560] ss:$16 sps:$4 sm:$0xff]  }
 0x1b0   :  { %2674 = vmatpush2.bf16.msra.mxu1 %v8021_v29  ;;  %2634 = vmatprep.subr.bf16.mxu0 %v8027_v61  ;;  %11308 = vst [vmem:[#allocation160_spill] sm:$0xff] %v8039_v30  ;;  %v8045_v29 = vld [vmem:[%s10832_s1 + $0x760] ss:$16 sps:$4 sm:$0xff]   ;;  %v8051_v61 = vld [vmem:[%s10832_s1 + $0x544] ss:$16 sps:$4 sm:$0xff]  }
 0x1b1   :  { %2675 = vmatprep.subr.bf16.mxu1 %v8033_v55  ;;  %11309 = vst [vmem:[#allocation161_spill] sm:$0xff] %v8045_v29  ;;  %11310 = vst [vmem:[#allocation162_spill] sm:$0xff] %v8051_v61  ;;  %v8057_v55 = vld [vmem:[%s10832_s1 + $0x744] ss:$16 sps:$4 sm:$0xff]  }
 0x1b2   :  { %11311 = vst [vmem:[#allocation163_spill] sm:$0xff] %v8057_v55 }
 0x1b3   :  { %2635 = vmatpush2.bf16.msra.mxu0 %v8039_v30  ;;  %v8063_v30 = vld [vmem:[%s10832_s1 + $0x540] ss:$16 sps:$4 sm:$0xff]  }
 0x1b4   :  { %2676 = vmatpush2.bf16.msra.mxu1 %v8045_v29  ;;  %2636 = vmatprep.subr.bf16.mxu0 %v8051_v61  ;;  %11312 = vst [vmem:[#allocation164_spill] sm:$0xff] %v8063_v30  ;;  %v8069_v29 = vld [vmem:[%s10832_s1 + $0x740] ss:$16 sps:$4 sm:$0xff]   ;;  %v8075_v61 = vld [vmem:[%s10832_s1 + $0x524] ss:$16 sps:$4 sm:$0xff]  }
 0x1b5   :  { %2677 = vmatprep.subr.bf16.mxu1 %v8057_v55  ;;  %11313 = vst [vmem:[#allocation165_spill] sm:$0xff] %v8069_v29  ;;  %11314 = vst [vmem:[#allocation166_spill] sm:$0xff] %v8075_v61  ;;  %v8081_v55 = vld [vmem:[%s10832_s1 + $0x724] ss:$16 sps:$4 sm:$0xff]  }
 0x1b6   :  { %11315 = vst [vmem:[#allocation167_spill] sm:$0xff] %v8081_v55 }
 0x1b7   :  { %2637 = vmatpush2.bf16.msra.mxu0 %v8063_v30  ;;  %v8086_v30 = vrot.slane %v7643_v23, %v6144_v49  ;;  %v8108_v23 = vld [vmem:[%s10832_s1 + $0x504] ss:$16 sps:$4 sm:$0xff]  }
 0x1b8   :  { %2678 = vmatpush2.bf16.msra.mxu1 %v8069_v29  ;;  %2638 = vmatprep.subr.bf16.mxu0 %v8075_v61  ;;  %v8091_v29 = vld.sshfl [vmem:[%s10831_s0 + $0x12] sm:$0x11 pattern:$0x75316420]  ;;  %11318 = vst [vmem:[#allocation170_spill] sm:$0xff] %v8108_v23 }
 0x1b9   :  { %2679 = vmatprep.subr.bf16.mxu1 %v8081_v55  ;;  %v8096_v61 = vld [vmem:[%s10832_s1 + $0x520] ss:$16 sps:$4 sm:$0xff]  }
 0x1ba   :  { %11316 = vst [vmem:[#allocation168_spill] sm:$0xff] %v8096_v61  ;;  %v8102_v55 = vld [vmem:[%s10832_s1 + $0x720] ss:$16 sps:$4 sm:$0xff]  }
 0x1bb   :  { %2639 = vmatpush2.bf16.msra.mxu0 %v8096_v61  ;;  %11317 = vst [vmem:[#allocation169_spill] sm:$0xff] %v8102_v55  ;;  %v2503_v61 = vcombine.high %v8091_v29, %v8091_v29 }
 0x1bc   :  { %2680 = vmatpush2.bf16.msra.mxu1 %v8102_v55  ;;  %2640 = vmatprep.subr.bf16.mxu0 %v8108_v23  ;;  %v8121_v55 = vcombine.high %v8086_v30, %v8086_v30  ;;  %v8132_v23 = vld [vmem:[%s10832_s1 + $0x700] ss:$16 sps:$4 sm:$0xff]  }
 0x1bd   :  { %2681 = vmatprep.subr.bf16.mxu1 %v8114_v43  ;;  %11322 = vst [vmem:[#allocation174_spill] sm:$0xff] %v8132_v23  ;;  %v8138_v43 = vld [vmem:[%s10832_s1 + $0x8e4] ss:$16 sps:$4 sm:$0xff]  }
 0x1be   :  { %11320 = vst [vmem:[#allocation172_spill] sm:$0xff] %v8121_v55  ;;  %11323 = vst [vmem:[#allocation175_spill] sm:$0xff] %v8138_v43 }
 0x1bf   :  { %2641 = vmatpush2.bf16.msra.mxu0 %v8126_v1  ;;  %v8148_v1 = vrot.slane %v2503_v61, %v6144_v49  ;;  %v8162_v61 = vld [vmem:[%s10832_s1 + $0xe8] ss:$16 sps:$4 sm:$0xff]  }
 0x1c0   :  { %2682 = vmatpush2.bf16.msra.mxu1 %v8132_v23  ;;  %2692 = vmatprep.subr.bf16.mxu0 %v8138_v43  ;;  %v8156_v43 = vld [vmem:[%s10832_s1 + $0x8e0] ss:$16 sps:$4 sm:$0xff]   ;;  %11326 = vst [vmem:[#allocation178_spill] sm:$0xff] %v8162_v61 }
 0x1c1   :  { %2733 = vmatprep.subr.bf16.mxu1 %v8144_v6  ;;  %11325 = vst [vmem:[#allocation177_spill] sm:$0xff] %v8156_v43 }
 0x1c2   :  { %v2313_v28 = vpop.f32.mrf.mxu0  ;;  %2643 = vmatmul.mubr.bf16.vlgmr.msra.gmra.mxu0 %v8086_v30 }
 0x1c3   :  { %v2354_v27 = vpop.f32.mrf.mxu1  ;;  %2684 = vmatmul.mubr.bf16.vlgmr.msra.gmra.mxu1 %v8121_v55  ;;  %v2314_v23 = vadd.f32 %v2313_v28, %v7734_v63  ;;  %2693 = vmatpush1.bf16.msra.mxu0 %v8156_v43  ;;  %v8168_v28 = vld [vmem:[%s10832_s1 + $0x8c4] ss:$16 sps:$4 sm:$0xff]   ;;  %v8174_v63 = vld [vmem:[%s10832_s1 + $0xcc] ss:$16 sps:$4 sm:$0xff]  }
 0x1c4   :  { %2734 = vmatpush1.bf16.msra.mxu1 %v8162_v61  ;;  %v2315_v6 = vpop.f32.mrf.mxu0  ;;  %11327 = vst [vmem:[#allocation179_spill] sm:$0xff] %v8168_v28  ;;  %2694 = vmatprep.subr.bf16.mxu0 %v8168_v28  ;;  %v8187_v28 = vld [vmem:[%s10832_s1 + $0x8c0] ss:$16 sps:$4 sm:$0xff]  }
 0x1c5   :  { %v2356_v25 = vpop.f32.mrf.mxu1  ;;  %2735 = vmatprep.subr.bf16.mxu1 %v8174_v63  ;;  %v8177_v43 = vadd.f32 %v2354_v27, %v2314_v23  ;;  %v2316_v61 = vadd.f32 %v2315_v6, %v7753_v56  ;;  %2724 = vmatprep.mubr.bf16.mxu0 %v8148_v1  ;;  %v8193_v27 = vld [vmem:[%s10832_s1 + $0xc8] ss:$16 sps:$4 sm:$0xff]   ;;  %v8211_v6 = vld [vmem:[%s10832_s1 + $0x8a0] ss:$16 sps:$4 sm:$0xff]   ;;  %v8223_v23 = vld [vmem:[%s10832_s1 + $0x884] ss:$16 sps:$4 sm:$0xff]  }
 0x1c6   :  { %2765 = vmatprep.mubr.bf16.mxu1 %v7298_v31  ;;  %v2317_v55 = vpop.f32.mrf.mxu0  ;;  %11328 = vst [vmem:[#allocation180_spill] sm:$0xff] %v8193_v27  ;;  %11331 = vst [vmem:[#allocation183_spill] sm:$0xff] %v8211_v6 }
 0x1c7   :  { %v2358_v24 = vpop.f32.mrf.mxu1  ;;  %v8182_v22 = vadd.f32 %v2356_v25, %v2316_v61  ;;  %2695 = vmatpush1.bf16.msra.mxu0 %v8187_v28  ;;  %v8205_v25 = vld [vmem:[%s10832_s1 + $0xac] ss:$16 sps:$4 sm:$0xff]   ;;  %v8217_v55 = vld [vmem:[%s10832_s1 + $0xa8] ss:$16 sps:$4 sm:$0xff]   ;;  %11333 = vst [vmem:[#allocation185_spill] sm:$0xff] %v8223_v23 }
 0x1c8   :  { %2736 = vmatpush1.bf16.msra.mxu1 %v8193_v27  ;;  %v2318_v56 = vpop.f32.mrf.mxu0  ;;  %v8199_v24 = vld [vmem:[%s10832_s1 + $0x8a4] ss:$16 sps:$4 sm:$0xff]   ;;  %11330 = vst [vmem:[#allocation182_spill] sm:$0xff] %v8205_v25  ;;  %11332 = vst [vmem:[#allocation184_spill] sm:$0xff] %v8217_v55  ;;  %v8229_v61 = vld [vmem:[%s10832_s1 + $0x8c] ss:$16 sps:$4 sm:$0xff]  }
 0x1c9   :  { %v2359_v31 = vpop.f32.mrf.mxu1  ;;  %11329 = vst [vmem:[#allocation181_spill] sm:$0xff] %v8199_v24  ;;  %2696 = vmatprep.subr.bf16.mxu0 %v8199_v24  ;;  %2737 = vmatprep.subr.bf16.mxu1 %v8205_v25  ;;  %11334 = vst [vmem:[#allocation186_spill] sm:$0xff] %v8229_v61  ;;  %v8235_v56 = vld [vmem:[%s10832_s1 + $0x880] ss:$16 sps:$4 sm:$0xff]  }
 0x1ca   :  { %11335 = vst [vmem:[#allocation187_spill] sm:$0xff] %v8235_v56  ;;  %v8241_v31 = vld [vmem:[%s10832_s1 + $0x88] ss:$16 sps:$4 sm:$0xff]  }
 0x1cb   :  { %2697 = vmatpush1.bf16.msra.mxu0 %v8211_v6  ;;  %11336 = vst [vmem:[#allocation188_spill] sm:$0xff] %v8241_v31  ;;  %v8554_v6 = vld [vmem:[%s10832_s1 + $0x2e8] ss:$16 sps:$4 sm:$0xff]  }
 0x1cc   :  { %2738 = vmatpush1.bf16.msra.mxu1 %v8217_v55  ;;  %2698 = vmatprep.subr.bf16.mxu0 %v8223_v23  ;;  %v8247_v23 = vld [vmem:[%s10832_s1 + $0x864] ss:$16 sps:$4 sm:$0xff]   ;;  %11387 = vst [vmem:[#allocation239_spill] sm:$0xff] %v8554_v6 }
 0x1cd   :  { %2739 = vmatprep.subr.bf16.mxu1 %v8229_v61  ;;  %11337 = vst [vmem:[#allocation189_spill] sm:$0xff] %v8247_v23  ;;  %v8253_v61 = vld [vmem:[%s10832_s1 + $0x6c] ss:$16 sps:$4 sm:$0xff]  }
 0x1ce   :  { %11338 = vst [vmem:[#allocation190_spill] sm:$0xff] %v8253_v61 }
 0x1cf   :  { %2699 = vmatpush1.bf16.msra.mxu0 %v8235_v56  ;;  %v8259_v56 = vld [vmem:[%s10832_s1 + $0x860] ss:$16 sps:$4 sm:$0xff]  }
 0x1d0   :  { %2740 = vmatpush1.bf16.msra.mxu1 %v8241_v31  ;;  %2700 = vmatprep.subr.bf16.mxu0 %v8247_v23  ;;  %11339 = vst [vmem:[#allocation191_spill] sm:$0xff] %v8259_v56  ;;  %v8265_v31 = vld [vmem:[%s10832_s1 + $0x68] ss:$16 sps:$4 sm:$0xff]   ;;  %v8271_v23 = vld [vmem:[%s10832_s1 + $0x844] ss:$16 sps:$4 sm:$0xff]  }
 0x1d1   :  { %2741 = vmatprep.subr.bf16.mxu1 %v8253_v61  ;;  %11340 = vst [vmem:[#allocation192_spill] sm:$0xff] %v8265_v31  ;;  %11341 = vst [vmem:[#allocation193_spill] sm:$0xff] %v8271_v23  ;;  %v8277_v61 = vld [vmem:[%s10832_s1 + $0x4c] ss:$16 sps:$4 sm:$0xff]  }
 0x1d2   :  { %11342 = vst [vmem:[#allocation194_spill] sm:$0xff] %v8277_v61 }
 0x1d3   :  { %2701 = vmatpush1.bf16.msra.mxu0 %v8259_v56  ;;  %v8283_v56 = vld [vmem:[%s10832_s1 + $0x840] ss:$16 sps:$4 sm:$0xff]  }
 0x1d4   :  { %2742 = vmatpush1.bf16.msra.mxu1 %v8265_v31  ;;  %2702 = vmatprep.subr.bf16.mxu0 %v8271_v23  ;;  %11343 = vst [vmem:[#allocation195_spill] sm:$0xff] %v8283_v56  ;;  %v8289_v31 = vld [vmem:[%s10832_s1 + $0x48] ss:$16 sps:$4 sm:$0xff]   ;;  %v8295_v23 = vld [vmem:[%s10832_s1 + $0x824] ss:$16 sps:$4 sm:$0xff]  }
 0x1d5   :  { %2743 = vmatprep.subr.bf16.mxu1 %v8277_v61  ;;  %11344 = vst [vmem:[#allocation196_spill] sm:$0xff] %v8289_v31  ;;  %11345 = vst [vmem:[#allocation197_spill] sm:$0xff] %v8295_v23  ;;  %v8301_v61 = vld [vmem:[%s10832_s1 + $0x2c] ss:$16 sps:$4 sm:$0xff]  }
 0x1d6   :  { %11346 = vst [vmem:[#allocation198_spill] sm:$0xff] %v8301_v61 }
 0x1d7   :  { %2703 = vmatpush1.bf16.msra.mxu0 %v8283_v56  ;;  %v8307_v56 = vld [vmem:[%s10832_s1 + $0x820] ss:$16 sps:$4 sm:$0xff]  }
 0x1d8   :  { %2744 = vmatpush1.bf16.msra.mxu1 %v8289_v31  ;;  %2704 = vmatprep.subr.bf16.mxu0 %v8295_v23  ;;  %11347 = vst [vmem:[#allocation199_spill] sm:$0xff] %v8307_v56  ;;  %v8313_v31 = vld [vmem:[%s10832_s1 + $0x28] ss:$16 sps:$4 sm:$0xff]   ;;  %v8319_v23 = vld [vmem:[%s10832_s1 + $0x804] ss:$16 sps:$4 sm:$0xff]  }
 0x1d9   :  { %2745 = vmatprep.subr.bf16.mxu1 %v8301_v61  ;;  %11348 = vst [vmem:[#allocation200_spill] sm:$0xff] %v8313_v31  ;;  %11349 = vst [vmem:[#allocation201_spill] sm:$0xff] %v8319_v23  ;;  %v8325_v61 = vld [vmem:[%s10832_s1 + $0xc] ss:$16 sps:$4 sm:$0xff]  }
 0x1da   :  { %11350 = vst [vmem:[#allocation202_spill] sm:$0xff] %v8325_v61 }
 0x1db   :  { %2705 = vmatpush1.bf16.msra.mxu0 %v8307_v56  ;;  %v8331_v56 = vld [vmem:[%s10832_s1 + $0x800] ss:$16 sps:$4 sm:$0xff]  }
 0x1dc   :  { %2746 = vmatpush1.bf16.msra.mxu1 %v8313_v31  ;;  %2706 = vmatprep.subr.bf16.mxu0 %v8319_v23  ;;  %11351 = vst [vmem:[#allocation203_spill] sm:$0xff] %v8331_v56  ;;  %v8337_v31 = vld [vmem:[%s10832_s1 + $0x8] ss:$16 sps:$4 sm:$0xff]   ;;  %v8343_v23 = vld [vmem:[%s10832_s1 + $0x9e4] ss:$16 sps:$4 sm:$0xff]  }
 0x1dd   :  { %2747 = vmatprep.subr.bf16.mxu1 %v8325_v61  ;;  %11352 = vst [vmem:[#allocation204_spill] sm:$0xff] %v8337_v31  ;;  %11353 = vst [vmem:[#allocation205_spill] sm:$0xff] %v8343_v23  ;;  %v8349_v61 = vld [vmem:[%s10832_s1 + $0x1ec] ss:$16 sps:$4 sm:$0xff]  }
 0x1de   :  { %11354 = vst [vmem:[#allocation206_spill] sm:$0xff] %v8349_v61 }
 0x1df   :  { %2707 = vmatpush1.bf16.msra.mxu0 %v8331_v56  ;;  %v8355_v56 = vld [vmem:[%s10832_s1 + $0x9e0] ss:$16 sps:$4 sm:$0xff]  }
 0x1e0   :  { %2748 = vmatpush1.bf16.msra.mxu1 %v8337_v31  ;;  %2708 = vmatprep.subr.bf16.mxu0 %v8343_v23  ;;  %11355 = vst [vmem:[#allocation207_spill] sm:$0xff] %v8355_v56  ;;  %v8361_v31 = vld [vmem:[%s10832_s1 + $0x1e8] ss:$16 sps:$4 sm:$0xff]   ;;  %v8367_v23 = vld [vmem:[%s10832_s1 + $0x9c4] ss:$16 sps:$4 sm:$0xff]  }
 0x1e1   :  { %2749 = vmatprep.subr.bf16.mxu1 %v8349_v61  ;;  %11356 = vst [vmem:[#allocation208_spill] sm:$0xff] %v8361_v31  ;;  %11357 = vst [vmem:[#allocation209_spill] sm:$0xff] %v8367_v23  ;;  %v8373_v61 = vld [vmem:[%s10832_s1 + $0x1cc] ss:$16 sps:$4 sm:$0xff]  }
 0x1e2   :  { %11358 = vst [vmem:[#allocation210_spill] sm:$0xff] %v8373_v61 }
 0x1e3   :  { %2709 = vmatpush2.bf16.msra.mxu0 %v8355_v56  ;;  %v8379_v56 = vld [vmem:[%s10832_s1 + $0x9c0] ss:$16 sps:$4 sm:$0xff]  }
 0x1e4   :  { %2750 = vmatpush2.bf16.msra.mxu1 %v8361_v31  ;;  %2710 = vmatprep.subr.bf16.mxu0 %v8367_v23  ;;  %11359 = vst [vmem:[#allocation211_spill] sm:$0xff] %v8379_v56  ;;  %v8385_v31 = vld [vmem:[%s10832_s1 + $0x1c8] ss:$16 sps:$4 sm:$0xff]   ;;  %v8391_v23 = vld [vmem:[%s10832_s1 + $0x9a4] ss:$16 sps:$4 sm:$0xff]  }
 0x1e5   :  { %2751 = vmatprep.subr.bf16.mxu1 %v8373_v61  ;;  %11360 = vst [vmem:[#allocation212_spill] sm:$0xff] %v8385_v31  ;;  %11361 = vst [vmem:[#allocation213_spill] sm:$0xff] %v8391_v23  ;;  %v8397_v61 = vld [vmem:[%s10832_s1 + $0x1ac] ss:$16 sps:$4 sm:$0xff]  }
 0x1e6   :  { %11362 = vst [vmem:[#allocation214_spill] sm:$0xff] %v8397_v61 }
 0x1e7   :  { %2711 = vmatpush2.bf16.msra.mxu0 %v8379_v56  ;;  %v8403_v56 = vld [vmem:[%s10832_s1 + $0x9a0] ss:$16 sps:$4 sm:$0xff]  }
 0x1e8   :  { %2752 = vmatpush2.bf16.msra.mxu1 %v8385_v31  ;;  %2712 = vmatprep.subr.bf16.mxu0 %v8391_v23  ;;  %11363 = vst [vmem:[#allocation215_spill] sm:$0xff] %v8403_v56  ;;  %v8409_v31 = vld [vmem:[%s10832_s1 + $0x1a8] ss:$16 sps:$4 sm:$0xff]   ;;  %v8415_v23 = vld [vmem:[%s10832_s1 + $0x984] ss:$16 sps:$4 sm:$0xff]  }
 0x1e9   :  { %2753 = vmatprep.subr.bf16.mxu1 %v8397_v61  ;;  %11364 = vst [vmem:[#allocation216_spill] sm:$0xff] %v8409_v31  ;;  %11365 = vst [vmem:[#allocation217_spill] sm:$0xff] %v8415_v23  ;;  %v8421_v61 = vld [vmem:[%s10832_s1 + $0x18c] ss:$16 sps:$4 sm:$0xff]  }
 0x1ea   :  { %11366 = vst [vmem:[#allocation218_spill] sm:$0xff] %v8421_v61 }
 0x1eb   :  { %2713 = vmatpush2.bf16.msra.mxu0 %v8403_v56  ;;  %v8427_v56 = vld [vmem:[%s10832_s1 + $0x980] ss:$16 sps:$4 sm:$0xff]  }
 0x1ec   :  { %2754 = vmatpush2.bf16.msra.mxu1 %v8409_v31  ;;  %2714 = vmatprep.subr.bf16.mxu0 %v8415_v23  ;;  %11367 = vst [vmem:[#allocation219_spill] sm:$0xff] %v8427_v56  ;;  %v8433_v31 = vld [vmem:[%s10832_s1 + $0x188] ss:$16 sps:$4 sm:$0xff]   ;;  %v8439_v23 = vld [vmem:[%s10832_s1 + $0x964] ss:$16 sps:$4 sm:$0xff]  }
 0x1ed   :  { %2755 = vmatprep.subr.bf16.mxu1 %v8421_v61  ;;  %11368 = vst [vmem:[#allocation220_spill] sm:$0xff] %v8433_v31  ;;  %11369 = vst [vmem:[#allocation221_spill] sm:$0xff] %v8439_v23  ;;  %v8445_v61 = vld [vmem:[%s10832_s1 + $0x16c] ss:$16 sps:$4 sm:$0xff]  }
 0x1ee   :  { %11370 = vst [vmem:[#allocation222_spill] sm:$0xff] %v8445_v61 }
 0x1ef   :  { %2715 = vmatpush2.bf16.msra.mxu0 %v8427_v56  ;;  %v8451_v56 = vld [vmem:[%s10832_s1 + $0x960] ss:$16 sps:$4 sm:$0xff]  }
 0x1f0   :  { %2756 = vmatpush2.bf16.msra.mxu1 %v8433_v31  ;;  %2716 = vmatprep.subr.bf16.mxu0 %v8439_v23  ;;  %11371 = vst [vmem:[#allocation223_spill] sm:$0xff] %v8451_v56  ;;  %v8457_v31 = vld [vmem:[%s10832_s1 + $0x168] ss:$16 sps:$4 sm:$0xff]   ;;  %v8463_v23 = vld [vmem:[%s10832_s1 + $0x944] ss:$16 sps:$4 sm:$0xff]  }
 0x1f1   :  { %2757 = vmatprep.subr.bf16.mxu1 %v8445_v61  ;;  %11372 = vst [vmem:[#allocation224_spill] sm:$0xff] %v8457_v31  ;;  %11373 = vst [vmem:[#allocation225_spill] sm:$0xff] %v8463_v23  ;;  %v8469_v61 = vld [vmem:[%s10832_s1 + $0x14c] ss:$16 sps:$4 sm:$0xff]  }
 0x1f2   :  { %11374 = vst [vmem:[#allocation226_spill] sm:$0xff] %v8469_v61 }
 0x1f3   :  { %2717 = vmatpush2.bf16.msra.mxu0 %v8451_v56  ;;  %v8475_v56 = vld [vmem:[%s10832_s1 + $0x940] ss:$16 sps:$4 sm:$0xff]  }
 0x1f4   :  { %2758 = vmatpush2.bf16.msra.mxu1 %v8457_v31  ;;  %2718 = vmatprep.subr.bf16.mxu0 %v8463_v23  ;;  %11375 = vst [vmem:[#allocation227_spill] sm:$0xff] %v8475_v56  ;;  %v8481_v31 = vld [vmem:[%s10832_s1 + $0x148] ss:$16 sps:$4 sm:$0xff]   ;;  %v8487_v23 = vld [vmem:[%s10832_s1 + $0x924] ss:$16 sps:$4 sm:$0xff]  }
 0x1f5   :  { %2759 = vmatprep.subr.bf16.mxu1 %v8469_v61  ;;  %11376 = vst [vmem:[#allocation228_spill] sm:$0xff] %v8481_v31  ;;  %11377 = vst [vmem:[#allocation229_spill] sm:$0xff] %v8487_v23  ;;  %v8493_v61 = vld [vmem:[%s10832_s1 + $0x12c] ss:$16 sps:$4 sm:$0xff]  }
 0x1f6   :  { %11378 = vst [vmem:[#allocation230_spill] sm:$0xff] %v8493_v61 }
 0x1f7   :  { %2719 = vmatpush2.bf16.msra.mxu0 %v8475_v56  ;;  %v8499_v56 = vld [vmem:[%s10832_s1 + $0x920] ss:$16 sps:$4 sm:$0xff]  }
 0x1f8   :  { %2760 = vmatpush2.bf16.msra.mxu1 %v8481_v31  ;;  %2720 = vmatprep.subr.bf16.mxu0 %v8487_v23  ;;  %11379 = vst [vmem:[#allocation231_spill] sm:$0xff] %v8499_v56  ;;  %v8505_v31 = vld [vmem:[%s10832_s1 + $0x128] ss:$16 sps:$4 sm:$0xff]   ;;  %v8511_v23 = vld [vmem:[%s10832_s1 + $0x904] ss:$16 sps:$4 sm:$0xff]  }
 0x1f9   :  { %2761 = vmatprep.subr.bf16.mxu1 %v8493_v61  ;;  %11380 = vst [vmem:[#allocation232_spill] sm:$0xff] %v8505_v31  ;;  %11381 = vst [vmem:[#allocation233_spill] sm:$0xff] %v8511_v23  ;;  %v8517_v61 = vld [vmem:[%s10832_s1 + $0x10c] ss:$16 sps:$4 sm:$0xff]  }
 0x1fa   :  { %11382 = vst [vmem:[#allocation234_spill] sm:$0xff] %v8517_v61 }
 0x1fb   :  { %2721 = vmatpush2.bf16.msra.mxu0 %v8499_v56  ;;  %v8522_v56 = vrot.slane %v8091_v29, %v6144_v49  ;;  %v8545_v29 = vld [vmem:[%s10832_s1 + $0x4ec] ss:$16 sps:$4 sm:$0xff]  }
 0x1fc   :  { %2762 = vmatpush2.bf16.msra.mxu1 %v8505_v31  ;;  %2722 = vmatprep.subr.bf16.mxu0 %v8511_v23  ;;  %v8527_v31 = vld [vmem:[%s10832_s1 + $0x900] ss:$16 sps:$4 sm:$0xff]   ;;  %v8533_v23 = vld [vmem:[%s10832_s1 + $0x108] ss:$16 sps:$4 sm:$0xff]   ;;  %11386 = vst [vmem:[#allocation238_spill] sm:$0xff] %v8545_v29 }
 0x1fd   :  { %2763 = vmatprep.subr.bf16.mxu1 %v8517_v61  ;;  %11383 = vst [vmem:[#allocation235_spill] sm:$0xff] %v8527_v31  ;;  %11384 = vst [vmem:[#allocation236_spill] sm:$0xff] %v8533_v23  ;;  %v8539_v61 = vld [vmem:[%s10832_s1 + $0x2ec] ss:$16 sps:$4 sm:$0xff]  }
 0x1fe   :  { %11385 = vst [vmem:[#allocation237_spill] sm:$0xff] %v8539_v61 }
 0x1ff   :  { %2723 = vmatpush2.bf16.msra.mxu0 %v8527_v31 }
 0x200   :  { %2764 = vmatpush2.bf16.msra.mxu1 %v8533_v23  ;;  %2774 = vmatprep.subr.bf16.mxu0 %v8539_v61  ;;  %v8560_v61 = vld [vmem:[%s10832_s1 + $0x4e8] ss:$16 sps:$4 sm:$0xff]  }
 0x201   :  { %2815 = vmatprep.subr.bf16.mxu1 %v8545_v29  ;;  %11388 = vst [vmem:[#allocation240_spill] sm:$0xff] %v8560_v61 }
 0x202   :  { %v2395_v31 = vpop.f32.mrf.mxu0  ;;  %2725 = vmatmul.mubr.bf16.vlgmr.msra.gmra.mxu0 %v8522_v56 }
 0x203   :  { %v2436_v55 = vpop.f32.mrf.mxu1  ;;  %2766 = vmatmul.mubr.bf16.vlgmr.msra.gmra.mxu1 %v7673_v62  ;;  %v2396_v23 = vadd.f32 %v2395_v31, %v8177_v43  ;;  %2775 = vmatpush1.bf16.msra.mxu0 %v8554_v6  ;;  %v8566_v62 = vld [vmem:[%s10832_s1 + $0x2cc] ss:$16 sps:$4 sm:$0xff]  }
 0x204   :  { %2816 = vmatpush1.bf16.msra.mxu1 %v8560_v61  ;;  %v2397_v29 = vpop.f32.mrf.mxu0  ;;  %11389 = vst [vmem:[#allocation241_spill] sm:$0xff] %v8566_v62  ;;  %2776 = vmatprep.subr.bf16.mxu0 %v8566_v62  ;;  %v8572_v43 = vld [vmem:[%s10832_s1 + $0x4cc] ss:$16 sps:$4 sm:$0xff]   ;;  %v8585_v62 = vld [vmem:[%s10832_s1 + $0x2c8] ss:$16 sps:$4 sm:$0xff]  }
 0x205   :  { %v2438_v25 = vpop.f32.mrf.mxu1  ;;  %2817 = vmatprep.subr.bf16.mxu1 %v8572_v43  ;;  %v8575_v31 = vadd.f32 %v2436_v55, %v2396_v23  ;;  %v2398_v61 = vadd.f32 %v2397_v29, %v8182_v22  ;;  %2806 = vmatprep.mubr.bf16.mxu0 %v7316_v17  ;;  %v8591_v55 = vld [vmem:[%s10832_s1 + $0x4c8] ss:$16 sps:$4 sm:$0xff]   ;;  %v8621_v23 = vld [vmem:[%s10832_s1 + $0x28c] ss:$16 sps:$4 sm:$0xff]  }
 0x206   :  { %2847 = vmatprep.mubr.bf16.mxu1 %v7700_v4  ;;  %v2399_v6 = vpop.f32.mrf.mxu0  ;;  %v8597_v4 = vld [vmem:[%s10832_s1 + $0x2ac] ss:$16 sps:$4 sm:$0xff]   ;;  %v8633_v29 = vld [vmem:[%s10832_s1 + $0x288] ss:$16 sps:$4 sm:$0xff]  }
 0x207   :  { %v2440_v24 = vpop.f32.mrf.mxu1  ;;  %v8580_v27 = vadd.f32 %v2438_v25, %v2398_v61  ;;  %2777 = vmatpush1.bf16.msra.mxu0 %v8585_v62  ;;  %v8609_v25 = vld [vmem:[%s10832_s1 + $0x2a8] ss:$16 sps:$4 sm:$0xff]   ;;  %v8627_v61 = vld [vmem:[%s10832_s1 + $0x48c] ss:$16 sps:$4 sm:$0xff]   ;;  %11391 = vst [vmem:[#allocation243_spill] sm:$0xff] %v8633_v29 }
 0x208   :  { %2818 = vmatpush1.bf16.msra.mxu1 %v8591_v55  ;;  %v2400_v22 = vpop.f32.mrf.mxu0  ;;  %2778 = vmatprep.subr.bf16.mxu0 %v8597_v4  ;;  %v8603_v24 = vld [vmem:[%s10832_s1 + $0x4ac] ss:$16 sps:$4 sm:$0xff]   ;;  %v8615_v6 = vld [vmem:[%s10832_s1 + $0x4a8] ss:$16 sps:$4 sm:$0xff]   ;;  %11390 = vst [vmem:[#allocation242_spill] sm:$0xff] %v8627_v61 }
 0x209   :  { %v2441_v17 = vpop.f32.mrf.mxu1  ;;  %2819 = vmatprep.subr.bf16.mxu1 %v8603_v24  ;;  %v8639_v22 = vld [vmem:[%s10832_s1 + $0x488] ss:$16 sps:$4 sm:$0xff]  }
 0x20a   :  { %11392 = vst [vmem:[#allocation244_spill] sm:$0xff] %v8639_v22  ;;  %v8645_v17 = vld [vmem:[%s10832_s1 + $0x26c] ss:$16 sps:$4 sm:$0xff]  }
 0x20b   :  { %2779 = vmatpush1.bf16.msra.mxu0 %v8609_v25  ;;  %11393 = vst [vmem:[#allocation245_spill] sm:$0xff] %v8645_v17 }
 0x20c   :  { %2820 = vmatpush1.bf16.msra.mxu1 %v8615_v6  ;;  %2780 = vmatprep.subr.bf16.mxu0 %v8621_v23 }
 0x20d   :  { %2821 = vmatprep.subr.bf16.mxu1 %v8627_v61  ;;  %v8651_v61 = vld [vmem:[%s10832_s1 + $0x46c] ss:$16 sps:$4 sm:$0xff]  }
 0x20e   :  { %11394 = vst [vmem:[#allocation246_spill] sm:$0xff] %v8651_v61 }
 0x20f   :  { %2781 = vmatpush1.bf16.msra.mxu0 %v8633_v29  ;;  %v8657_v29 = vld [vmem:[%s10832_s1 + $0x268] ss:$16 sps:$4 sm:$0xff]  }
 0x210   :  { %2822 = vmatpush1.bf16.msra.mxu1 %v8639_v22  ;;  %2782 = vmatprep.subr.bf16.mxu0 %v8645_v17  ;;  %11395 = vst [vmem:[#allocation247_spill] sm:$0xff] %v8657_v29  ;;  %v8663_v22 = vld [vmem:[%s10832_s1 + $0x468] ss:$16 sps:$4 sm:$0xff]   ;;  %v8669_v17 = vld [vmem:[%s10832_s1 + $0x24c] ss:$16 sps:$4 sm:$0xff]  }
 0x211   :  { %2823 = vmatprep.subr.bf16.mxu1 %v8651_v61  ;;  %11396 = vst [vmem:[#allocation248_spill] sm:$0xff] %v8663_v22  ;;  %11397 = vst [vmem:[#allocation249_spill] sm:$0xff] %v8669_v17  ;;  %v8675_v61 = vld [vmem:[%s10832_s1 + $0x44c] ss:$16 sps:$4 sm:$0xff]  }
 0x212   :  { %11398 = vst [vmem:[#allocation250_spill] sm:$0xff] %v8675_v61 }
 0x213   :  { %2783 = vmatpush1.bf16.msra.mxu0 %v8657_v29  ;;  %v8681_v29 = vld [vmem:[%s10832_s1 + $0x248] ss:$16 sps:$4 sm:$0xff]  }
 0x214   :  { %2824 = vmatpush1.bf16.msra.mxu1 %v8663_v22  ;;  %2784 = vmatprep.subr.bf16.mxu0 %v8669_v17  ;;  %11399 = vst [vmem:[#allocation251_spill] sm:$0xff] %v8681_v29  ;;  %v8687_v22 = vld [vmem:[%s10832_s1 + $0x448] ss:$16 sps:$4 sm:$0xff]   ;;  %v8693_v17 = vld [vmem:[%s10832_s1 + $0x22c] ss:$16 sps:$4 sm:$0xff]  }
 0x215   :  { %2825 = vmatprep.subr.bf16.mxu1 %v8675_v61  ;;  %11400 = vst [vmem:[#allocation252_spill] sm:$0xff] %v8687_v22  ;;  %11401 = vst [vmem:[#allocation253_spill] sm:$0xff] %v8693_v17  ;;  %v8699_v61 = vld [vmem:[%s10832_s1 + $0x42c] ss:$16 sps:$4 sm:$0xff]  }
 0x216   :  { %11402 = vst [vmem:[#allocation254_spill] sm:$0xff] %v8699_v61 }
 0x217   :  { %2785 = vmatpush1.bf16.msra.mxu0 %v8681_v29  ;;  %v8705_v29 = vld [vmem:[%s10832_s1 + $0x228] ss:$16 sps:$4 sm:$0xff]  }
 0x218   :  { %2826 = vmatpush1.bf16.msra.mxu1 %v8687_v22  ;;  %2786 = vmatprep.subr.bf16.mxu0 %v8693_v17  ;;  %11403 = vst [vmem:[#allocation255_spill] sm:$0xff] %v8705_v29  ;;  %v8711_v22 = vld [vmem:[%s10832_s1 + $0x428] ss:$16 sps:$4 sm:$0xff]   ;;  %v8717_v17 = vld [vmem:[%s10832_s1 + $0x20c] ss:$16 sps:$4 sm:$0xff]  }
 0x219   :  { %2827 = vmatprep.subr.bf16.mxu1 %v8699_v61  ;;  %11404 = vst [vmem:[#allocation256_spill] sm:$0xff] %v8711_v22  ;;  %11405 = vst [vmem:[#allocation257_spill] sm:$0xff] %v8717_v17  ;;  %v8723_v61 = vld [vmem:[%s10832_s1 + $0x40c] ss:$16 sps:$4 sm:$0xff]  }
 0x21a   :  { %11406 = vst [vmem:[#allocation258_spill] sm:$0xff] %v8723_v61 }
 0x21b   :  { %2787 = vmatpush1.bf16.msra.mxu0 %v8705_v29  ;;  %v8729_v29 = vld [vmem:[%s10832_s1 + $0x208] ss:$16 sps:$4 sm:$0xff]  }
 0x21c   :  { %2828 = vmatpush1.bf16.msra.mxu1 %v8711_v22  ;;  %2788 = vmatprep.subr.bf16.mxu0 %v8717_v17  ;;  %11407 = vst [vmem:[#allocation259_spill] sm:$0xff] %v8729_v29  ;;  %v8735_v22 = vld [vmem:[%s10832_s1 + $0x408] ss:$16 sps:$4 sm:$0xff]   ;;  %v8741_v17 = vld [vmem:[%s10832_s1 + $0x3ec] ss:$16 sps:$4 sm:$0xff]  }
 0x21d   :  { %2829 = vmatprep.subr.bf16.mxu1 %v8723_v61  ;;  %11408 = vst [vmem:[#allocation260_spill] sm:$0xff] %v8735_v22  ;;  %11409 = vst [vmem:[#allocation261_spill] sm:$0xff] %v8741_v17  ;;  %v8747_v61 = vld [vmem:[%s10832_s1 + $0x5ec] ss:$16 sps:$4 sm:$0xff]  }
 0x21e   :  { %11410 = vst [vmem:[#allocation262_spill] sm:$0xff] %v8747_v61 }
 0x21f   :  { %2789 = vmatpush1.bf16.msra.mxu0 %v8729_v29  ;;  %v8753_v29 = vld [vmem:[%s10832_s1 + $0x3e8] ss:$16 sps:$4 sm:$0xff]  }
 0x220   :  { %2830 = vmatpush1.bf16.msra.mxu1 %v8735_v22  ;;  %2790 = vmatprep.subr.bf16.mxu0 %v8741_v17  ;;  %11411 = vst [vmem:[#allocation263_spill] sm:$0xff] %v8753_v29  ;;  %v8759_v22 = vld [vmem:[%s10832_s1 + $0x5e8] ss:$16 sps:$4 sm:$0xff]   ;;  %v8765_v17 = vld [vmem:[%s10832_s1 + $0x3cc] ss:$16 sps:$4 sm:$0xff]  }
 0x221   :  { %2831 = vmatprep.subr.bf16.mxu1 %v8747_v61  ;;  %11412 = vst [vmem:[#allocation264_spill] sm:$0xff] %v8759_v22  ;;  %11413 = vst [vmem:[#allocation265_spill] sm:$0xff] %v8765_v17  ;;  %v8771_v61 = vld [vmem:[%s10832_s1 + $0x5cc] ss:$16 sps:$4 sm:$0xff]  }
 0x222   :  { %11414 = vst [vmem:[#allocation266_spill] sm:$0xff] %v8771_v61 }
 0x223   :  { %2791 = vmatpush2.bf16.msra.mxu0 %v8753_v29  ;;  %v8777_v29 = vld [vmem:[%s10832_s1 + $0x3c8] ss:$16 sps:$4 sm:$0xff]  }
 0x224   :  { %2832 = vmatpush2.bf16.msra.mxu1 %v8759_v22  ;;  %2792 = vmatprep.subr.bf16.mxu0 %v8765_v17  ;;  %11415 = vst [vmem:[#allocation267_spill] sm:$0xff] %v8777_v29  ;;  %v8783_v22 = vld [vmem:[%s10832_s1 + $0x5c8] ss:$16 sps:$4 sm:$0xff]   ;;  %v8789_v17 = vld [vmem:[%s10832_s1 + $0x3ac] ss:$16 sps:$4 sm:$0xff]  }
 0x225   :  { %2833 = vmatprep.subr.bf16.mxu1 %v8771_v61  ;;  %11416 = vst [vmem:[#allocation268_spill] sm:$0xff] %v8783_v22  ;;  %11417 = vst [vmem:[#allocation269_spill] sm:$0xff] %v8789_v17  ;;  %v8795_v61 = vld [vmem:[%s10832_s1 + $0x5ac] ss:$16 sps:$4 sm:$0xff]  }
 0x226   :  { %11418 = vst [vmem:[#allocation270_spill] sm:$0xff] %v8795_v61 }
 0x227   :  { %2793 = vmatpush2.bf16.msra.mxu0 %v8777_v29  ;;  %v8801_v29 = vld [vmem:[%s10832_s1 + $0x3a8] ss:$16 sps:$4 sm:$0xff]  }
 0x228   :  { %2834 = vmatpush2.bf16.msra.mxu1 %v8783_v22  ;;  %2794 = vmatprep.subr.bf16.mxu0 %v8789_v17  ;;  %11419 = vst [vmem:[#allocation271_spill] sm:$0xff] %v8801_v29  ;;  %v8807_v22 = vld [vmem:[%s10832_s1 + $0x5a8] ss:$16 sps:$4 sm:$0xff]   ;;  %v8813_v17 = vld [vmem:[%s10832_s1 + $0x38c] ss:$16 sps:$4 sm:$0xff]  }
 0x229   :  { %2835 = vmatprep.subr.bf16.mxu1 %v8795_v61  ;;  %11420 = vst [vmem:[#allocation272_spill] sm:$0xff] %v8807_v22  ;;  %v8819_v61 = vld [vmem:[%s10832_s1 + $0x58c] ss:$16 sps:$4 sm:$0xff]  }
 0x22b   :  { %2795 = vmatpush2.bf16.msra.mxu0 %v8801_v29  ;;  %v8825_v29 = vld [vmem:[%s10832_s1 + $0x388] ss:$16 sps:$4 sm:$0xff]  }
 0x22c   :  { %2836 = vmatpush2.bf16.msra.mxu1 %v8807_v22  ;;  %2796 = vmatprep.subr.bf16.mxu0 %v8813_v17  ;;  %v8831_v22 = vld [vmem:[%s10832_s1 + $0x588] ss:$16 sps:$4 sm:$0xff]  }
 0x22d   :  { %2837 = vmatprep.subr.bf16.mxu1 %v8819_v61 }
 0x22f   :  { %2797 = vmatpush2.bf16.msra.mxu0 %v8825_v29 }
 0x230   :  { %2838 = vmatpush2.bf16.msra.mxu1 %v8831_v22  ;;  %2798 = vmatprep.subr.bf16.mxu0 %v6803_v32 }
 0x231   :  { %2839 = vmatprep.subr.bf16.mxu1 %v6808_v34 }
 0x233   :  { %2799 = vmatpush2.bf16.msra.mxu0 %v6813_v35 }
 0x234   :  { %2840 = vmatpush2.bf16.msra.mxu1 %v6818_v36  ;;  %2800 = vmatprep.subr.bf16.mxu0 %v6825_v38 }
 0x235   :  { %2841 = vmatprep.subr.bf16.mxu1 %v6830_v39 }
 0x237   :  { %2801 = vmatpush2.bf16.msra.mxu0 %v6837_v40 }
 0x238   :  { %2842 = vmatpush2.bf16.msra.mxu1 %v6842_v41  ;;  %2802 = vmatprep.subr.bf16.mxu0 %v6849_v42 }
 0x239   :  { %2843 = vmatprep.subr.bf16.mxu1 %v6854_v44 }
 0x23b   :  { %2803 = vmatpush2.bf16.msra.mxu0 %v6861_v45  ;;  %v11421_v45 = vld [vmem:[#allocation6_spill] sm:$0xff] }
 0x23c   :  { %2844 = vmatpush2.bf16.msra.mxu1 %v6866_v46  ;;  %2804 = vmatprep.subr.bf16.mxu0 %v6873_v47  ;;  %v11422_v46 = vld [vmem:[#allocation7_spill] sm:$0xff]  ;;  %v11423_v47 = vld [vmem:[#allocation8_spill] sm:$0xff] }
 0x23d   :  { %2845 = vmatprep.subr.bf16.mxu1 %v6878_v33  ;;  %v11424_v33 = vld [vmem:[#allocation9_spill] sm:$0xff] }
 0x23f   :  { %2805 = vmatpush2.bf16.msra.mxu0 %v6885_v48  ;;  %v11425_v48 = vld [vmem:[#allocation10_spill] sm:$0xff] }
 0x240   :  { %2846 = vmatpush2.bf16.msra.mxu1 %v6890_v50  ;;  %2856 = vmatprep.subr.bf16.mxu0 %v6897_v51  ;;  %v11426_v50 = vld [vmem:[#allocation11_spill] sm:$0xff]  ;;  %v11427_v51 = vld [vmem:[#allocation12_spill] sm:$0xff] }
 0x241   :  { %2897 = vmatprep.subr.bf16.mxu1 %v6902_v13  ;;  %v11428_v13 = vld [vmem:[#allocation13_spill] sm:$0xff] }
 0x242   :  { %v2562_v32 = vpop.f32.mrf.mxu0  ;;  %2807 = vmatmul.mubr.bf16.vlgmr.msra.gmra.mxu0 %v7704_v59  ;;  %v11452_v59 = vld [vmem:[#allocation37_spill] sm:$0xff] }
 0x243   :  { %v2603_v34 = vpop.f32.mrf.mxu1  ;;  %2848 = vmatmul.mubr.bf16.vlgmr.msra.gmra.mxu1 %v8086_v30  ;;  %2857 = vmatpush1.bf16.msra.mxu0 %v6909_v52  ;;  %v11429_v52 = vld [vmem:[#allocation14_spill] sm:$0xff] }
 0x244   :  { %v8854_v35 = vadd.f32 %v2603_v34, %v2562_v32  ;;  %2898 = vmatpush1.bf16.msra.mxu1 %v6914_v53  ;;  %v2564_v36 = vpop.f32.mrf.mxu0  ;;  %2858 = vmatprep.subr.bf16.mxu0 %v6921_v54  ;;  %v11430_v53 = vld [vmem:[#allocation15_spill] sm:$0xff]  ;;  %v11431_v54 = vld [vmem:[#allocation16_spill] sm:$0xff]  ;;  %v11453_v30 = vld [vmem:[#allocation38_spill] sm:$0xff] }
 0x245   :  { %v2605_v38 = vpop.f32.mrf.mxu1  ;;  %2899 = vmatprep.subr.bf16.mxu1 %v6926_v0  ;;  %2888 = vmatprep.mubr.bf16.mxu0 %v7732_v18  ;;  %v11432_v0 = vld [vmem:[#allocation17_spill] sm:$0xff]  ;;  %v11451_v18 = vld [vmem:[#allocation36_spill] sm:$0xff]  ;;  %v11454_v32 = vld [vmem:[#allocation39_spill] sm:$0xff] }
 0x246   :  { %v8860_v39 = vadd.f32 %v2605_v38, %v2564_v36  ;;  %2929 = vmatprep.mubr.bf16.mxu1 %v8148_v1  ;;  %v2566_v40 = vpop.f32.mrf.mxu0  ;;  %v11455_v34 = vld [vmem:[#allocation40_spill] sm:$0xff]  ;;  %v11456_v36 = vld [vmem:[#allocation41_spill] sm:$0xff] }
 0x247   :  { %v2607_v41 = vpop.f32.mrf.mxu1  ;;  %2859 = vmatpush1.bf16.msra.mxu0 %v6937_v57  ;;  %v11433_v57 = vld [vmem:[#allocation18_spill] sm:$0xff] }
 0x248   :  { %2900 = vmatpush1.bf16.msra.mxu1 %v6942_v58  ;;  %v2567_v42 = vpop.f32.mrf.mxu0  ;;  %2860 = vmatprep.subr.bf16.mxu0 %v6949_v26  ;;  %v11434_v58 = vld [vmem:[#allocation19_spill] sm:$0xff]  ;;  %v11435_v26 = vld [vmem:[#allocation20_spill] sm:$0xff]  ;;  %v11457_v40 = vld [vmem:[#allocation42_spill] sm:$0xff] }
 0x249   :  { %v2608_v44 = vpop.f32.mrf.mxu1  ;;  %2901 = vmatprep.subr.bf16.mxu1 %v6954_v60  ;;  %v11436_v60 = vld [vmem:[#allocation21_spill] sm:$0xff]  ;;  %v11458_v41 = vld [vmem:[#allocation43_spill] sm:$0xff]  ;;  %v11459_v42 = vld [vmem:[#allocation44_spill] sm:$0xff] }
 0x24a   :  { %v11460_v44 = vld [vmem:[#allocation45_spill] sm:$0xff] }
 0x24b   :  { %2861 = vmatpush1.bf16.msra.mxu0 %v6965_v2  ;;  %v11437_v2 = vld [vmem:[#allocation22_spill] sm:$0xff] }
 0x24c   :  { %2902 = vmatpush1.bf16.msra.mxu1 %v6970_v3  ;;  %2862 = vmatprep.subr.bf16.mxu0 %v6977_v37  ;;  %v11438_v3 = vld [vmem:[#allocation23_spill] sm:$0xff]  ;;  %v11439_v37 = vld [vmem:[#allocation24_spill] sm:$0xff] }
 0x24d   :  { %2903 = vmatprep.subr.bf16.mxu1 %v6982_v5  ;;  %v11440_v5 = vld [vmem:[#allocation25_spill] sm:$0xff] }
 0x24f   :  { %2863 = vmatpush1.bf16.msra.mxu0 %v6989_v7  ;;  %v11441_v7 = vld [vmem:[#allocation26_spill] sm:$0xff] }
 0x250   :  { %2904 = vmatpush1.bf16.msra.mxu1 %v6994_v8  ;;  %2864 = vmatprep.subr.bf16.mxu0 %v7001_v9  ;;  %v11442_v8 = vld [vmem:[#allocation27_spill] sm:$0xff]  ;;  %v11443_v9 = vld [vmem:[#allocation28_spill] sm:$0xff] }
 0x251   :  { %2905 = vmatprep.subr.bf16.mxu1 %v7006_v10  ;;  %v11444_v10 = vld [vmem:[#allocation29_spill] sm:$0xff] }
 0x253   :  { %2865 = vmatpush1.bf16.msra.mxu0 %v7013_v11  ;;  %v8911_v11 = vld [vmem:[%s10831_s0 + $0x14] sm:$0xff] }
 0x254   :  { %2906 = vmatpush1.bf16.msra.mxu1 %v7018_v12  ;;  %2866 = vmatprep.subr.bf16.mxu0 %v7025_v14  ;;  %v11445_v12 = vld [vmem:[#allocation30_spill] sm:$0xff]  ;;  %v11446_v14 = vld [vmem:[#allocation31_spill] sm:$0xff] }
 0x255   :  { %2907 = vmatprep.subr.bf16.mxu1 %v7030_v15  ;;  %v11447_v15 = vld [vmem:[#allocation32_spill] sm:$0xff] }
 0x257   :  { %2867 = vmatpush1.bf16.msra.mxu0 %v7037_v16  ;;  %v11448_v16 = vld [vmem:[#allocation33_spill] sm:$0xff] }
 0x258   :  { %2908 = vmatpush1.bf16.msra.mxu1 %v7042_v19  ;;  %2868 = vmatprep.subr.bf16.mxu0 %v7049_v20  ;;  %v8919_v19 = vrot.slane %v8911_v11, %v6144_v49  ;;  %v11449_v20 = vld [vmem:[#allocation34_spill] sm:$0xff] }
 0x259   :  { %2909 = vmatprep.subr.bf16.mxu1 %v7054_v21  ;;  %v11450_v21 = vld [vmem:[#allocation35_spill] sm:$0xff] }
 0x25a   :  { %v2961_v1 = vcombine.high %v8919_v19, %v8919_v19 }
 0x25b   :  { %2869 = vmatpush1.bf16.msra.mxu0 %v11421_v45 }
 0x25c   :  { %2910 = vmatpush1.bf16.msra.mxu1 %v11422_v46  ;;  %2870 = vmatprep.subr.bf16.mxu0 %v11423_v47  ;;  %v8932_v38 = vrot.slane %v2961_v1, %v6144_v49  ;;  %v11483_v1 = vld [vmem:[#allocation67_spill] sm:$0xff] }
 0x25d   :  { %2911 = vmatprep.subr.bf16.mxu1 %v11424_v33  ;;  %v11461_v33 = vld [vmem:[#allocation172_spill] sm:$0xff] }
 0x25e   :  { %v8940_v45 = vcombine.high %v8932_v38, %v8932_v38 }
 0x25f   :  { %2871 = vmatpush1.bf16.msra.mxu0 %v11425_v48 }
 0x260   :  { %2912 = vmatpush1.bf16.msra.mxu1 %v11426_v50  ;;  %2872 = vmatprep.subr.bf16.mxu0 %v11427_v51  ;;  %v11462_v50 = vld [vmem:[#allocation46_spill] sm:$0xff]  ;;  %v11463_v51 = vld [vmem:[#allocation47_spill] sm:$0xff] }
 0x261   :  { %2913 = vmatprep.subr.bf16.mxu1 %v11428_v13 }
 0x263   :  { %2873 = vmatpush2.bf16.msra.mxu0 %v11429_v52 }
 0x264   :  { %2914 = vmatpush2.bf16.msra.mxu1 %v11430_v53  ;;  %2874 = vmatprep.subr.bf16.mxu0 %v11431_v54  ;;  %v11464_v53 = vld [vmem:[#allocation48_spill] sm:$0xff]  ;;  %v11465_v54 = vld [vmem:[#allocation49_spill] sm:$0xff] }
 0x265   :  { %2915 = vmatprep.subr.bf16.mxu1 %v11432_v0 }
 0x267   :  { %2875 = vmatpush2.bf16.msra.mxu0 %v11433_v57 }
 0x268   :  { %2916 = vmatpush2.bf16.msra.mxu1 %v11434_v58  ;;  %2876 = vmatprep.subr.bf16.mxu0 %v11435_v26  ;;  %v11466_v26 = vld [vmem:[#allocation50_spill] sm:$0xff] }
 0x269   :  { %2917 = vmatprep.subr.bf16.mxu1 %v11436_v60  ;;  %v11467_v60 = vld [vmem:[#allocation51_spill] sm:$0xff] }
 0x26b   :  { %2877 = vmatpush2.bf16.msra.mxu0 %v11437_v2 }
 0x26c   :  { %2918 = vmatpush2.bf16.msra.mxu1 %v11438_v3  ;;  %2878 = vmatprep.subr.bf16.mxu0 %v11439_v37  ;;  %v11468_v37 = vld [vmem:[#allocation52_spill] sm:$0xff] }
 0x26d   :  { %2919 = vmatprep.subr.bf16.mxu1 %v11440_v5  ;;  %v11469_v5 = vld [vmem:[#allocation53_spill] sm:$0xff] }
 0x26f   :  { %2879 = vmatpush2.bf16.msra.mxu0 %v11441_v7  ;;  %v11470_v7 = vld [vmem:[#allocation54_spill] sm:$0xff] }
 0x270   :  { %2920 = vmatpush2.bf16.msra.mxu1 %v11442_v8  ;;  %2880 = vmatprep.subr.bf16.mxu0 %v11443_v9  ;;  %v11472_v8 = vld [vmem:[#allocation56_spill] sm:$0xff]  ;;  %v11473_v9 = vld [vmem:[#allocation57_spill] sm:$0xff] }
 0x271   :  { %2921 = vmatprep.subr.bf16.mxu1 %v11444_v10  ;;  %v11474_v10 = vld [vmem:[#allocation58_spill] sm:$0xff] }
 0x273   :  { %2881 = vmatpush2.bf16.msra.mxu0 %v11445_v12  ;;  %v11475_v12 = vld [vmem:[#allocation59_spill] sm:$0xff] }
 0x274   :  { %2922 = vmatpush2.bf16.msra.mxu1 %v11446_v14  ;;  %2882 = vmatprep.subr.bf16.mxu0 %v11447_v15  ;;  %v11476_v14 = vld [vmem:[#allocation60_spill] sm:$0xff]  ;;  %v11477_v15 = vld [vmem:[#allocation61_spill] sm:$0xff] }
 0x275   :  { %2923 = vmatprep.subr.bf16.mxu1 %v11448_v16  ;;  %v11478_v16 = vld [vmem:[#allocation62_spill] sm:$0xff] }
 0x277   :  { %2883 = vmatpush2.bf16.msra.mxu0 %v11449_v20  ;;  %v11479_v20 = vld [vmem:[#allocation63_spill] sm:$0xff] }
 0x278   :  { %2924 = vmatpush2.bf16.msra.mxu1 %v11450_v21  ;;  %2884 = vmatprep.subr.bf16.mxu0 %v11451_v18  ;;  %v11480_v21 = vld [vmem:[#allocation64_spill] sm:$0xff]  ;;  %v11481_v18 = vld [vmem:[#allocation65_spill] sm:$0xff] }
 0x279   :  { %2925 = vmatprep.subr.bf16.mxu1 %v11452_v59  ;;  %v11482_v59 = vld [vmem:[#allocation66_spill] sm:$0xff] }
 0x27b   :  { %2885 = vmatpush2.bf16.msra.mxu0 %v11453_v30  ;;  %v11484_v30 = vld [vmem:[#allocation68_spill] sm:$0xff] }
 0x27c   :  { %2926 = vmatpush2.bf16.msra.mxu1 %v11454_v32  ;;  %2886 = vmatprep.subr.bf16.mxu0 %v11455_v34  ;;  %v11485_v32 = vld [vmem:[#allocation69_spill] sm:$0xff]  ;;  %v11486_v34 = vld [vmem:[#allocation70_spill] sm:$0xff] }
 0x27d   :  { %2927 = vmatprep.subr.bf16.mxu1 %v11456_v36  ;;  %v11487_v36 = vld [vmem:[#allocation71_spill] sm:$0xff] }
 0x27f   :  { %2887 = vmatpush2.bf16.msra.mxu0 %v11457_v40  ;;  %v11488_v40 = vld [vmem:[#allocation72_spill] sm:$0xff] }
 0x280   :  { %2928 = vmatpush2.bf16.msra.mxu1 %v11458_v41  ;;  %3027 = vmatprep.subr.bf16.mxu0 %v11459_v42  ;;  %v11489_v41 = vld [vmem:[#allocation73_spill] sm:$0xff]  ;;  %v11490_v42 = vld [vmem:[#allocation74_spill] sm:$0xff] }
 0x281   :  { %3068 = vmatprep.subr.bf16.mxu1 %v11460_v44  ;;  %v11491_v44 = vld [vmem:[#allocation75_spill] sm:$0xff] }
 0x282   :  { %v2644_v46 = vpop.f32.mrf.mxu0  ;;  %2889 = vmatmul.mubr.bf16.vlgmr.msra.gmra.mxu0 %v11461_v33  ;;  %v11494_v33 = vld [vmem:[#allocation78_spill] sm:$0xff] }
 0x283   :  { %v2685_v47 = vpop.f32.mrf.mxu1  ;;  %2930 = vmatmul.mubr.bf16.vlgmr.msra.gmra.mxu1 %v8522_v56  ;;  %v2645_v48 = vadd.f32 %v2644_v46, %v8854_v35  ;;  %3028 = vmatpush1.bf16.msra.mxu0 %v11462_v50  ;;  %v11492_v46 = vld [vmem:[#allocation76_spill] sm:$0xff] }
 0x284   :  { %3069 = vmatpush1.bf16.msra.mxu1 %v11463_v51  ;;  %v2646_v13 = vpop.f32.mrf.mxu0  ;;  %3029 = vmatprep.subr.bf16.mxu0 %v11464_v53  ;;  %v11496_v50 = vld [vmem:[#allocation80_spill] sm:$0xff]  ;;  %v11497_v51 = vld [vmem:[#allocation81_spill] sm:$0xff] }
 0x285   :  { %v2687_v52 = vpop.f32.mrf.mxu1  ;;  %3070 = vmatprep.subr.bf16.mxu1 %v11465_v54  ;;  %v8949_v0 = vadd.f32 %v2685_v47, %v2645_v48  ;;  %v2647_v57 = vadd.f32 %v2646_v13, %v8860_v39  ;;  %3059 = vmatprep.mubr.bf16.mxu0 %v8932_v38  ;;  %v11471_v39 = vld [vmem:[#allocation55_spill] sm:$0xff]  ;;  %v11493_v47 = vld [vmem:[#allocation77_spill] sm:$0xff]  ;;  %v11498_v13 = vld [vmem:[#allocation82_spill] sm:$0xff] }
 0x286   :  { %3100 = vmatprep.mubr.bf16.mxu1 %v8940_v45  ;;  %v2648_v56 = vpop.f32.mrf.mxu0  ;;  %v11495_v48 = vld [vmem:[#allocation79_spill] sm:$0xff]  ;;  %v11500_v53 = vld [vmem:[#allocation84_spill] sm:$0xff]  ;;  %v11501_v54 = vld [vmem:[#allocation85_spill] sm:$0xff] }
 0x287   :  { %v2689_v35 = vpop.f32.mrf.mxu1  ;;  %v8954_v58 = vadd.f32 %v2687_v52, %v2647_v57  ;;  %3030 = vmatpush1.bf16.msra.mxu0 %v11466_v26  ;;  %v11499_v52 = vld [vmem:[#allocation83_spill] sm:$0xff]  ;;  %v11502_v57 = vld [vmem:[#allocation86_spill] sm:$0xff]  ;;  %v11505_v26 = vld [vmem:[#allocation89_spill] sm:$0xff] }
 0x288   :  { %3071 = vmatpush1.bf16.msra.mxu1 %v11467_v60  ;;  %v2649_v2 = vpop.f32.mrf.mxu0  ;;  %3031 = vmatprep.subr.bf16.mxu0 %v11468_v37  ;;  %v11503_v56 = vld [vmem:[#allocation87_spill] sm:$0xff]  ;;  %v11504_v35 = vld [vmem:[#allocation88_spill] sm:$0xff]  ;;  %v11506_v60 = vld [vmem:[#allocation90_spill] sm:$0xff] }
 0x289   :  { %v2690_v3 = vpop.f32.mrf.mxu1  ;;  %3072 = vmatprep.subr.bf16.mxu1 %v11469_v5  ;;  %v11507_v2 = vld [vmem:[#allocation91_spill] sm:$0xff]  ;;  %v11509_v37 = vld [vmem:[#allocation93_spill] sm:$0xff]  ;;  %v2946_v5 = vcombine.high %v8911_v11, %v8911_v11 }
 0x28a   :  { %v11508_v3 = vld [vmem:[#allocation92_spill] sm:$0xff] }
 0x28b   :  { %3032 = vmatpush1.bf16.msra.mxu0 %v11470_v7  ;;  %v11510_v7 = vld [vmem:[#allocation94_spill] sm:$0xff] }
 0x28c   :  { %3073 = vmatpush1.bf16.msra.mxu1 %v11471_v39  ;;  %3033 = vmatprep.subr.bf16.mxu0 %v11472_v8  ;;  %v11511_v39 = vld [vmem:[#allocation95_spill] sm:$0xff]  ;;  %v11512_v8 = vld [vmem:[#allocation96_spill] sm:$0xff] }
 0x28d   :  { %3074 = vmatprep.subr.bf16.mxu1 %v11473_v9  ;;  %v11513_v9 = vld [vmem:[#allocation97_spill] sm:$0xff] }
 0x28f   :  { %3034 = vmatpush1.bf16.msra.mxu0 %v11474_v10  ;;  %v9007_v10 = vrot.slane %v2946_v5, %v6144_v49  ;;  %v11535_v5 = vld [vmem:[#allocation119_spill] sm:$0xff] }
 0x290   :  { %3075 = vmatpush1.bf16.msra.mxu1 %v11475_v12  ;;  %3035 = vmatprep.subr.bf16.mxu0 %v11476_v14  ;;  %v11514_v12 = vld [vmem:[#allocation98_spill] sm:$0xff]  ;;  %v11515_v14 = vld [vmem:[#allocation99_spill] sm:$0xff] }
 0x291   :  { %3076 = vmatprep.subr.bf16.mxu1 %v11477_v15  ;;  %v11516_v15 = vld [vmem:[#allocation100_spill] sm:$0xff]  ;;  %v2962_v11 = vcombine.high %v9007_v10, %v9007_v10 }
 0x293   :  { %3036 = vmatpush1.bf16.msra.mxu0 %v11478_v16  ;;  %v11517_v16 = vld [vmem:[#allocation101_spill] sm:$0xff] }
 0x294   :  { %3077 = vmatpush1.bf16.msra.mxu1 %v11479_v20  ;;  %3037 = vmatprep.subr.bf16.mxu0 %v11480_v21  ;;  %v9017_v20 = vrot.slane %v8919_v19, %v6144_v49  ;;  %v11518_v21 = vld [vmem:[#allocation102_spill] sm:$0xff]  ;;  %v11524_v19 = vld [vmem:[#allocation108_spill] sm:$0xff] }
 0x295   :  { %3078 = vmatprep.subr.bf16.mxu1 %v11481_v18  ;;  %v11519_v18 = vld [vmem:[#allocation103_spill] sm:$0xff] }
 0x297   :  { %3038 = vmatpush1.bf16.msra.mxu0 %v11482_v59  ;;  %v11520_v59 = vld [vmem:[#allocation104_spill] sm:$0xff] }
 0x298   :  { %3079 = vmatpush1.bf16.msra.mxu1 %v11483_v1  ;;  %3039 = vmatprep.subr.bf16.mxu0 %v11484_v30  ;;  %v11521_v1 = vld [vmem:[#allocation105_spill] sm:$0xff]  ;;  %v9024_v30 = vrot.slane %v2962_v11, %v6144_v49 }
 0x299   :  { %3080 = vmatprep.subr.bf16.mxu1 %v11485_v32  ;;  %v9028_v32 = vcombine.high %v9017_v20, %v9017_v20  ;;  %v11545_v11 = vld [vmem:[#allocation129_spill] sm:$0xff] }
 0x29b   :  { %3040 = vmatpush1.bf16.msra.mxu0 %v11486_v34  ;;  %v11522_v34 = vld [vmem:[#allocation106_spill] sm:$0xff] }
 0x29c   :  { %3081 = vmatpush1.bf16.msra.mxu1 %v11487_v36  ;;  %3041 = vmatprep.subr.bf16.mxu0 %v11488_v40  ;;  %v11523_v36 = vld [vmem:[#allocation107_spill] sm:$0xff]  ;;  %v11525_v40 = vld [vmem:[#allocation109_spill] sm:$0xff] }
 0x29d   :  { %3082 = vmatprep.subr.bf16.mxu1 %v11489_v41  ;;  %v9036_v41 = vcombine.high %v9024_v30, %v9024_v30 }
 0x29f   :  { %3042 = vmatpush1.bf16.msra.mxu0 %v11490_v42 }
 0x2a0   :  { %3083 = vmatpush1.bf16.msra.mxu1 %v11491_v44  ;;  %3043 = vmatprep.subr.bf16.mxu0 %v11492_v46 }
 0x2a1   :  { %3084 = vmatprep.subr.bf16.mxu1 %v11493_v47  ;;  %v11526_v47 = vld [vmem:[#allocation111_spill] sm:$0xff] }
 0x2a3   :  { %3044 = vmatpush2.bf16.msra.mxu0 %v11494_v33  ;;  %v11527_v33 = vld [vmem:[#allocation112_spill] sm:$0xff] }
 0x2a4   :  { %3085 = vmatpush2.bf16.msra.mxu1 %v11495_v48  ;;  %3045 = vmatprep.subr.bf16.mxu0 %v11496_v50 }
 0x2a5   :  { %3086 = vmatprep.subr.bf16.mxu1 %v11497_v51  ;;  %v11528_v51 = vld [vmem:[#allocation113_spill] sm:$0xff] }
 0x2a7   :  { %3046 = vmatpush2.bf16.msra.mxu0 %v11498_v13  ;;  %v11529_v13 = vld [vmem:[#allocation114_spill] sm:$0xff] }
 0x2a8   :  { %3087 = vmatpush2.bf16.msra.mxu1 %v11499_v52  ;;  %3047 = vmatprep.subr.bf16.mxu0 %v11500_v53  ;;  %v11530_v52 = vld [vmem:[#allocation110_spill] sm:$0xff] }
 0x2a9   :  { %3088 = vmatprep.subr.bf16.mxu1 %v11501_v54  ;;  %v9587_v53 = vld [vmem:[%s10832_s1 + $0x7e8] ss:$16 sps:$4 sm:$0xff]  }
 0x2aa   :  { %11703 = vst [vmem:[#allocation21_spill] sm:$0xff] %v9587_v53 }
 0x2ab   :  { %3048 = vmatpush2.bf16.msra.mxu0 %v11502_v57 }
 0x2ac   :  { %3089 = vmatpush2.bf16.msra.mxu1 %v11503_v56  ;;  %3049 = vmatprep.subr.bf16.mxu0 %v11504_v35  ;;  %v11531_v56 = vld [vmem:[#allocation115_spill] sm:$0xff]  ;;  %v9581_v35 = vld [vmem:[%s10832_s1 + $0x9ec] ss:$16 sps:$4 sm:$0xff]  }
 0x2ad   :  { %3090 = vmatprep.subr.bf16.mxu1 %v11505_v26  ;;  %v11532_v26 = vld [vmem:[#allocation116_spill] sm:$0xff]  ;;  %11702 = vst [vmem:[#allocation20_spill] sm:$0xff] %v9581_v35 }
 0x2af   :  { %3050 = vmatpush2.bf16.msra.mxu0 %v11506_v60  ;;  %v11533_v60 = vld [vmem:[#allocation117_spill] sm:$0xff] }
 0x2b0   :  { %3091 = vmatpush2.bf16.msra.mxu1 %v11507_v2  ;;  %3051 = vmatprep.subr.bf16.mxu0 %v11508_v3 }
 0x2b1   :  { %3092 = vmatprep.subr.bf16.mxu1 %v11509_v37  ;;  %v11534_v37 = vld [vmem:[#allocation118_spill] sm:$0xff] }
 0x2b3   :  { %3052 = vmatpush2.bf16.msra.mxu0 %v11510_v7  ;;  %v11537_v7 = vld [vmem:[#allocation121_spill] sm:$0xff] }
 0x2b4   :  { %3093 = vmatpush2.bf16.msra.mxu1 %v11511_v39  ;;  %3053 = vmatprep.subr.bf16.mxu0 %v11512_v8  ;;  %v11538_v39 = vld [vmem:[#allocation122_spill] sm:$0xff]  ;;  %v11539_v8 = vld [vmem:[#allocation123_spill] sm:$0xff] }
 0x2b5   :  { %3094 = vmatprep.subr.bf16.mxu1 %v11513_v9  ;;  %v11540_v9 = vld [vmem:[#allocation124_spill] sm:$0xff] }
 0x2b7   :  { %3054 = vmatpush2.bf16.msra.mxu0 %v11514_v12  ;;  %v11541_v12 = vld [vmem:[#allocation125_spill] sm:$0xff] }
 0x2b8   :  { %3095 = vmatpush2.bf16.msra.mxu1 %v11515_v14  ;;  %3055 = vmatprep.subr.bf16.mxu0 %v11516_v15  ;;  %v11542_v14 = vld [vmem:[#allocation126_spill] sm:$0xff]  ;;  %v11543_v15 = vld [vmem:[#allocation127_spill] sm:$0xff] }
 0x2b9   :  { %3096 = vmatprep.subr.bf16.mxu1 %v11517_v16  ;;  %v11544_v16 = vld [vmem:[#allocation128_spill] sm:$0xff] }
 0x2bb   :  { %3056 = vmatpush2.bf16.msra.mxu0 %v11518_v21  ;;  %v11546_v21 = vld [vmem:[#allocation130_spill] sm:$0xff] }
 0x2bc   :  { %3097 = vmatpush2.bf16.msra.mxu1 %v11519_v18  ;;  %3057 = vmatprep.subr.bf16.mxu0 %v11520_v59  ;;  %v11547_v18 = vld [vmem:[#allocation131_spill] sm:$0xff]  ;;  %v11548_v59 = vld [vmem:[#allocation132_spill] sm:$0xff] }
 0x2bd   :  { %3098 = vmatprep.subr.bf16.mxu1 %v11521_v1  ;;  %v11549_v1 = vld [vmem:[#allocation133_spill] sm:$0xff] }
 0x2bf   :  { %3058 = vmatpush2.bf16.msra.mxu0 %v11522_v34  ;;  %v11550_v34 = vld [vmem:[#allocation134_spill] sm:$0xff] }
 0x2c0   :  { %3099 = vmatpush2.bf16.msra.mxu1 %v11523_v36  ;;  %3109 = vmatprep.subr.bf16.mxu0 %v11524_v19  ;;  %v11551_v36 = vld [vmem:[#allocation135_spill] sm:$0xff]  ;;  %v11552_v19 = vld [vmem:[#allocation136_spill] sm:$0xff] }
 0x2c1   :  { %3150 = vmatprep.subr.bf16.mxu1 %v11525_v40  ;;  %v11553_v40 = vld [vmem:[#allocation137_spill] sm:$0xff] }
 0x2c2   :  { %v2726_v42 = vpop.f32.mrf.mxu0  ;;  %3060 = vmatmul.mubr.bf16.vlgmr.msra.gmra.mxu0 %v9017_v20 }
 0x2c3   :  { %v9038_v44 = vpop.f32.mrf.mxu1  ;;  %3101 = vmatmul.mubr.bf16.vlgmr.msra.gmra.mxu1 %v9028_v32  ;;  %v9043_v46 = vadd.f32 %v2726_v42, %v8949_v0  ;;  %3110 = vmatpush1.bf16.msra.mxu0 %v11526_v47  ;;  %v11554_v42 = vld [vmem:[#allocation138_spill] sm:$0xff]  ;;  %v11555_v47 = vld [vmem:[#allocation139_spill] sm:$0xff] }
 0x2c4   :  { %3151 = vmatpush1.bf16.msra.mxu1 %v11527_v33  ;;  %v2728_v48 = vpop.f32.mrf.mxu0  ;;  %3111 = vmatprep.subr.bf16.mxu0 %v11528_v51  ;;  %v11556_v33 = vld [vmem:[#allocation140_spill] sm:$0xff]  ;;  %v11558_v51 = vld [vmem:[#allocation142_spill] sm:$0xff] }
 0x2c5   :  { %v9047_v50 = vpop.f32.mrf.mxu1  ;;  %3152 = vmatprep.subr.bf16.mxu1 %v11529_v13  ;;  %v9054_v54 = vadd.f32 %v2728_v48, %v8954_v58  ;;  %3141 = vmatprep.mubr.bf16.mxu0 %v9024_v30  ;;  %v11536_v58 = vld [vmem:[#allocation120_spill] sm:$0xff]  ;;  %v11557_v48 = vld [vmem:[#allocation141_spill] sm:$0xff]  ;;  %v11559_v13 = vld [vmem:[#allocation143_spill] sm:$0xff] }
 0x2c6   :  { %3182 = vmatprep.mubr.bf16.mxu1 %v9036_v41  ;;  %v2730_v0 = vpop.f32.mrf.mxu0 }
 0x2c7   :  { %v2771_v57 = vpop.f32.mrf.mxu1  ;;  %3112 = vmatpush1.bf16.msra.mxu0 %v11532_v26  ;;  %v11560_v0 = vld [vmem:[#allocation144_spill] sm:$0xff]  ;;  %v11562_v26 = vld [vmem:[#allocation146_spill] sm:$0xff] }
 0x2c8   :  { %3153 = vmatpush1.bf16.msra.mxu1 %v11533_v60  ;;  %v2731_v2 = vpop.f32.mrf.mxu0  ;;  %3113 = vmatprep.subr.bf16.mxu0 %v11534_v37  ;;  %v11561_v57 = vld [vmem:[#allocation145_spill] sm:$0xff]  ;;  %v11563_v60 = vld [vmem:[#allocation147_spill] sm:$0xff]  ;;  %v11566_v37 = vld [vmem:[#allocation150_spill] sm:$0xff] }
 0x2c9   :  { %v2772_v3 = vpop.f32.mrf.mxu1  ;;  %3154 = vmatprep.subr.bf16.mxu1 %v11535_v5  ;;  %v11564_v2 = vld [vmem:[#allocation148_spill] sm:$0xff]  ;;  %v11567_v5 = vld [vmem:[#allocation151_spill] sm:$0xff] }
 0x2ca   :  { %v11565_v3 = vld [vmem:[#allocation149_spill] sm:$0xff] }
 0x2cb   :  { %3114 = vmatpush1.bf16.msra.mxu0 %v11536_v58  ;;  %v11568_v58 = vld [vmem:[#allocation152_spill] sm:$0xff] }
 0x2cc   :  { %3155 = vmatpush1.bf16.msra.mxu1 %v11537_v7  ;;  %3115 = vmatprep.subr.bf16.mxu0 %v11538_v39  ;;  %v11569_v7 = vld [vmem:[#allocation153_spill] sm:$0xff]  ;;  %v11570_v39 = vld [vmem:[#allocation154_spill] sm:$0xff] }
 0x2cd   :  { %3156 = vmatprep.subr.bf16.mxu1 %v11539_v8  ;;  %v11571_v8 = vld [vmem:[#allocation155_spill] sm:$0xff] }
 0x2cf   :  { %3116 = vmatpush1.bf16.msra.mxu0 %v11540_v9  ;;  %v11572_v9 = vld [vmem:[#allocation156_spill] sm:$0xff] }
 0x2d0   :  { %3157 = vmatpush1.bf16.msra.mxu1 %v11541_v12  ;;  %3117 = vmatprep.subr.bf16.mxu0 %v11542_v14  ;;  %v11573_v12 = vld [vmem:[#allocation157_spill] sm:$0xff]  ;;  %v11574_v14 = vld [vmem:[#allocation158_spill] sm:$0xff] }
 0x2d1   :  { %3158 = vmatprep.subr.bf16.mxu1 %v11543_v15  ;;  %v11575_v15 = vld [vmem:[#allocation159_spill] sm:$0xff] }
 0x2d3   :  { %3118 = vmatpush1.bf16.msra.mxu0 %v11544_v16  ;;  %v11576_v16 = vld [vmem:[#allocation160_spill] sm:$0xff] }
 0x2d4   :  { %3159 = vmatpush1.bf16.msra.mxu1 %v11545_v11  ;;  %3119 = vmatprep.subr.bf16.mxu0 %v11546_v21  ;;  %v11577_v11 = vld [vmem:[#allocation161_spill] sm:$0xff]  ;;  %v11578_v21 = vld [vmem:[#allocation162_spill] sm:$0xff] }
 0x2d5   :  { %3160 = vmatprep.subr.bf16.mxu1 %v11547_v18  ;;  %v11579_v18 = vld [vmem:[#allocation163_spill] sm:$0xff] }
 0x2d7   :  { %3120 = vmatpush1.bf16.msra.mxu0 %v11548_v59  ;;  %v11580_v59 = vld [vmem:[#allocation164_spill] sm:$0xff] }
 0x2d8   :  { %3161 = vmatpush1.bf16.msra.mxu1 %v11549_v1  ;;  %3121 = vmatprep.subr.bf16.mxu0 %v11550_v34  ;;  %v11581_v1 = vld [vmem:[#allocation165_spill] sm:$0xff]  ;;  %v11582_v34 = vld [vmem:[#allocation166_spill] sm:$0xff] }
 0x2d9   :  { %3162 = vmatprep.subr.bf16.mxu1 %v11551_v36  ;;  %v11583_v36 = vld [vmem:[#allocation167_spill] sm:$0xff] }
 0x2db   :  { %3122 = vmatpush1.bf16.msra.mxu0 %v11552_v19  ;;  %v9114_v19 = vrot.slane %v9007_v10, %v6144_v49 }
 0x2dc   :  { %3163 = vmatpush1.bf16.msra.mxu1 %v11553_v40  ;;  %3123 = vmatprep.subr.bf16.mxu0 %v11554_v42  ;;  %v9119_v40 = vld.sshfl [vmem:[%s10831_s0 + $0x1c] sm:$0x11 pattern:$0x75316420] }
 0x2dd   :  { %3164 = vmatprep.subr.bf16.mxu1 %v11555_v47  ;;  %v11584_v42 = vld [vmem:[#allocation168_spill] sm:$0xff]  ;;  %v11585_v47 = vld [vmem:[#allocation169_spill] sm:$0xff]  ;;  %v9129_v10 = vcombine.high %v9114_v19, %v9114_v19 }
 0x2df   :  { %3124 = vmatpush1.bf16.msra.mxu0 %v11556_v33  ;;  %v11586_v33 = vld [vmem:[#allocation170_spill] sm:$0xff] }
 0x2e0   :  { %3165 = vmatpush1.bf16.msra.mxu1 %v11557_v48  ;;  %3125 = vmatprep.subr.bf16.mxu0 %v11558_v51  ;;  %v11587_v48 = vld [vmem:[#allocation171_spill] sm:$0xff]  ;;  %v3002_v51 = vcombine.high %v9119_v40, %v9119_v40 }
 0x2e1   :  { %3166 = vmatprep.subr.bf16.mxu1 %v11559_v13  ;;  %v11588_v13 = vld [vmem:[#allocation173_spill] sm:$0xff] }
 0x2e3   :  { %3126 = vmatpush2.bf16.msra.mxu0 %v11560_v0  ;;  %v11589_v0 = vld [vmem:[#allocation174_spill] sm:$0xff] }
 0x2e4   :  { %3167 = vmatpush2.bf16.msra.mxu1 %v11561_v57  ;;  %3127 = vmatprep.subr.bf16.mxu0 %v11562_v26  ;;  %v11590_v57 = vld [vmem:[#allocation175_spill] sm:$0xff]  ;;  %v11591_v26 = vld [vmem:[#allocation176_spill] sm:$0xff] }
 0x2e5   :  { %3168 = vmatprep.subr.bf16.mxu1 %v11563_v60  ;;  %v9136_v60 = vrot.slane %v3002_v51, %v6144_v49  ;;  %v11609_v51 = vld [vmem:[#allocation194_spill] sm:$0xff] }
 0x2e7   :  { %3128 = vmatpush2.bf16.msra.mxu0 %v11564_v2 }
 0x2e8   :  { %3169 = vmatpush2.bf16.msra.mxu1 %v11565_v3  ;;  %3129 = vmatprep.subr.bf16.mxu0 %v11566_v37 }
 0x2e9   :  { %3170 = vmatprep.subr.bf16.mxu1 %v11567_v5  ;;  %v11592_v5 = vld [vmem:[#allocation177_spill] sm:$0xff] }
 0x2eb   :  { %3130 = vmatpush2.bf16.msra.mxu0 %v11568_v58  ;;  %v11593_v58 = vld [vmem:[#allocation178_spill] sm:$0xff] }
 0x2ec   :  { %3171 = vmatpush2.bf16.msra.mxu1 %v11569_v7  ;;  %3131 = vmatprep.subr.bf16.mxu0 %v11570_v39 }
 0x2ed   :  { %3172 = vmatprep.subr.bf16.mxu1 %v11571_v8  ;;  %v11594_v8 = vld [vmem:[#allocation179_spill] sm:$0xff] }
 0x2ef   :  { %3132 = vmatpush2.bf16.msra.mxu0 %v11572_v9 }
 0x2f0   :  { %3173 = vmatpush2.bf16.msra.mxu1 %v11573_v12  ;;  %3133 = vmatprep.subr.bf16.mxu0 %v11574_v14 }
 0x2f1   :  { %3174 = vmatprep.subr.bf16.mxu1 %v11575_v15 }
 0x2f3   :  { %3134 = vmatpush2.bf16.msra.mxu0 %v11576_v16  ;;  %v11595_v16 = vld [vmem:[#allocation180_spill] sm:$0xff] }
 0x2f4   :  { %3175 = vmatpush2.bf16.msra.mxu1 %v11577_v11  ;;  %3135 = vmatprep.subr.bf16.mxu0 %v11578_v21 }
 0x2f5   :  { %3176 = vmatprep.subr.bf16.mxu1 %v11579_v18  ;;  %v11596_v18 = vld [vmem:[#allocation181_spill] sm:$0xff] }
 0x2f7   :  { %3136 = vmatpush2.bf16.msra.mxu0 %v11580_v59  ;;  %v11598_v59 = vld [vmem:[#allocation183_spill] sm:$0xff] }
 0x2f8   :  { %3177 = vmatpush2.bf16.msra.mxu1 %v11581_v1  ;;  %3137 = vmatprep.subr.bf16.mxu0 %v11582_v34  ;;  %v11600_v1 = vld [vmem:[#allocation185_spill] sm:$0xff]  ;;  %v11602_v34 = vld [vmem:[#allocation187_spill] sm:$0xff] }
 0x2f9   :  { %3178 = vmatprep.subr.bf16.mxu1 %v11583_v36  ;;  %v11603_v36 = vld [vmem:[#allocation188_spill] sm:$0xff] }
 0x2fb   :  { %3138 = vmatpush2.bf16.msra.mxu0 %v11584_v42  ;;  %v11605_v42 = vld [vmem:[#allocation190_spill] sm:$0xff] }
 0x2fc   :  { %3179 = vmatpush2.bf16.msra.mxu1 %v11585_v47  ;;  %3139 = vmatprep.subr.bf16.mxu0 %v11586_v33  ;;  %v11606_v47 = vld [vmem:[#allocation191_spill] sm:$0xff]  ;;  %v11607_v33 = vld [vmem:[#allocation192_spill] sm:$0xff] }
 0x2fd   :  { %3180 = vmatprep.subr.bf16.mxu1 %v11587_v48  ;;  %v11608_v48 = vld [vmem:[#allocation193_spill] sm:$0xff] }
 0x2ff   :  { %3140 = vmatpush2.bf16.msra.mxu0 %v11588_v13  ;;  %v11610_v13 = vld [vmem:[#allocation195_spill] sm:$0xff] }
 0x300   :  { %3181 = vmatpush2.bf16.msra.mxu1 %v11589_v0  ;;  %3191 = vmatprep.subr.bf16.mxu0 %v11590_v57  ;;  %v11611_v0 = vld [vmem:[#allocation196_spill] sm:$0xff]  ;;  %v11612_v57 = vld [vmem:[#allocation197_spill] sm:$0xff] }
 0x301   :  { %3232 = vmatprep.subr.bf16.mxu1 %v11591_v26  ;;  %v11613_v26 = vld [vmem:[#allocation198_spill] sm:$0xff] }
 0x302   :  { %v2808_v2 = vpop.f32.mrf.mxu0  ;;  %3142 = vmatmul.mubr.bf16.vlgmr.msra.gmra.mxu0 %v9114_v19 }
 0x303   :  { %v2849_v3 = vpop.f32.mrf.mxu1  ;;  %3183 = vmatmul.mubr.bf16.vlgmr.msra.gmra.mxu1 %v9129_v10  ;;  %v2809_v37 = vadd.f32 %v2808_v2, %v9038_v44  ;;  %3192 = vmatpush1.bf16.msra.mxu0 %v11592_v5  ;;  %v11614_v2 = vld [vmem:[#allocation199_spill] sm:$0xff]  ;;  %v11617_v5 = vld [vmem:[#allocation202_spill] sm:$0xff] }
 0x304   :  { %3233 = vmatpush1.bf16.msra.mxu1 %v11593_v58  ;;  %v2810_v7 = vpop.f32.mrf.mxu0  ;;  %3193 = vmatprep.subr.bf16.mxu0 %v11594_v8  ;;  %v11618_v58 = vld [vmem:[#allocation203_spill] sm:$0xff]  ;;  %v11621_v8 = vld [vmem:[#allocation206_spill] sm:$0xff] }
 0x305   :  { %v2851_v39 = vpop.f32.mrf.mxu1  ;;  %3234 = vmatprep.subr.bf16.mxu1 %v8174_v63  ;;  %v9145_v9 = vadd.f32 %v2849_v3, %v2809_v37  ;;  %v2811_v12 = vadd.f32 %v2810_v7, %v9047_v50  ;;  %3223 = vmatprep.mubr.bf16.mxu0 %v9136_v60  ;;  %v11597_v63 = vld [vmem:[#allocation182_spill] sm:$0xff]  ;;  %v11599_v50 = vld [vmem:[#allocation184_spill] sm:$0xff]  ;;  %v11616_v37 = vld [vmem:[#allocation201_spill] sm:$0xff] }
 0x306   :  { %3264 = vmatprep.mubr.bf16.mxu1 %v8932_v38  ;;  %v2812_v14 = vpop.f32.mrf.mxu0  ;;  %v11601_v38 = vld [vmem:[#allocation186_spill] sm:$0xff]  ;;  %v11615_v3 = vld [vmem:[#allocation200_spill] sm:$0xff] }
 0x307   :  { %v2853_v44 = vpop.f32.mrf.mxu1  ;;  %v9150_v15 = vadd.f32 %v2851_v39, %v2811_v12  ;;  %3194 = vmatpush1.bf16.msra.mxu0 %v8187_v28  ;;  %v11604_v28 = vld [vmem:[#allocation189_spill] sm:$0xff]  ;;  %v11619_v7 = vld [vmem:[#allocation204_spill] sm:$0xff]  ;;  %v11622_v12 = vld [vmem:[#allocation207_spill] sm:$0xff] }
 0x308   :  { %3235 = vmatpush1.bf16.msra.mxu1 %v11595_v16  ;;  %v2813_v11 = vpop.f32.mrf.mxu0  ;;  %3195 = vmatprep.subr.bf16.mxu0 %v11596_v18  ;;  %v11620_v39 = vld [vmem:[#allocation205_spill] sm:$0xff]  ;;  %v11623_v14 = vld [vmem:[#allocation208_spill] sm:$0xff]  ;;  %v11625_v16 = vld [vmem:[#allocation210_spill] sm:$0xff] }
 0x309   :  { %v2854_v21 = vpop.f32.mrf.mxu1  ;;  %3236 = vmatprep.subr.bf16.mxu1 %v11597_v63  ;;  %v11624_v44 = vld [vmem:[#allocation209_spill] sm:$0xff]  ;;  %v11626_v11 = vld [vmem:[#allocation211_spill] sm:$0xff]  ;;  %v11629_v63 = vld [vmem:[#allocation214_spill] sm:$0xff] }
 0x30a   :  { %v11627_v21 = vld [vmem:[#allocation212_spill] sm:$0xff]  ;;  %v11628_v18 = vld [vmem:[#allocation213_spill] sm:$0xff] }
 0x30b   :  { %3196 = vmatpush1.bf16.msra.mxu0 %v11598_v59  ;;  %v11630_v59 = vld [vmem:[#allocation215_spill] sm:$0xff] }
 0x30c   :  { %3237 = vmatpush1.bf16.msra.mxu1 %v11599_v50  ;;  %3197 = vmatprep.subr.bf16.mxu0 %v11600_v1  ;;  %v11631_v50 = vld [vmem:[#allocation216_spill] sm:$0xff]  ;;  %v11632_v1 = vld [vmem:[#allocation217_spill] sm:$0xff] }
 0x30d   :  { %3238 = vmatprep.subr.bf16.mxu1 %v11601_v38  ;;  %v11633_v38 = vld [vmem:[#allocation218_spill] sm:$0xff] }
 0x30f   :  { %3198 = vmatpush1.bf16.msra.mxu0 %v11602_v34  ;;  %v11634_v34 = vld [vmem:[#allocation219_spill] sm:$0xff] }
 0x310   :  { %3239 = vmatpush1.bf16.msra.mxu1 %v11603_v36  ;;  %3199 = vmatprep.subr.bf16.mxu0 %v11604_v28  ;;  %v11635_v36 = vld [vmem:[#allocation220_spill] sm:$0xff]  ;;  %v11636_v28 = vld [vmem:[#allocation221_spill] sm:$0xff] }
 0x311   :  { %3240 = vmatprep.subr.bf16.mxu1 %v11605_v42  ;;  %v11637_v42 = vld [vmem:[#allocation222_spill] sm:$0xff] }
 0x313   :  { %3200 = vmatpush1.bf16.msra.mxu0 %v11606_v47  ;;  %v11638_v47 = vld [vmem:[#allocation223_spill] sm:$0xff] }
 0x314   :  { %3241 = vmatpush1.bf16.msra.mxu1 %v11607_v33  ;;  %3201 = vmatprep.subr.bf16.mxu0 %v11608_v48  ;;  %v11639_v33 = vld [vmem:[#allocation224_spill] sm:$0xff]  ;;  %v11640_v48 = vld [vmem:[#allocation225_spill] sm:$0xff] }
 0x315   :  { %3242 = vmatprep.subr.bf16.mxu1 %v11609_v51  ;;  %v11641_v51 = vld [vmem:[#allocation226_spill] sm:$0xff] }
 0x317   :  { %3202 = vmatpush1.bf16.msra.mxu0 %v11610_v13  ;;  %v11642_v13 = vld [vmem:[#allocation227_spill] sm:$0xff] }
 0x318   :  { %3243 = vmatpush1.bf16.msra.mxu1 %v11611_v0  ;;  %3203 = vmatprep.subr.bf16.mxu0 %v11612_v57  ;;  %v11643_v0 = vld [vmem:[#allocation228_spill] sm:$0xff]  ;;  %v11644_v57 = vld [vmem:[#allocation229_spill] sm:$0xff] }
 0x319   :  { %3244 = vmatprep.subr.bf16.mxu1 %v11613_v26  ;;  %v11645_v26 = vld [vmem:[#allocation230_spill] sm:$0xff] }
 0x31b   :  { %3204 = vmatpush1.bf16.msra.mxu0 %v11614_v2  ;;  %v11646_v2 = vld [vmem:[#allocation231_spill] sm:$0xff] }
 0x31c   :  { %3245 = vmatpush1.bf16.msra.mxu1 %v11615_v3  ;;  %3205 = vmatprep.subr.bf16.mxu0 %v11616_v37  ;;  %v11647_v3 = vld [vmem:[#allocation232_spill] sm:$0xff]  ;;  %v11648_v37 = vld [vmem:[#allocation233_spill] sm:$0xff] }
 0x31d   :  { %3246 = vmatprep.subr.bf16.mxu1 %v11617_v5  ;;  %v11649_v5 = vld [vmem:[#allocation234_spill] sm:$0xff] }
 0x31f   :  { %3206 = vmatpush1.bf16.msra.mxu0 %v11618_v58  ;;  %v9210_v58 = vrot.slane %v9119_v40, %v6144_v49  ;;  %v11655_v40 = vld [vmem:[#allocation240_spill] sm:$0xff] }
 0x320   :  { %3247 = vmatpush1.bf16.msra.mxu1 %v11619_v7  ;;  %3207 = vmatprep.subr.bf16.mxu0 %v11620_v39  ;;  %v11650_v7 = vld [vmem:[#allocation235_spill] sm:$0xff]  ;;  %v11651_v39 = vld [vmem:[#allocation236_spill] sm:$0xff] }
 0x321   :  { %3248 = vmatprep.subr.bf16.mxu1 %v11621_v8  ;;  %v11652_v8 = vld [vmem:[#allocation237_spill] sm:$0xff] }
 0x323   :  { %3208 = vmatpush2.bf16.msra.mxu0 %v11622_v12  ;;  %v11653_v12 = vld [vmem:[#allocation238_spill] sm:$0xff] }
 0x324   :  { %3249 = vmatpush2.bf16.msra.mxu1 %v11623_v14  ;;  %3209 = vmatprep.subr.bf16.mxu0 %v11624_v44 }
 0x325   :  { %3250 = vmatprep.subr.bf16.mxu1 %v11625_v16 }
 0x327   :  { %3210 = vmatpush2.bf16.msra.mxu0 %v11626_v11  ;;  %v11654_v11 = vld [vmem:[#allocation239_spill] sm:$0xff] }
 0x328   :  { %3251 = vmatpush2.bf16.msra.mxu1 %v11627_v21  ;;  %3211 = vmatprep.subr.bf16.mxu0 %v11628_v18 }
 0x329   :  { %3252 = vmatprep.subr.bf16.mxu1 %v11629_v63  ;;  %v11656_v63 = vld [vmem:[#allocation241_spill] sm:$0xff] }
 0x32b   :  { %3212 = vmatpush2.bf16.msra.mxu0 %v11630_v59 }
 0x32c   :  { %3253 = vmatpush2.bf16.msra.mxu1 %v11631_v50  ;;  %3213 = vmatprep.subr.bf16.mxu0 %v11632_v1  ;;  %v9575_v1 = vld [vmem:[%s10832_s1 + $0x7ec] ss:$16 sps:$4 sm:$0xff]  }
 0x32d   :  { %3254 = vmatprep.subr.bf16.mxu1 %v11633_v38  ;;  %11701 = vst [vmem:[#allocation19_spill] sm:$0xff] %v9575_v1 }
 0x32f   :  { %3214 = vmatpush2.bf16.msra.mxu0 %v11634_v34 }
 0x330   :  { %3255 = vmatpush2.bf16.msra.mxu1 %v11635_v36  ;;  %3215 = vmatprep.subr.bf16.mxu0 %v11636_v28  ;;  %v11663_v36 = vld [vmem:[#allocation248_spill] sm:$0xff]  ;;  %v11664_v28 = vld [vmem:[#allocation249_spill] sm:$0xff] }
 0x331   :  { %3256 = vmatprep.subr.bf16.mxu1 %v11637_v42  ;;  %v11668_v42 = vld [vmem:[#allocation253_spill] sm:$0xff] }
 0x333   :  { %3216 = vmatpush2.bf16.msra.mxu0 %v11638_v47  ;;  %v11669_v47 = vld [vmem:[#allocation254_spill] sm:$0xff] }
 0x334   :  { %3257 = vmatpush2.bf16.msra.mxu1 %v11639_v33  ;;  %3217 = vmatprep.subr.bf16.mxu0 %v11640_v48  ;;  %v11670_v33 = vld [vmem:[#allocation255_spill] sm:$0xff]  ;;  %v11671_v48 = vld [vmem:[#allocation256_spill] sm:$0xff] }
 0x335   :  { %3258 = vmatprep.subr.bf16.mxu1 %v11641_v51  ;;  %v11672_v51 = vld [vmem:[#allocation257_spill] sm:$0xff] }
 0x337   :  { %3218 = vmatpush2.bf16.msra.mxu0 %v11642_v13  ;;  %v11673_v13 = vld [vmem:[#allocation258_spill] sm:$0xff] }
 0x338   :  { %3259 = vmatpush2.bf16.msra.mxu1 %v11643_v0  ;;  %3219 = vmatprep.subr.bf16.mxu0 %v11644_v57  ;;  %v11674_v0 = vld [vmem:[#allocation259_spill] sm:$0xff]  ;;  %v11675_v57 = vld [vmem:[#allocation260_spill] sm:$0xff] }
 0x339   :  { %3260 = vmatprep.subr.bf16.mxu1 %v11645_v26  ;;  %v11676_v26 = vld [vmem:[#allocation261_spill] sm:$0xff] }
 0x33b   :  { %3220 = vmatpush2.bf16.msra.mxu0 %v11646_v2  ;;  %v11677_v2 = vld [vmem:[#allocation262_spill] sm:$0xff] }
 0x33c   :  { %3261 = vmatpush2.bf16.msra.mxu1 %v11647_v3  ;;  %3221 = vmatprep.subr.bf16.mxu0 %v11648_v37  ;;  %v11678_v3 = vld [vmem:[#allocation263_spill] sm:$0xff]  ;;  %v11679_v37 = vld [vmem:[#allocation264_spill] sm:$0xff] }
 0x33d   :  { %3262 = vmatprep.subr.bf16.mxu1 %v11649_v5  ;;  %v11680_v5 = vld [vmem:[#allocation265_spill] sm:$0xff] }
 0x33f   :  { %3222 = vmatpush2.bf16.msra.mxu0 %v11650_v7  ;;  %v11681_v7 = vld [vmem:[#allocation266_spill] sm:$0xff] }
 0x340   :  { %3263 = vmatpush2.bf16.msra.mxu1 %v11651_v39  ;;  %3273 = vmatprep.subr.bf16.mxu0 %v11652_v8  ;;  %v11682_v39 = vld [vmem:[#allocation267_spill] sm:$0xff]  ;;  %v11683_v8 = vld [vmem:[#allocation268_spill] sm:$0xff] }
 0x341   :  { %3314 = vmatprep.subr.bf16.mxu1 %v11653_v12  ;;  %v11684_v12 = vld [vmem:[#allocation269_spill] sm:$0xff] }
 0x342   :  { %v2890_v14 = vpop.f32.mrf.mxu0  ;;  %3224 = vmatmul.mubr.bf16.vlgmr.msra.gmra.mxu0 %v9210_v58 }
 0x343   :  { %v2931_v44 = vpop.f32.mrf.mxu1  ;;  %3265 = vmatmul.mubr.bf16.vlgmr.msra.gmra.mxu1 %v9017_v20  ;;  %v2891_v16 = vadd.f32 %v2890_v14, %v9145_v9  ;;  %3274 = vmatpush1.bf16.msra.mxu0 %v11654_v11  ;;  %v11685_v14 = vld [vmem:[#allocation270_spill] sm:$0xff] }
 0x344   :  { %3315 = vmatpush1.bf16.msra.mxu1 %v11655_v40  ;;  %v2892_v21 = vpop.f32.mrf.mxu0  ;;  %3275 = vmatprep.subr.bf16.mxu0 %v11656_v63  ;;  %v9279_v11 = vld [vmem:[%s10832_s1 + $0x36c] ss:$16 sps:$4 sm:$0xff]  }
 0x345   :  { %v2933_v18 = vpop.f32.mrf.mxu1  ;;  %3316 = vmatprep.subr.bf16.mxu1 %v8572_v43  ;;  %v9223_v59 = vadd.f32 %v2931_v44, %v2891_v16  ;;  %v2893_v50 = vadd.f32 %v2892_v21, %v9150_v15  ;;  %3305 = vmatprep.mubr.bf16.mxu0 %v8940_v45  ;;  %v11660_v15 = vld [vmem:[#allocation245_spill] sm:$0xff]  ;;  %v11686_v44 = vld [vmem:[#allocation271_spill] sm:$0xff]  ;;  %v11687_v16 = vld [vmem:[#allocation272_spill] sm:$0xff] }
 0x346   :  { %3346 = vmatprep.mubr.bf16.mxu1 %v9024_v30  ;;  %v2894_v20 = vpop.f32.mrf.mxu0  ;;  %v11657_v30 = vld [vmem:[#allocation242_spill] sm:$0xff] }
 0x347   :  { %v2935_v9 = vpop.f32.mrf.mxu1  ;;  %v9230_v38 = vadd.f32 %v2933_v18, %v2893_v50  ;;  %3276 = vmatpush1.bf16.msra.mxu0 %v8585_v62  ;;  %v11658_v62 = vld [vmem:[#allocation243_spill] sm:$0xff]  ;;  %v9285_v40 = vld [vmem:[%s10832_s1 + $0x56c] ss:$16 sps:$4 sm:$0xff]  }
 0x348   :  { %3317 = vmatpush1.bf16.msra.mxu1 %v8591_v55  ;;  %v2895_v43 = vpop.f32.mrf.mxu0  ;;  %3277 = vmatprep.subr.bf16.mxu0 %v8597_v4  ;;  %v11659_v55 = vld [vmem:[#allocation244_spill] sm:$0xff]  ;;  %v11661_v4 = vld [vmem:[#allocation246_spill] sm:$0xff] }
 0x349   :  { %v2936_v34 = vpop.f32.mrf.mxu1  ;;  %3318 = vmatprep.subr.bf16.mxu1 %v8603_v24  ;;  %v11662_v24 = vld [vmem:[#allocation247_spill] sm:$0xff]  ;;  %v9327_v63 = vld [vmem:[%s10832_s1 + $0x32c] ss:$16 sps:$4 sm:$0xff]  }
 0x34a   :  { %v9315_v21 = vld [vmem:[%s10832_s1 + $0x348] ss:$16 sps:$4 sm:$0xff]   ;;  %v9333_v50 = vld [vmem:[%s10832_s1 + $0x52c] ss:$16 sps:$4 sm:$0xff]  }
 0x34b   :  { %3278 = vmatpush1.bf16.msra.mxu0 %v8609_v25  ;;  %v11665_v25 = vld [vmem:[#allocation250_spill] sm:$0xff] }
 0x34c   :  { %3319 = vmatpush1.bf16.msra.mxu1 %v8615_v6  ;;  %3279 = vmatprep.subr.bf16.mxu0 %v8621_v23  ;;  %v11666_v6 = vld [vmem:[#allocation251_spill] sm:$0xff]  ;;  %v11667_v23 = vld [vmem:[#allocation252_spill] sm:$0xff] }
 0x34d   :  { %3320 = vmatprep.subr.bf16.mxu1 %v11657_v30  ;;  %v9321_v18 = vld [vmem:[%s10832_s1 + $0x548] ss:$16 sps:$4 sm:$0xff]   ;;  %v9351_v43 = vld [vmem:[%s10832_s1 + $0x30c] ss:$16 sps:$4 sm:$0xff]  }
 0x34e   :  { %v9339_v20 = vld [vmem:[%s10832_s1 + $0x328] ss:$16 sps:$4 sm:$0xff]   ;;  %v9357_v34 = vld [vmem:[%s10832_s1 + $0x50c] ss:$16 sps:$4 sm:$0xff]  }
 0x34f   :  { %3280 = vmatpush1.bf16.msra.mxu0 %v11658_v62  ;;  %v9345_v9 = vld [vmem:[%s10832_s1 + $0x528] ss:$16 sps:$4 sm:$0xff]  }
 0x350   :  { %3321 = vmatpush1.bf16.msra.mxu1 %v11659_v55  ;;  %3281 = vmatprep.subr.bf16.mxu0 %v11660_v15  ;;  %v9363_v30 = vld [vmem:[%s10832_s1 + $0x308] ss:$16 sps:$4 sm:$0xff]   ;;  %v9375_v55 = vld [vmem:[%s10832_s1 + $0x6ec] ss:$16 sps:$4 sm:$0xff]  }
 0x351   :  { %3322 = vmatprep.subr.bf16.mxu1 %v11661_v4  ;;  %v9369_v62 = vld [vmem:[%s10832_s1 + $0x508] ss:$16 sps:$4 sm:$0xff]   ;;  %v9381_v15 = vld [vmem:[%s10832_s1 + $0x8ec] ss:$16 sps:$4 sm:$0xff]  }
 0x352   :  { %v9569_v45 = vld [vmem:[%s10832_s1 + $0x808] ss:$16 sps:$4 sm:$0xff]  }
 0x353   :  { %3282 = vmatpush1.bf16.msra.mxu0 %v11662_v24  ;;  %11700 = vst [vmem:[#allocation18_spill] sm:$0xff] %v9569_v45 }
 0x354   :  { %3323 = vmatpush1.bf16.msra.mxu1 %v11663_v36  ;;  %3283 = vmatprep.subr.bf16.mxu0 %v11664_v28  ;;  %v9391_v28 = vld [vmem:[%s10832_s1 + $0x6e8] ss:$16 sps:$4 sm:$0xff]  }
 0x355   :  { %3324 = vmatprep.subr.bf16.mxu1 %v11665_v25  ;;  %v9397_v25 = vld [vmem:[%s10832_s1 + $0x8e8] ss:$16 sps:$4 sm:$0xff]  }
 0x357   :  { %3284 = vmatpush1.bf16.msra.mxu0 %v11666_v6 }
 0x358   :  { %3325 = vmatpush1.bf16.msra.mxu1 %v11667_v23  ;;  %3285 = vmatprep.subr.bf16.mxu0 %v11668_v42  ;;  %v9409_v23 = vld [vmem:[%s10832_s1 + $0x8cc] ss:$16 sps:$4 sm:$0xff]  }
 0x359   :  { %3326 = vmatprep.subr.bf16.mxu1 %v11669_v47 }
 0x35b   :  { %3286 = vmatpush1.bf16.msra.mxu0 %v11670_v33 }
 0x35c   :  { %3327 = vmatpush1.bf16.msra.mxu1 %v11671_v48  ;;  %3287 = vmatprep.subr.bf16.mxu0 %v11672_v51  ;;  %v9419_v48 = vld [vmem:[%s10832_s1 + $0x6c8] ss:$16 sps:$4 sm:$0xff]  }
 0x35d   :  { %3328 = vmatprep.subr.bf16.mxu1 %v11673_v13  ;;  %v9425_v51 = vld [vmem:[%s10832_s1 + $0x8c8] ss:$16 sps:$4 sm:$0xff]  }
 0x35f   :  { %3288 = vmatpush1.bf16.msra.mxu0 %v11674_v0  ;;  %v9437_v0 = vld [vmem:[%s10832_s1 + $0x8ac] ss:$16 sps:$4 sm:$0xff]  }
 0x360   :  { %3329 = vmatpush1.bf16.msra.mxu1 %v11675_v57  ;;  %3289 = vmatprep.subr.bf16.mxu0 %v11676_v26  ;;  %v9443_v57 = vld [vmem:[%s10832_s1 + $0x6a8] ss:$16 sps:$4 sm:$0xff]  }
 0x361   :  { %3330 = vmatprep.subr.bf16.mxu1 %v11677_v2  ;;  %v9449_v26 = vld [vmem:[%s10832_s1 + $0x8a8] ss:$16 sps:$4 sm:$0xff]   ;;  %v9455_v2 = vld [vmem:[%s10832_s1 + $0x68c] ss:$16 sps:$4 sm:$0xff]  }
 0x363   :  { %3290 = vmatpush2.bf16.msra.mxu0 %v11678_v3  ;;  %v9461_v3 = vld [vmem:[%s10832_s1 + $0x88c] ss:$16 sps:$4 sm:$0xff]  }
 0x364   :  { %3331 = vmatpush2.bf16.msra.mxu1 %v11679_v37  ;;  %3291 = vmatprep.subr.bf16.mxu0 %v11680_v5  ;;  %v9467_v37 = vld [vmem:[%s10832_s1 + $0x688] ss:$16 sps:$4 sm:$0xff]  }
 0x365   :  { %3332 = vmatprep.subr.bf16.mxu1 %v11681_v7  ;;  %v9473_v5 = vld [vmem:[%s10832_s1 + $0x888] ss:$16 sps:$4 sm:$0xff]   ;;  %v9479_v7 = vld [vmem:[%s10832_s1 + $0x66c] ss:$16 sps:$4 sm:$0xff]  }
 0x367   :  { %3292 = vmatpush2.bf16.msra.mxu0 %v11682_v39  ;;  %v9485_v39 = vld [vmem:[%s10832_s1 + $0x86c] ss:$16 sps:$4 sm:$0xff]  }
 0x368   :  { %3333 = vmatpush2.bf16.msra.mxu1 %v11683_v8  ;;  %3293 = vmatprep.subr.bf16.mxu0 %v11684_v12  ;;  %v9491_v8 = vld [vmem:[%s10832_s1 + $0x668] ss:$16 sps:$4 sm:$0xff]  }
 0x369   :  { %3334 = vmatprep.subr.bf16.mxu1 %v11685_v14  ;;  %v9497_v12 = vld [vmem:[%s10832_s1 + $0x868] ss:$16 sps:$4 sm:$0xff]   ;;  %v9503_v14 = vld [vmem:[%s10832_s1 + $0x64c] ss:$16 sps:$4 sm:$0xff]  }
 0x36a   :  { %11688 = vst [vmem:[#allocation6_spill] sm:$0xff] %v9497_v12  ;;  %11689 = vst [vmem:[#allocation7_spill] sm:$0xff] %v9503_v14 }
 0x36b   :  { %3294 = vmatpush2.bf16.msra.mxu0 %v11686_v44  ;;  %v9509_v44 = vld [vmem:[%s10832_s1 + $0x84c] ss:$16 sps:$4 sm:$0xff]  }
 0x36c   :  { %3335 = vmatpush2.bf16.msra.mxu1 %v11687_v16  ;;  %3295 = vmatprep.subr.bf16.mxu0 %v8813_v17  ;;  %v9309_v17 = vld [vmem:[%s10832_s1 + $0x54c] ss:$16 sps:$4 sm:$0xff]   ;;  %11690 = vst [vmem:[#allocation8_spill] sm:$0xff] %v9509_v44  ;;  %v9515_v16 = vld [vmem:[%s10832_s1 + $0x648] ss:$16 sps:$4 sm:$0xff]  }
 0x36d   :  { %3336 = vmatprep.subr.bf16.mxu1 %v8819_v61  ;;  %v9291_v61 = vld [vmem:[%s10832_s1 + $0x368] ss:$16 sps:$4 sm:$0xff]   ;;  %11691 = vst [vmem:[#allocation9_spill] sm:$0xff] %v9515_v16 }
 0x36f   :  { %3296 = vmatpush2.bf16.msra.mxu0 %v8825_v29  ;;  %v9297_v29 = vld [vmem:[%s10832_s1 + $0x568] ss:$16 sps:$4 sm:$0xff]  }
 0x370   :  { %3337 = vmatpush2.bf16.msra.mxu1 %v8831_v22  ;;  %3297 = vmatprep.subr.bf16.mxu0 %v9279_v11  ;;  %v9303_v22 = vld [vmem:[%s10832_s1 + $0x34c] ss:$16 sps:$4 sm:$0xff]  }
 0x371   :  { %3338 = vmatprep.subr.bf16.mxu1 %v9285_v40 }
 0x373   :  { %3298 = vmatpush2.bf16.msra.mxu0 %v9291_v61 }
 0x374   :  { %3339 = vmatpush2.bf16.msra.mxu1 %v9297_v29  ;;  %3299 = vmatprep.subr.bf16.mxu0 %v9303_v22 }
 0x375   :  { %3340 = vmatprep.subr.bf16.mxu1 %v9309_v17 }
 0x377   :  { %3300 = vmatpush2.bf16.msra.mxu0 %v9315_v21 }
 0x378   :  { %3341 = vmatpush2.bf16.msra.mxu1 %v9321_v18  ;;  %3301 = vmatprep.subr.bf16.mxu0 %v9327_v63 }
 0x379   :  { %3342 = vmatprep.subr.bf16.mxu1 %v9333_v50 }
 0x37b   :  { %3302 = vmatpush2.bf16.msra.mxu0 %v9339_v20 }
 0x37c   :  { %3343 = vmatpush2.bf16.msra.mxu1 %v9345_v9  ;;  %3303 = vmatprep.subr.bf16.mxu0 %v9351_v43 }
 0x37d   :  { %3344 = vmatprep.subr.bf16.mxu1 %v9357_v34 }
 0x37f   :  { %3304 = vmatpush2.bf16.msra.mxu0 %v9363_v30 }
 0x380   :  { %3345 = vmatpush2.bf16.msra.mxu1 %v9369_v62  ;;  %3355 = vmatprep.subr.bf16.mxu0 %v9375_v55 }
 0x381   :  { %3396 = vmatprep.subr.bf16.mxu1 %v9381_v15 }
 0x382   :  { %v3061_v4 = vpop.f32.mrf.mxu0  ;;  %3306 = vmatmul.mubr.bf16.vlgmr.msra.gmra.mxu0 %v9028_v32 }
 0x383   :  { %v3102_v24 = vpop.f32.mrf.mxu1  ;;  %3347 = vmatmul.mubr.bf16.vlgmr.msra.gmra.mxu1 %v9114_v19  ;;  %3356 = vmatpush1.bf16.msra.mxu0 %v9391_v28  ;;  %v9403_v19 = vld [vmem:[%s10832_s1 + $0x6cc] ss:$16 sps:$4 sm:$0xff]  }
 0x384   :  { %v9386_v36 = vadd.f32 %v3102_v24, %v3061_v4  ;;  %3397 = vmatpush1.bf16.msra.mxu1 %v9397_v25  ;;  %v3063_v6 = vpop.f32.mrf.mxu0  ;;  %3357 = vmatprep.subr.bf16.mxu0 %v9403_v19  ;;  %v9521_v4 = vld [vmem:[%s10832_s1 + $0x848] ss:$16 sps:$4 sm:$0xff]   ;;  %v9527_v24 = vld [vmem:[%s10832_s1 + $0x62c] ss:$16 sps:$4 sm:$0xff]  }
 0x385   :  { %v3104_v32 = vpop.f32.mrf.mxu1  ;;  %3398 = vmatprep.subr.bf16.mxu1 %v9409_v23  ;;  %3387 = vmatprep.mubr.bf16.mxu0 %v9036_v41  ;;  %11692 = vst [vmem:[#allocation10_spill] sm:$0xff] %v9521_v4  ;;  %11693 = vst [vmem:[#allocation11_spill] sm:$0xff] %v9527_v24 }
 0x386   :  { %v9412_v42 = vadd.f32 %v3104_v32, %v3063_v6  ;;  %3428 = vmatprep.mubr.bf16.mxu1 %v9136_v60  ;;  %v3065_v47 = vpop.f32.mrf.mxu0  ;;  %v9431_v60 = vld [vmem:[%s10832_s1 + $0x6ac] ss:$16 sps:$4 sm:$0xff]   ;;  %v9539_v32 = vld [vmem:[%s10832_s1 + $0x628] ss:$16 sps:$4 sm:$0xff]  }
 0x387   :  { %v3106_v33 = vpop.f32.mrf.mxu1  ;;  %3358 = vmatpush1.bf16.msra.mxu0 %v9419_v48  ;;  %v9533_v6 = vld [vmem:[%s10832_s1 + $0x82c] ss:$16 sps:$4 sm:$0xff]   ;;  %11695 = vst [vmem:[#allocation13_spill] sm:$0xff] %v9539_v32  ;;  %v9545_v47 = vld [vmem:[%s10832_s1 + $0x828] ss:$16 sps:$4 sm:$0xff]  }
 0x388   :  { %3399 = vmatpush1.bf16.msra.mxu1 %v9425_v51  ;;  %v3066_v13 = vpop.f32.mrf.mxu0  ;;  %3359 = vmatprep.subr.bf16.mxu0 %v9431_v60  ;;  %11694 = vst [vmem:[#allocation12_spill] sm:$0xff] %v9533_v6  ;;  %11696 = vst [vmem:[#allocation14_spill] sm:$0xff] %v9545_v47  ;;  %v9551_v33 = vld [vmem:[%s10832_s1 + $0x60c] ss:$16 sps:$4 sm:$0xff]  }
 0x389   :  { %v3107_v41 = vpop.f32.mrf.mxu1  ;;  %3400 = vmatprep.subr.bf16.mxu1 %v9437_v0  ;;  %11697 = vst [vmem:[#allocation15_spill] sm:$0xff] %v9551_v33  ;;  %v9557_v13 = vld [vmem:[%s10832_s1 + $0x80c] ss:$16 sps:$4 sm:$0xff]  }
 0x38a   :  { %11698 = vst [vmem:[#allocation16_spill] sm:$0xff] %v9557_v13  ;;  %v9563_v41 = vld [vmem:[%s10832_s1 + $0x608] ss:$16 sps:$4 sm:$0xff]  }
 0x38b   :  { %3360 = vmatpush1.bf16.msra.mxu0 %v9443_v57  ;;  %11699 = vst [vmem:[#allocation17_spill] sm:$0xff] %v9563_v41 }
 0x38c   :  { %3401 = vmatpush1.bf16.msra.mxu1 %v9449_v26  ;;  %3361 = vmatprep.subr.bf16.mxu0 %v9455_v2 }
 0x38d   :  { %3402 = vmatprep.subr.bf16.mxu1 %v9461_v3 }
 0x38f   :  { %3362 = vmatpush1.bf16.msra.mxu0 %v9467_v37 }
 0x390   :  { %3403 = vmatpush1.bf16.msra.mxu1 %v9473_v5  ;;  %3363 = vmatprep.subr.bf16.mxu0 %v9479_v7 }
 0x391   :  { %3404 = vmatprep.subr.bf16.mxu1 %v9485_v39 }
 0x393   :  { %3364 = vmatpush1.bf16.msra.mxu0 %v9491_v8 }
 0x394   :  { %3405 = vmatpush1.bf16.msra.mxu1 %v9497_v12  ;;  %3365 = vmatprep.subr.bf16.mxu0 %v9503_v14 }
 0x395   :  { %3406 = vmatprep.subr.bf16.mxu1 %v9509_v44 }
 0x397   :  { %3366 = vmatpush1.bf16.msra.mxu0 %v9515_v16  ;;  %v5771_v16 = vld [vmem:[%s10832_s1 + $0x4c4] ss:$16 sps:$4 sm:$0xff]  }
 0x398   :  { %3407 = vmatpush1.bf16.msra.mxu1 %v9521_v4  ;;  %3367 = vmatprep.subr.bf16.mxu0 %v9527_v24 }
 0x399   :  { %3408 = vmatprep.subr.bf16.mxu1 %v9533_v6 }
 0x39b   :  { %3368 = vmatpush1.bf16.msra.mxu0 %v9539_v32 }
 0x39c   :  { %3409 = vmatpush1.bf16.msra.mxu1 %v9545_v47  ;;  %3369 = vmatprep.subr.bf16.mxu0 %v9551_v33  ;;  %v9760_v33 = vld [vmem:[%s10832_s1 + $0x90c] ss:$16 sps:$4 sm:$0xff]  }
 0x39d   :  { %3410 = vmatprep.subr.bf16.mxu1 %v9557_v13  ;;  %v9734_v13 = vld [vmem:[%s10832_s1 + $0x92c] ss:$16 sps:$4 sm:$0xff]   ;;  %11730 = vst [vmem:[#allocation47_spill] sm:$0xff] %v9760_v33 }
 0x39e   :  { %11726 = vst [vmem:[#allocation44_spill] sm:$0xff] %v9734_v13 }
 0x39f   :  { %3370 = vmatpush1.bf16.msra.mxu0 %v9563_v41  ;;  %v9706_v41 = vld [vmem:[%s10832_s1 + $0x94c] ss:$16 sps:$4 sm:$0xff]  }
 0x3a0   :  { %3411 = vmatpush1.bf16.msra.mxu1 %v9569_v45  ;;  %3371 = vmatprep.subr.bf16.mxu0 %v9575_v1  ;;  %v9593_v45 = vld [vmem:[%s10832_s1 + $0x9e8] ss:$16 sps:$4 sm:$0xff]   ;;  %v9599_v1 = vld [vmem:[%s10832_s1 + $0x7cc] ss:$16 sps:$4 sm:$0xff]   ;;  %11722 = vst [vmem:[#allocation40_spill] sm:$0xff] %v9706_v41 }
 0x3a1   :  { %3412 = vmatprep.subr.bf16.mxu1 %v9581_v35  ;;  %11704 = vst [vmem:[#allocation22_spill] sm:$0xff] %v9593_v45  ;;  %11705 = vst [vmem:[#allocation23_spill] sm:$0xff] %v9599_v1  ;;  %v9605_v35 = vld [vmem:[%s10832_s1 + $0x9cc] ss:$16 sps:$4 sm:$0xff]  }
 0x3a2   :  { %11706 = vst [vmem:[#allocation24_spill] sm:$0xff] %v9605_v35 }
 0x3a3   :  { %3372 = vmatpush2.bf16.msra.mxu0 %v9587_v53  ;;  %v9611_v53 = vld [vmem:[%s10832_s1 + $0x7c8] ss:$16 sps:$4 sm:$0xff]  }
 0x3a4   :  { %3413 = vmatpush2.bf16.msra.mxu1 %v9593_v45  ;;  %3373 = vmatprep.subr.bf16.mxu0 %v9599_v1  ;;  %11707 = vst [vmem:[#allocation25_spill] sm:$0xff] %v9611_v53  ;;  %v9617_v45 = vld [vmem:[%s10832_s1 + $0x9c8] ss:$16 sps:$4 sm:$0xff]   ;;  %v9623_v1 = vld [vmem:[%s10832_s1 + $0x7ac] ss:$16 sps:$4 sm:$0xff]  }
 0x3a5   :  { %3414 = vmatprep.subr.bf16.mxu1 %v9605_v35  ;;  %11708 = vst [vmem:[#allocation26_spill] sm:$0xff] %v9617_v45  ;;  %11709 = vst [vmem:[#allocation27_spill] sm:$0xff] %v9623_v1  ;;  %v9629_v35 = vld [vmem:[%s10832_s1 + $0x9ac] ss:$16 sps:$4 sm:$0xff]  }
 0x3a6   :  { %11710 = vst [vmem:[#allocation28_spill] sm:$0xff] %v9629_v35 }
 0x3a7   :  { %3374 = vmatpush2.bf16.msra.mxu0 %v9611_v53  ;;  %v9635_v53 = vld [vmem:[%s10832_s1 + $0x7a8] ss:$16 sps:$4 sm:$0xff]  }
 0x3a8   :  { %3415 = vmatpush2.bf16.msra.mxu1 %v9617_v45  ;;  %3375 = vmatprep.subr.bf16.mxu0 %v9623_v1  ;;  %11711 = vst [vmem:[#allocation29_spill] sm:$0xff] %v9635_v53  ;;  %v9641_v45 = vld [vmem:[%s10832_s1 + $0x9a8] ss:$16 sps:$4 sm:$0xff]   ;;  %v9647_v1 = vld [vmem:[%s10832_s1 + $0x78c] ss:$16 sps:$4 sm:$0xff]  }
 0x3a9   :  { %3416 = vmatprep.subr.bf16.mxu1 %v9629_v35  ;;  %11712 = vst [vmem:[#allocation30_spill] sm:$0xff] %v9641_v45  ;;  %11713 = vst [vmem:[#allocation31_spill] sm:$0xff] %v9647_v1  ;;  %v9653_v35 = vld [vmem:[%s10832_s1 + $0x98c] ss:$16 sps:$4 sm:$0xff]  }
 0x3aa   :  { %11714 = vst [vmem:[#allocation32_spill] sm:$0xff] %v9653_v35 }
 0x3ab   :  { %3376 = vmatpush2.bf16.msra.mxu0 %v9635_v53  ;;  %v9659_v53 = vld [vmem:[%s10832_s1 + $0x788] ss:$16 sps:$4 sm:$0xff]  }
 0x3ac   :  { %3417 = vmatpush2.bf16.msra.mxu1 %v9641_v45  ;;  %3377 = vmatprep.subr.bf16.mxu0 %v9647_v1  ;;  %11715 = vst [vmem:[#allocation33_spill] sm:$0xff] %v9659_v53  ;;  %v9665_v45 = vld [vmem:[%s10832_s1 + $0x988] ss:$16 sps:$4 sm:$0xff]   ;;  %v9671_v1 = vld [vmem:[%s10832_s1 + $0x76c] ss:$16 sps:$4 sm:$0xff]  }
 0x3ad   :  { %3418 = vmatprep.subr.bf16.mxu1 %v9653_v35  ;;  %11716 = vst [vmem:[#allocation34_spill] sm:$0xff] %v9665_v45  ;;  %11717 = vst [vmem:[#allocation35_spill] sm:$0xff] %v9671_v1  ;;  %v9677_v35 = vld [vmem:[%s10832_s1 + $0x96c] ss:$16 sps:$4 sm:$0xff]  }
 0x3ae   :  { %11718 = vst [vmem:[#allocation36_spill] sm:$0xff] %v9677_v35 }
 0x3af   :  { %3378 = vmatpush2.bf16.msra.mxu0 %v9659_v53  ;;  %v9683_v53 = vld [vmem:[%s10831_s0 + $0x1e] sm:$0xff] }
 0x3b0   :  { %3419 = vmatpush2.bf16.msra.mxu1 %v9665_v45  ;;  %3379 = vmatprep.subr.bf16.mxu0 %v9671_v1  ;;  %v9688_v45 = vld [vmem:[%s10832_s1 + $0x768] ss:$16 sps:$4 sm:$0xff]  }
 0x3b1   :  { %3420 = vmatprep.subr.bf16.mxu1 %v9677_v35  ;;  %11719 = vst [vmem:[#allocation37_spill] sm:$0xff] %v9688_v45  ;;  %v9694_v1 = vld [vmem:[%s10832_s1 + $0x968] ss:$16 sps:$4 sm:$0xff]   ;;  %v9700_v35 = vld [vmem:[%s10832_s1 + $0x74c] ss:$16 sps:$4 sm:$0xff]  }
 0x3b2   :  { %11720 = vst [vmem:[#allocation38_spill] sm:$0xff] %v9694_v1  ;;  %11721 = vst [vmem:[#allocation39_spill] sm:$0xff] %v9700_v35 }
 0x3b3   :  { %3380 = vmatpush2.bf16.msra.mxu0 %v9688_v45  ;;  %v9711_v45 = vrot.slane %v9683_v53, %v6144_v49 }
 0x3b4   :  { %3421 = vmatpush2.bf16.msra.mxu1 %v9694_v1  ;;  %3381 = vmatprep.subr.bf16.mxu0 %v9700_v35  ;;  %v9716_v1 = vld [vmem:[%s10832_s1 + $0x748] ss:$16 sps:$4 sm:$0xff]  }
 0x3b5   :  { %3422 = vmatprep.subr.bf16.mxu1 %v9706_v41  ;;  %11723 = vst [vmem:[#allocation41_spill] sm:$0xff] %v9716_v1  ;;  %v9722_v35 = vld [vmem:[%s10832_s1 + $0x948] ss:$16 sps:$4 sm:$0xff]   ;;  %v9728_v41 = vld [vmem:[%s10832_s1 + $0x72c] ss:$16 sps:$4 sm:$0xff]  }
 0x3b6   :  { %11724 = vst [vmem:[#allocation42_spill] sm:$0xff] %v9722_v35  ;;  %11725 = vst [vmem:[#allocation43_spill] sm:$0xff] %v9728_v41 }
 0x3b7   :  { %3382 = vmatpush2.bf16.msra.mxu0 %v9716_v1  ;;  %v3460_v1 = vcombine.high %v9711_v45, %v9711_v45 }
 0x3b8   :  { %3423 = vmatpush2.bf16.msra.mxu1 %v9722_v35  ;;  %3383 = vmatprep.subr.bf16.mxu0 %v9728_v41  ;;  %v9742_v35 = vld [vmem:[%s10832_s1 + $0x728] ss:$16 sps:$4 sm:$0xff]  }
 0x3b9   :  { %3424 = vmatprep.subr.bf16.mxu1 %v9734_v13  ;;  %11727 = vst [vmem:[#allocation45_spill] sm:$0xff] %v9742_v35  ;;  %v9748_v41 = vld [vmem:[%s10832_s1 + $0x928] ss:$16 sps:$4 sm:$0xff]   ;;  %v9754_v13 = vld [vmem:[%s10832_s1 + $0x70c] ss:$16 sps:$4 sm:$0xff]  }
 0x3ba   :  { %11728 = vst [vmem:[#allocation172_spill] sm:$0xff] %v9748_v41  ;;  %11729 = vst [vmem:[#allocation46_spill] sm:$0xff] %v9754_v13 }
 0x3bb   :  { %3384 = vmatpush2.bf16.msra.mxu0 %v9742_v35  ;;  %v9764_v35 = vrot.slane %v3460_v1, %v6144_v49  ;;  %v5704_v1 = vld [vmem:[%s10832_s1 + $0x2e4] ss:$16 sps:$4 sm:$0xff]  }
 0x3bc   :  { %3425 = vmatpush2.bf16.msra.mxu1 %v9748_v41  ;;  %3385 = vmatprep.subr.bf16.mxu0 %v9754_v13  ;;  %v9769_v41 = vld [vmem:[%s10832_s1 + $0x708] ss:$16 sps:$4 sm:$0xff]  }
 0x3bd   :  { %3426 = vmatprep.subr.bf16.mxu1 %v9760_v33  ;;  %11731 = vst [vmem:[#allocation48_spill] sm:$0xff] %v9769_v41  ;;  %v9775_v13 = vld [vmem:[%s10832_s1 + $0x908] ss:$16 sps:$4 sm:$0xff]   ;;  %v5703_v33 = vld [vmem:[%s10832_s1 + $0xe4] ss:$16 sps:$4 sm:$0xff]  }
 0x3be   :  { %11732 = vst [vmem:[#allocation49_spill] sm:$0xff] %v9775_v13 }
 0x3bf   :  { %3386 = vmatpush2.bf16.msra.mxu0 %v9769_v41  ;;  %v9786_v41 = vcombine.high %v9764_v35, %v9764_v35 }
 0x3c0   :  { %3427 = vmatpush2.bf16.msra.mxu1 %v9775_v13  ;;  %3526 = vmatprep.subr.bf16.mxu0 %v5703_v33  ;;  %v5705_v33 = vld [vmem:[%s10832_s1 + $0xe0] ss:$16 sps:$4 sm:$0xff]  }
 0x3c1   :  { %3567 = vmatprep.subr.bf16.mxu1 %v5704_v1  ;;  %v5706_v1 = vld [vmem:[%s10832_s1 + $0x2e0] ss:$16 sps:$4 sm:$0xff]  }
 0x3c2   :  { %v3143_v47 = vpop.f32.mrf.mxu0  ;;  %3388 = vmatmul.mubr.bf16.vlgmr.msra.gmra.mxu0 %v9129_v10  ;;  %v5707_v10 = vld [vmem:[%s10832_s1 + $0xc4] ss:$16 sps:$4 sm:$0xff]  }
 0x3c3   :  { %v3184_v32 = vpop.f32.mrf.mxu1  ;;  %3429 = vmatmul.mubr.bf16.vlgmr.msra.gmra.mxu1 %v9210_v58  ;;  %v3144_v13 = vadd.f32 %v3143_v47, %v9386_v36  ;;  %3527 = vmatpush1.bf16.msra.mxu0 %v5705_v33  ;;  %v5708_v58 = vld [vmem:[%s10832_s1 + $0x2c4] ss:$16 sps:$4 sm:$0xff]  }
 0x3c4   :  { %3568 = vmatpush1.bf16.msra.mxu1 %v5706_v1  ;;  %v3145_v6 = vpop.f32.mrf.mxu0  ;;  %3528 = vmatprep.subr.bf16.mxu0 %v5707_v10  ;;  %v5709_v10 = vld [vmem:[%s10832_s1 + $0xc0] ss:$16 sps:$4 sm:$0xff]  }
 0x3c5   :  { %v3186_v24 = vpop.f32.mrf.mxu1  ;;  %3569 = vmatprep.subr.bf16.mxu1 %v5708_v58  ;;  %v9803_v36 = vadd.f32 %v3184_v32, %v3144_v13  ;;  %v3146_v47 = vadd.f32 %v3145_v6, %v9412_v42  ;;  %3558 = vmatprep.mubr.bf16.mxu0 %v9764_v35  ;;  %v5710_v32 = vld [vmem:[%s10832_s1 + $0x2c0] ss:$16 sps:$4 sm:$0xff]   ;;  %v5711_v6 = vld [vmem:[%s10832_s1 + $0xa4] ss:$16 sps:$4 sm:$0xff]  }
 0x3c6   :  { %3599 = vmatprep.mubr.bf16.mxu1 %v9786_v41  ;;  %v3147_v33 = vpop.f32.mrf.mxu0  ;;  %v5713_v58 = vld [vmem:[%s10832_s1 + $0xa0] ss:$16 sps:$4 sm:$0xff]  }
 0x3c7   :  { %v3188_v1 = vpop.f32.mrf.mxu1  ;;  %v9808_v4 = vadd.f32 %v3186_v24, %v3146_v47  ;;  %3529 = vmatpush1.bf16.msra.mxu0 %v5709_v10  ;;  %v5712_v24 = vld [vmem:[%s10832_s1 + $0x2a4] ss:$16 sps:$4 sm:$0xff]   ;;  %v5714_v47 = vld [vmem:[%s10832_s1 + $0x2a0] ss:$16 sps:$4 sm:$0xff]  }
 0x3c8   :  { %3570 = vmatpush1.bf16.msra.mxu1 %v5710_v32  ;;  %v3148_v13 = vpop.f32.mrf.mxu0  ;;  %3530 = vmatprep.subr.bf16.mxu0 %v5711_v6  ;;  %v5715_v33 = vld [vmem:[%s10832_s1 + $0x84] ss:$16 sps:$4 sm:$0xff]   ;;  %v5717_v10 = vld [vmem:[%s10832_s1 + $0x80] ss:$16 sps:$4 sm:$0xff]  }
 0x3c9   :  { %v3189_v42 = vpop.f32.mrf.mxu1  ;;  %3571 = vmatprep.subr.bf16.mxu1 %v5712_v24  ;;  %v5716_v1 = vld [vmem:[%s10832_s1 + $0x284] ss:$16 sps:$4 sm:$0xff]   ;;  %v5718_v32 = vld [vmem:[%s10832_s1 + $0x280] ss:$16 sps:$4 sm:$0xff]  }
 0x3ca   :  { %v5719_v13 = vld [vmem:[%s10832_s1 + $0x64] ss:$16 sps:$4 sm:$0xff]   ;;  %v5721_v6 = vld [vmem:[%s10832_s1 + $0x60] ss:$16 sps:$4 sm:$0xff]  }
 0x3cb   :  { %3531 = vmatpush1.bf16.msra.mxu0 %v5713_v58  ;;  %v5720_v42 = vld [vmem:[%s10832_s1 + $0x264] ss:$16 sps:$4 sm:$0xff]   ;;  %v5722_v24 = vld [vmem:[%s10832_s1 + $0x260] ss:$16 sps:$4 sm:$0xff]  }
 0x3cc   :  { %3572 = vmatpush1.bf16.msra.mxu1 %v5714_v47  ;;  %3532 = vmatprep.subr.bf16.mxu0 %v5715_v33  ;;  %v5723_v58 = vld [vmem:[%s10832_s1 + $0x44] ss:$16 sps:$4 sm:$0xff]   ;;  %v5725_v33 = vld [vmem:[%s10832_s1 + $0x40] ss:$16 sps:$4 sm:$0xff]  }
 0x3cd   :  { %3573 = vmatprep.subr.bf16.mxu1 %v5716_v1  ;;  %v5724_v47 = vld [vmem:[%s10832_s1 + $0x244] ss:$16 sps:$4 sm:$0xff]   ;;  %v5726_v1 = vld [vmem:[%s10832_s1 + $0x240] ss:$16 sps:$4 sm:$0xff]  }
 0x3cf   :  { %3533 = vmatpush1.bf16.msra.mxu0 %v5717_v10  ;;  %v5727_v10 = vld [vmem:[%s10832_s1 + $0x24] ss:$16 sps:$4 sm:$0xff]  }
 0x3d0   :  { %3574 = vmatpush1.bf16.msra.mxu1 %v5718_v32  ;;  %3534 = vmatprep.subr.bf16.mxu0 %v5719_v13  ;;  %v5728_v32 = vld [vmem:[%s10832_s1 + $0x224] ss:$16 sps:$4 sm:$0xff]   ;;  %v5729_v13 = vld [vmem:[%s10832_s1 + $0x20] ss:$16 sps:$4 sm:$0xff]  }
 0x3d1   :  { %3575 = vmatprep.subr.bf16.mxu1 %v5720_v42  ;;  %v5730_v42 = vld [vmem:[%s10832_s1 + $0x220] ss:$16 sps:$4 sm:$0xff]  }
 0x3d3   :  { %3535 = vmatpush1.bf16.msra.mxu0 %v5721_v6  ;;  %v5731_v6 = vld [vmem:[%s10832_s1 + $0x4] ss:$16 sps:$4 sm:$0xff]  }
 0x3d4   :  { %3576 = vmatpush1.bf16.msra.mxu1 %v5722_v24  ;;  %3536 = vmatprep.subr.bf16.mxu0 %v5723_v58  ;;  %v5732_v24 = vld [vmem:[%s10832_s1 + $0x204] ss:$16 sps:$4 sm:$0xff]   ;;  %v5733_v58 = vld [vmem:[%s10832_s1] ss:$16 sps:$4 sm:$0xff]  }
 0x3d5   :  { %3577 = vmatprep.subr.bf16.mxu1 %v5724_v47  ;;  %v5734_v47 = vld [vmem:[%s10832_s1 + $0x200] ss:$16 sps:$4 sm:$0xff]  }
 0x3d7   :  { %3537 = vmatpush1.bf16.msra.mxu0 %v5725_v33  ;;  %v5735_v33 = vld [vmem:[%s10832_s1 + $0x1e4] ss:$16 sps:$4 sm:$0xff]  }
 0x3d8   :  { %3578 = vmatpush1.bf16.msra.mxu1 %v5726_v1  ;;  %3538 = vmatprep.subr.bf16.mxu0 %v5727_v10  ;;  %v5736_v1 = vld [vmem:[%s10832_s1 + $0x3e4] ss:$16 sps:$4 sm:$0xff]   ;;  %v5737_v10 = vld [vmem:[%s10832_s1 + $0x1e0] ss:$16 sps:$4 sm:$0xff]  }
 0x3d9   :  { %3579 = vmatprep.subr.bf16.mxu1 %v5728_v32  ;;  %v5738_v32 = vld [vmem:[%s10832_s1 + $0x3e0] ss:$16 sps:$4 sm:$0xff]  }
 0x3db   :  { %3539 = vmatpush1.bf16.msra.mxu0 %v5729_v13  ;;  %v5739_v13 = vld [vmem:[%s10832_s1 + $0x1c4] ss:$16 sps:$4 sm:$0xff]  }
 0x3dc   :  { %3580 = vmatpush1.bf16.msra.mxu1 %v5730_v42  ;;  %3540 = vmatprep.subr.bf16.mxu0 %v5731_v6  ;;  %v5740_v42 = vld [vmem:[%s10832_s1 + $0x3c4] ss:$16 sps:$4 sm:$0xff]   ;;  %v5741_v6 = vld [vmem:[%s10832_s1 + $0x1c0] ss:$16 sps:$4 sm:$0xff]  }
 0x3dd   :  { %3581 = vmatprep.subr.bf16.mxu1 %v5732_v24  ;;  %v5742_v24 = vld [vmem:[%s10832_s1 + $0x3c0] ss:$16 sps:$4 sm:$0xff]  }
 0x3df   :  { %3541 = vmatpush1.bf16.msra.mxu0 %v5733_v58  ;;  %v5743_v58 = vld [vmem:[%s10832_s1 + $0x1a4] ss:$16 sps:$4 sm:$0xff]  }
 0x3e0   :  { %3582 = vmatpush1.bf16.msra.mxu1 %v5734_v47  ;;  %3542 = vmatprep.subr.bf16.mxu0 %v5735_v33  ;;  %v5744_v47 = vld [vmem:[%s10832_s1 + $0x3a4] ss:$16 sps:$4 sm:$0xff]   ;;  %v5745_v33 = vld [vmem:[%s10832_s1 + $0x1a0] ss:$16 sps:$4 sm:$0xff]  }
 0x3e1   :  { %3583 = vmatprep.subr.bf16.mxu1 %v5736_v1  ;;  %v5746_v1 = vld [vmem:[%s10832_s1 + $0x3a0] ss:$16 sps:$4 sm:$0xff]  }
 0x3e3   :  { %3543 = vmatpush2.bf16.msra.mxu0 %v5737_v10  ;;  %v5747_v10 = vld [vmem:[%s10832_s1 + $0x184] ss:$16 sps:$4 sm:$0xff]  }
 0x3e4   :  { %3584 = vmatpush2.bf16.msra.mxu1 %v5738_v32  ;;  %3544 = vmatprep.subr.bf16.mxu0 %v5739_v13  ;;  %v5748_v32 = vld [vmem:[%s10832_s1 + $0x384] ss:$16 sps:$4 sm:$0xff]   ;;  %v5749_v13 = vld [vmem:[%s10832_s1 + $0x180] ss:$16 sps:$4 sm:$0xff]  }
 0x3e5   :  { %3585 = vmatprep.subr.bf16.mxu1 %v5740_v42  ;;  %v5750_v42 = vld [vmem:[%s10832_s1 + $0x380] ss:$16 sps:$4 sm:$0xff]  }
 0x3e7   :  { %3545 = vmatpush2.bf16.msra.mxu0 %v5741_v6  ;;  %v5751_v6 = vld [vmem:[%s10832_s1 + $0x164] ss:$16 sps:$4 sm:$0xff]  }
 0x3e8   :  { %3586 = vmatpush2.bf16.msra.mxu1 %v5742_v24  ;;  %3546 = vmatprep.subr.bf16.mxu0 %v5743_v58  ;;  %v5752_v24 = vld [vmem:[%s10832_s1 + $0x364] ss:$16 sps:$4 sm:$0xff]   ;;  %v3445_v58 = vcombine.high %v9683_v53, %v9683_v53 }
 0x3e9   :  { %3587 = vmatprep.subr.bf16.mxu1 %v5744_v47  ;;  %v5753_v47 = vld [vmem:[%s10832_s1 + $0x160] ss:$16 sps:$4 sm:$0xff]  }
 0x3ea   :  { %v9957_v53 = vrot.slane %v3445_v58, %v6144_v49  ;;  %v9975_v58 = vrot.slane %v9711_v45, %v6144_v49  ;;  %v5764_v45 = vld [vmem:[%s10832_s1 + $0x304] ss:$16 sps:$4 sm:$0xff]  }
 0x3eb   :  { %3547 = vmatpush2.bf16.msra.mxu0 %v5745_v33  ;;  %v5754_v33 = vld [vmem:[%s10832_s1 + $0x360] ss:$16 sps:$4 sm:$0xff]  }
 0x3ec   :  { %3588 = vmatpush2.bf16.msra.mxu1 %v5746_v1  ;;  %3548 = vmatprep.subr.bf16.mxu0 %v5747_v10  ;;  %v5755_v1 = vld [vmem:[%s10832_s1 + $0x144] ss:$16 sps:$4 sm:$0xff]  }
 0x3ed   :  { %3589 = vmatprep.subr.bf16.mxu1 %v5748_v32  ;;  %v5756_v10 = vld [vmem:[%s10832_s1 + $0x344] ss:$16 sps:$4 sm:$0xff]   ;;  %v5757_v32 = vld [vmem:[%s10832_s1 + $0x140] ss:$16 sps:$4 sm:$0xff]  }
 0x3ef   :  { %3549 = vmatpush2.bf16.msra.mxu0 %v5749_v13  ;;  %v5758_v13 = vld [vmem:[%s10832_s1 + $0x340] ss:$16 sps:$4 sm:$0xff]  }
 0x3f0   :  { %3590 = vmatpush2.bf16.msra.mxu1 %v5750_v42  ;;  %3550 = vmatprep.subr.bf16.mxu0 %v5751_v6  ;;  %v5759_v42 = vld [vmem:[%s10832_s1 + $0x124] ss:$16 sps:$4 sm:$0xff]  }
 0x3f1   :  { %3591 = vmatprep.subr.bf16.mxu1 %v5752_v24  ;;  %v5760_v6 = vld [vmem:[%s10832_s1 + $0x324] ss:$16 sps:$4 sm:$0xff]   ;;  %v3461_v24 = vcombine.high %v9957_v53, %v9957_v53 }
 0x3f3   :  { %3551 = vmatpush2.bf16.msra.mxu0 %v5753_v47  ;;  %v5761_v47 = vld [vmem:[%s10832_s1 + $0x120] ss:$16 sps:$4 sm:$0xff]  }
 0x3f4   :  { %3592 = vmatpush2.bf16.msra.mxu1 %v5754_v33  ;;  %3552 = vmatprep.subr.bf16.mxu0 %v5755_v1  ;;  %v5762_v33 = vld [vmem:[%s10832_s1 + $0x320] ss:$16 sps:$4 sm:$0xff]   ;;  %v5763_v1 = vld [vmem:[%s10832_s1 + $0x104] ss:$16 sps:$4 sm:$0xff]  }
 0x3f5   :  { %3593 = vmatprep.subr.bf16.mxu1 %v5756_v10  ;;  %v9990_v10 = vrot.slane %v3461_v24, %v6144_v49  ;;  %v5768_v24 = vld [vmem:[%s10832_s1 + $0x6e4] ss:$16 sps:$4 sm:$0xff]  }
 0x3f7   :  { %3553 = vmatpush2.bf16.msra.mxu0 %v5757_v32  ;;  %v9994_v32 = vcombine.high %v9975_v58, %v9975_v58 }
 0x3f8   :  { %3594 = vmatpush2.bf16.msra.mxu1 %v5758_v13  ;;  %3554 = vmatprep.subr.bf16.mxu0 %v5759_v42  ;;  %v5765_v13 = vld [vmem:[%s10832_s1 + $0x100] ss:$16 sps:$4 sm:$0xff]  }
 0x3f9   :  { %3595 = vmatprep.subr.bf16.mxu1 %v5760_v6  ;;  %v5766_v42 = vld [vmem:[%s10832_s1 + $0x300] ss:$16 sps:$4 sm:$0xff]   ;;  %v5767_v6 = vld [vmem:[%s10832_s1 + $0x4e4] ss:$16 sps:$4 sm:$0xff]  }
 0x3fb   :  { %3555 = vmatpush2.bf16.msra.mxu0 %v5761_v47  ;;  %v10010_v47 = vcombine.high %v9990_v10, %v9990_v10 }
 0x3fc   :  { %3596 = vmatpush2.bf16.msra.mxu1 %v5762_v33  ;;  %3556 = vmatprep.subr.bf16.mxu0 %v5763_v1 }
 0x3fd   :  { %3597 = vmatprep.subr.bf16.mxu1 %v5764_v45 }
 0x3ff   :  { %3557 = vmatpush2.bf16.msra.mxu0 %v5765_v13  ;;  %v5769_v13 = vld [vmem:[%s10832_s1 + $0x4e0] ss:$16 sps:$4 sm:$0xff]  }
 0x400   :  { %3598 = vmatpush2.bf16.msra.mxu1 %v5766_v42  ;;  %3608 = vmatprep.subr.bf16.mxu0 %v5767_v6  ;;  %v5770_v42 = vld [vmem:[%s10832_s1 + $0x6e0] ss:$16 sps:$4 sm:$0xff]  }
 0x401   :  { %3649 = vmatprep.subr.bf16.mxu1 %v5768_v24 }
 0x402   :  { %v3225_v33 = vpop.f32.mrf.mxu0  ;;  %3559 = vmatmul.mubr.bf16.vlgmr.msra.gmra.mxu0 %v9975_v58 }
 0x403   :  { %v10012_v1 = vpop.f32.mrf.mxu1  ;;  %3600 = vmatmul.mubr.bf16.vlgmr.msra.gmra.mxu1 %v9994_v32  ;;  %v3226_v45 = vadd.f32 %v3225_v33, %v9803_v36  ;;  %3609 = vmatpush1.bf16.msra.mxu0 %v5769_v13  ;;  %v5772_v36 = vld [vmem:[%s10832_s1 + $0x6c4] ss:$16 sps:$4 sm:$0xff]   ;;  %v11733_v33 = vmax.f32 %v11530_v52, %v9043_v46  ;;  %v5774_v46 = vld [vmem:[%s10832_s1 + $0x6c0] ss:$16 sps:$4 sm:$0xff]  }
 0x404   :  { %3650 = vmatpush1.bf16.msra.mxu1 %v5770_v42  ;;  %v3227_v6 = vpop.f32.mrf.mxu0  ;;  %3610 = vmatprep.subr.bf16.mxu0 %v5771_v16  ;;  %v11734_v16 = vmax.f32 %v11531_v56, %v9054_v54  ;;  %v5776_v54 = vld [vmem:[%s10832_s1 + $0x6a4] ss:$16 sps:$4 sm:$0xff]   ;;  %v5777_v56 = vld [vmem:[%s10832_s1 + $0x4a0] ss:$16 sps:$4 sm:$0xff]  }
 0x405   :  { %v10023_v24 = vpop.f32.mrf.mxu1  ;;  %3651 = vmatprep.subr.bf16.mxu1 %v5772_v36  ;;  %v10034_v13 = vmax.f32 %v11733_v33, %v3226_v45  ;;  %v3228_v42 = vadd.f32 %v3227_v6, %v9808_v4  ;;  %3640 = vmatprep.mubr.bf16.mxu0 %v9990_v10  ;;  %v5773_v36 = vld [vmem:[%s10832_s1 + $0x4c0] ss:$16 sps:$4 sm:$0xff]   ;;  %v5779_v45 = vld [vmem:[%s10832_s1 + $0x484] ss:$16 sps:$4 sm:$0xff]  }
 0x406   :  { %3681 = vmatprep.mubr.bf16.mxu1 %v10010_v47  ;;  %v3229_v44 = vpop.f32.mrf.mxu0  ;;  %v5780_v6 = vld [vmem:[%s10832_s1 + $0x684] ss:$16 sps:$4 sm:$0xff]   ;;  %v5781_v33 = vld [vmem:[%s10832_s1 + $0x480] ss:$16 sps:$4 sm:$0xff]  }
 0x407   :  { %v3270_v14 = vpop.f32.mrf.mxu1  ;;  %v10042_v12 = vmax.f32 %v11734_v16, %v3228_v42  ;;  %3611 = vmatpush1.bf16.msra.mxu0 %v5773_v36  ;;  %v5778_v44 = vld [vmem:[%s10832_s1 + $0x6a0] ss:$16 sps:$4 sm:$0xff]   ;;  %v5783_v16 = vld [vmem:[%s10832_s1 + $0x464] ss:$16 sps:$4 sm:$0xff]  }
 0x408   :  { %3652 = vmatpush1.bf16.msra.mxu1 %v5774_v46  ;;  %v3230_v52 = vpop.f32.mrf.mxu0  ;;  %v5775_v14 = vld [vmem:[%s10832_s1 + $0x4a4] ss:$16 sps:$4 sm:$0xff]   ;;  %v5782_v42 = vld [vmem:[%s10832_s1 + $0x680] ss:$16 sps:$4 sm:$0xff]  }
 0x409   :  { %v3271_v4 = vpop.f32.mrf.mxu1  ;;  %3612 = vmatprep.subr.bf16.mxu0 %v5775_v14  ;;  %3653 = vmatprep.subr.bf16.mxu1 %v5776_v54  ;;  %v5784_v36 = vld [vmem:[%s10832_s1 + $0x664] ss:$16 sps:$4 sm:$0xff]   ;;  %v5785_v46 = vld [vmem:[%s10832_s1 + $0x460] ss:$16 sps:$4 sm:$0xff]  }
 0x40a   :  { %v5786_v52 = vld [vmem:[%s10832_s1 + $0x660] ss:$16 sps:$4 sm:$0xff]   ;;  %v5787_v4 = vld [vmem:[%s10832_s1 + $0x444] ss:$16 sps:$4 sm:$0xff]  }
 0x40b   :  { %3613 = vmatpush1.bf16.msra.mxu0 %v5777_v56  ;;  %v5788_v14 = vld [vmem:[%s10832_s1 + $0x644] ss:$16 sps:$4 sm:$0xff]   ;;  %v5789_v54 = vld [vmem:[%s10832_s1 + $0x440] ss:$16 sps:$4 sm:$0xff]  }
 0x40c   :  { %3654 = vmatpush1.bf16.msra.mxu1 %v5778_v44  ;;  %3614 = vmatprep.subr.bf16.mxu0 %v5779_v45  ;;  %v5790_v56 = vld [vmem:[%s10832_s1 + $0x640] ss:$16 sps:$4 sm:$0xff]   ;;  %v5791_v44 = vld [vmem:[%s10832_s1 + $0x424] ss:$16 sps:$4 sm:$0xff]  }
 0x40d   :  { %3655 = vmatprep.subr.bf16.mxu1 %v5780_v6  ;;  %v5792_v45 = vld [vmem:[%s10832_s1 + $0x624] ss:$16 sps:$4 sm:$0xff]   ;;  %v5793_v6 = vld [vmem:[%s10832_s1 + $0x420] ss:$16 sps:$4 sm:$0xff]  }
 0x40f   :  { %3615 = vmatpush1.bf16.msra.mxu0 %v5781_v33  ;;  %v5794_v33 = vld [vmem:[%s10832_s1 + $0x620] ss:$16 sps:$4 sm:$0xff]  }
 0x410   :  { %3656 = vmatpush1.bf16.msra.mxu1 %v5782_v42  ;;  %3616 = vmatprep.subr.bf16.mxu0 %v5783_v16  ;;  %v5795_v42 = vld [vmem:[%s10832_s1 + $0x404] ss:$16 sps:$4 sm:$0xff]  }
 0x411   :  { %3657 = vmatprep.subr.bf16.mxu1 %v5784_v36  ;;  %v5796_v16 = vld [vmem:[%s10832_s1 + $0x604] ss:$16 sps:$4 sm:$0xff]   ;;  %v5797_v36 = vld [vmem:[%s10832_s1 + $0x400] ss:$16 sps:$4 sm:$0xff]  }
 0x413   :  { %3617 = vmatpush1.bf16.msra.mxu0 %v5785_v46  ;;  %v5798_v46 = vld [vmem:[%s10832_s1 + $0x600] ss:$16 sps:$4 sm:$0xff]  }
 0x414   :  { %3658 = vmatpush1.bf16.msra.mxu1 %v5786_v52  ;;  %3618 = vmatprep.subr.bf16.mxu0 %v5787_v4  ;;  %v5799_v52 = vld [vmem:[%s10832_s1 + $0x5e4] ss:$16 sps:$4 sm:$0xff]  }
 0x415   :  { %3659 = vmatprep.subr.bf16.mxu1 %v5788_v14  ;;  %v5800_v4 = vld [vmem:[%s10832_s1 + $0x7e4] ss:$16 sps:$4 sm:$0xff]   ;;  %v5801_v14 = vld [vmem:[%s10832_s1 + $0x5e0] ss:$16 sps:$4 sm:$0xff]  }
 0x417   :  { %3619 = vmatpush1.bf16.msra.mxu0 %v5789_v54  ;;  %v5802_v54 = vld [vmem:[%s10832_s1 + $0x7e0] ss:$16 sps:$4 sm:$0xff]  }
 0x418   :  { %3660 = vmatpush1.bf16.msra.mxu1 %v5790_v56  ;;  %3620 = vmatprep.subr.bf16.mxu0 %v5791_v44  ;;  %v5803_v56 = vld [vmem:[%s10832_s1 + $0x5c4] ss:$16 sps:$4 sm:$0xff]  }
 0x419   :  { %3661 = vmatprep.subr.bf16.mxu1 %v5792_v45  ;;  %v5804_v44 = vld [vmem:[%s10832_s1 + $0x7c4] ss:$16 sps:$4 sm:$0xff]   ;;  %v5805_v45 = vld [vmem:[%s10832_s1 + $0x5c0] ss:$16 sps:$4 sm:$0xff]  }
 0x41b   :  { %3621 = vmatpush1.bf16.msra.mxu0 %v5793_v6  ;;  %v5806_v6 = vld [vmem:[%s10832_s1 + $0x7c0] ss:$16 sps:$4 sm:$0xff]  }
 0x41c   :  { %3662 = vmatpush1.bf16.msra.mxu1 %v5794_v33  ;;  %3622 = vmatprep.subr.bf16.mxu0 %v5795_v42  ;;  %v5807_v33 = vld [vmem:[%s10832_s1 + $0x5a4] ss:$16 sps:$4 sm:$0xff]  }
 0x41d   :  { %3663 = vmatprep.subr.bf16.mxu1 %v5796_v16  ;;  %v5808_v42 = vld [vmem:[%s10832_s1 + $0x7a4] ss:$16 sps:$4 sm:$0xff]   ;;  %v5809_v16 = vld [vmem:[%s10832_s1 + $0x5a0] ss:$16 sps:$4 sm:$0xff]  }
 0x41f   :  { %3623 = vmatpush1.bf16.msra.mxu0 %v5797_v36  ;;  %v5810_v36 = vld [vmem:[%s10832_s1 + $0x7a0] ss:$16 sps:$4 sm:$0xff]  }
 0x420   :  { %3664 = vmatpush1.bf16.msra.mxu1 %v5798_v46  ;;  %3624 = vmatprep.subr.bf16.mxu0 %v5799_v52  ;;  %v5811_v46 = vld [vmem:[%s10832_s1 + $0x584] ss:$16 sps:$4 sm:$0xff]  }
 0x421   :  { %3665 = vmatprep.subr.bf16.mxu1 %v5800_v4  ;;  %v5812_v52 = vld [vmem:[%s10832_s1 + $0x784] ss:$16 sps:$4 sm:$0xff]   ;;  %v5813_v4 = vld [vmem:[%s10832_s1 + $0x580] ss:$16 sps:$4 sm:$0xff]  }
 0x423   :  { %3625 = vmatpush2.bf16.msra.mxu0 %v5801_v14  ;;  %v5814_v14 = vld [vmem:[%s10832_s1 + $0x780] ss:$16 sps:$4 sm:$0xff]  }
 0x424   :  { %3666 = vmatpush2.bf16.msra.mxu1 %v5802_v54  ;;  %3626 = vmatprep.subr.bf16.mxu0 %v5803_v56  ;;  %v5815_v54 = vld [vmem:[%s10832_s1 + $0x564] ss:$16 sps:$4 sm:$0xff]  }
 0x425   :  { %3667 = vmatprep.subr.bf16.mxu1 %v5804_v44  ;;  %v5816_v56 = vld [vmem:[%s10832_s1 + $0x764] ss:$16 sps:$4 sm:$0xff]   ;;  %v5817_v44 = vld [vmem:[%s10832_s1 + $0x560] ss:$16 sps:$4 sm:$0xff]  }
 0x427   :  { %3627 = vmatpush2.bf16.msra.mxu0 %v5805_v45  ;;  %v5818_v45 = vld [vmem:[%s10832_s1 + $0x760] ss:$16 sps:$4 sm:$0xff]  }
 0x428   :  { %3668 = vmatpush2.bf16.msra.mxu1 %v5806_v6  ;;  %3628 = vmatprep.subr.bf16.mxu0 %v5807_v33  ;;  %v5819_v6 = vld [vmem:[%s10832_s1 + $0x544] ss:$16 sps:$4 sm:$0xff]  }
 0x429   :  { %3669 = vmatprep.subr.bf16.mxu1 %v5808_v42  ;;  %v5820_v33 = vld [vmem:[%s10832_s1 + $0x744] ss:$16 sps:$4 sm:$0xff]   ;;  %v5821_v42 = vld [vmem:[%s10832_s1 + $0x540] ss:$16 sps:$4 sm:$0xff]  }
 0x42b   :  { %3629 = vmatpush2.bf16.msra.mxu0 %v5809_v16  ;;  %v5822_v16 = vld [vmem:[%s10832_s1 + $0x740] ss:$16 sps:$4 sm:$0xff]  }
 0x42c   :  { %3670 = vmatpush2.bf16.msra.mxu1 %v5810_v36  ;;  %3630 = vmatprep.subr.bf16.mxu0 %v5811_v46  ;;  %v5823_v36 = vld [vmem:[%s10832_s1 + $0x524] ss:$16 sps:$4 sm:$0xff]  }
 0x42d   :  { %3671 = vmatprep.subr.bf16.mxu1 %v5812_v52  ;;  %v5824_v46 = vld [vmem:[%s10832_s1 + $0x724] ss:$16 sps:$4 sm:$0xff]   ;;  %v10202_v52 = vrot.slane %v9957_v53, %v6144_v49 }
 0x42e   :  { %v5827_v53 = vld [vmem:[%s10832_s1 + $0x504] ss:$16 sps:$4 sm:$0xff]  }
 0x42f   :  { %3631 = vmatpush2.bf16.msra.mxu0 %v5813_v4  ;;  %v10207_v4 = vld.sshfl [vmem:[%s10831_s0 + $0x26] sm:$0x11 pattern:$0x75316420] }
 0x430   :  { %3672 = vmatpush2.bf16.msra.mxu1 %v5814_v14  ;;  %3632 = vmatprep.subr.bf16.mxu0 %v5815_v54  ;;  %v5825_v14 = vld [vmem:[%s10832_s1 + $0x520] ss:$16 sps:$4 sm:$0xff]  }
 0x431   :  { %3673 = vmatprep.subr.bf16.mxu1 %v5816_v56  ;;  %v5826_v54 = vld [vmem:[%s10832_s1 + $0x720] ss:$16 sps:$4 sm:$0xff]   ;;  %v5828_v56 = vld [vmem:[%s10832_s1 + $0x704] ss:$16 sps:$4 sm:$0xff]  }
 0x433   :  { %3633 = vmatpush2.bf16.msra.mxu0 %v5817_v44  ;;  %v3501_v44 = vcombine.high %v10207_v4, %v10207_v4 }
 0x434   :  { %3674 = vmatpush2.bf16.msra.mxu1 %v5818_v45  ;;  %3634 = vmatprep.subr.bf16.mxu0 %v5819_v6  ;;  %v10225_v45 = vcombine.high %v10202_v52, %v10202_v52  ;;  %v5829_v6 = vld [vmem:[%s10832_s1 + $0x500] ss:$16 sps:$4 sm:$0xff]  }
 0x435   :  { %3675 = vmatprep.subr.bf16.mxu1 %v5820_v33  ;;  %v5830_v33 = vld [vmem:[%s10832_s1 + $0x700] ss:$16 sps:$4 sm:$0xff]  }
 0x437   :  { %3635 = vmatpush2.bf16.msra.mxu0 %v5821_v42  ;;  %v5831_v42 = vld [vmem:[%s10832_s1 + $0x8e4] ss:$16 sps:$4 sm:$0xff]  }
 0x438   :  { %3676 = vmatpush2.bf16.msra.mxu1 %v5822_v16  ;;  %3636 = vmatprep.subr.bf16.mxu0 %v5823_v36  ;;  %v5832_v16 = vld [vmem:[%s10832_s1 + $0xec] ss:$16 sps:$4 sm:$0xff]   ;;  %v10240_v36 = vrot.slane %v3501_v44, %v6144_v49 }
 0x439   :  { %3677 = vmatprep.subr.bf16.mxu1 %v5824_v46 }
 0x43b   :  { %3637 = vmatpush2.bf16.msra.mxu0 %v5825_v14 }
 0x43c   :  { %3678 = vmatpush2.bf16.msra.mxu1 %v5826_v54  ;;  %3638 = vmatprep.subr.bf16.mxu0 %v5827_v53  ;;  %v5833_v53 = vld [vmem:[%s10832_s1 + $0x8e0] ss:$16 sps:$4 sm:$0xff]  }
 0x43d   :  { %3679 = vmatprep.subr.bf16.mxu1 %v5828_v56  ;;  %v5834_v56 = vld [vmem:[%s10832_s1 + $0xe8] ss:$16 sps:$4 sm:$0xff]  }
 0x43f   :  { %3639 = vmatpush2.bf16.msra.mxu0 %v5829_v6 }
 0x440   :  { %3680 = vmatpush2.bf16.msra.mxu1 %v5830_v33  ;;  %3690 = vmatprep.subr.bf16.mxu0 %v5831_v42  ;;  %v5835_v33 = vld [vmem:[%s10832_s1 + $0x8c4] ss:$16 sps:$4 sm:$0xff]  }
 0x441   :  { %3731 = vmatprep.subr.bf16.mxu1 %v5832_v16 }
 0x442   :  { %v3307_v46 = vpop.f32.mrf.mxu0  ;;  %3641 = vmatmul.mubr.bf16.vlgmr.msra.gmra.mxu0 %v10202_v52 }
 0x443   :  { %v3348_v14 = vpop.f32.mrf.mxu1  ;;  %3682 = vmatmul.mubr.bf16.vlgmr.msra.gmra.mxu1 %v10225_v45  ;;  %v3308_v54 = vadd.f32 %v3307_v46, %v10012_v1  ;;  %3691 = vmatpush1.bf16.msra.mxu0 %v5833_v53  ;;  %v5836_v1 = vld [vmem:[%s10832_s1 + $0xcc] ss:$16 sps:$4 sm:$0xff]  }
 0x444   :  { %3732 = vmatpush1.bf16.msra.mxu1 %v5834_v56  ;;  %v3309_v44 = vpop.f32.mrf.mxu0  ;;  %3692 = vmatprep.subr.bf16.mxu0 %v5835_v33  ;;  %v5837_v33 = vld [vmem:[%s10832_s1 + $0x8c0] ss:$16 sps:$4 sm:$0xff]  }
 0x445   :  { %v3350_v6 = vpop.f32.mrf.mxu1  ;;  %3733 = vmatprep.subr.bf16.mxu1 %v5836_v1  ;;  %v10257_v42 = vadd.f32 %v3348_v14, %v3308_v54  ;;  %v3310_v16 = vadd.f32 %v3309_v44, %v10023_v24  ;;  %3722 = vmatprep.mubr.bf16.mxu0 %v10240_v36  ;;  %v5838_v14 = vld [vmem:[%s10832_s1 + $0xc8] ss:$16 sps:$4 sm:$0xff]   ;;  %v5840_v44 = vld [vmem:[%s10832_s1 + $0xac] ss:$16 sps:$4 sm:$0xff]  }
 0x446   :  { %3763 = vmatprep.mubr.bf16.mxu1 %v9764_v35  ;;  %v3311_v46 = vpop.f32.mrf.mxu0  ;;  %v5839_v35 = vld [vmem:[%s10832_s1 + $0x8a4] ss:$16 sps:$4 sm:$0xff]   ;;  %v5842_v1 = vld [vmem:[%s10832_s1 + $0xa8] ss:$16 sps:$4 sm:$0xff]  }
 0x447   :  { %v3352_v53 = vpop.f32.mrf.mxu1  ;;  %v10262_v56 = vadd.f32 %v3350_v6, %v3310_v16  ;;  %3693 = vmatpush1.bf16.msra.mxu0 %v5837_v33  ;;  %v5841_v6 = vld [vmem:[%s10832_s1 + $0x8a0] ss:$16 sps:$4 sm:$0xff]   ;;  %v5843_v16 = vld [vmem:[%s10832_s1 + $0x884] ss:$16 sps:$4 sm:$0xff]   ;;  %v5844_v46 = vld [vmem:[%s10832_s1 + $0x8c] ss:$16 sps:$4 sm:$0xff]  }
 0x448   :  { %3734 = vmatpush1.bf16.msra.mxu1 %v5838_v14  ;;  %v3312_v54 = vpop.f32.mrf.mxu0  ;;  %3694 = vmatprep.subr.bf16.mxu0 %v5839_v35  ;;  %v5845_v53 = vld [vmem:[%s10832_s1 + $0x880] ss:$16 sps:$4 sm:$0xff]   ;;  %v5846_v33 = vld [vmem:[%s10832_s1 + $0x88] ss:$16 sps:$4 sm:$0xff]   ;;  %v5847_v14 = vld [vmem:[%s10832_s1 + $0x864] ss:$16 sps:$4 sm:$0xff]  }
 0x449   :  { %v3353_v24 = vpop.f32.mrf.mxu1  ;;  %3735 = vmatprep.subr.bf16.mxu1 %v5840_v44  ;;  %v5848_v54 = vld [vmem:[%s10832_s1 + $0x6c] ss:$16 sps:$4 sm:$0xff]   ;;  %v5850_v35 = vld [vmem:[%s10832_s1 + $0x68] ss:$16 sps:$4 sm:$0xff]   ;;  %v5851_v44 = vld [vmem:[%s10832_s1 + $0x844] ss:$16 sps:$4 sm:$0xff]  }
 0x44a   :  { %v5849_v24 = vld [vmem:[%s10832_s1 + $0x860] ss:$16 sps:$4 sm:$0xff]  }
 0x44b   :  { %3695 = vmatpush1.bf16.msra.mxu0 %v5841_v6  ;;  %v5852_v6 = vld [vmem:[%s10832_s1 + $0x4c] ss:$16 sps:$4 sm:$0xff]  }
 0x44c   :  { %3736 = vmatpush1.bf16.msra.mxu1 %v5842_v1  ;;  %3696 = vmatprep.subr.bf16.mxu0 %v5843_v16  ;;  %v5853_v1 = vld [vmem:[%s10832_s1 + $0x840] ss:$16 sps:$4 sm:$0xff]   ;;  %v5854_v16 = vld [vmem:[%s10832_s1 + $0x48] ss:$16 sps:$4 sm:$0xff]  }
 0x44d   :  { %3737 = vmatprep.subr.bf16.mxu1 %v5844_v46  ;;  %v5855_v46 = vld [vmem:[%s10832_s1 + $0x824] ss:$16 sps:$4 sm:$0xff]  }
 0x44f   :  { %3697 = vmatpush1.bf16.msra.mxu0 %v5845_v53  ;;  %v5856_v53 = vld [vmem:[%s10832_s1 + $0x2c] ss:$16 sps:$4 sm:$0xff]  }
 0x450   :  { %3738 = vmatpush1.bf16.msra.mxu1 %v5846_v33  ;;  %3698 = vmatprep.subr.bf16.mxu0 %v5847_v14  ;;  %v5857_v33 = vld [vmem:[%s10832_s1 + $0x820] ss:$16 sps:$4 sm:$0xff]   ;;  %v5858_v14 = vld [vmem:[%s10832_s1 + $0x28] ss:$16 sps:$4 sm:$0xff]  }
 0x451   :  { %3739 = vmatprep.subr.bf16.mxu1 %v5848_v54  ;;  %v5859_v54 = vld [vmem:[%s10832_s1 + $0x804] ss:$16 sps:$4 sm:$0xff]  }
 0x453   :  { %3699 = vmatpush1.bf16.msra.mxu0 %v5849_v24  ;;  %v5860_v24 = vld [vmem:[%s10832_s1 + $0xc] ss:$16 sps:$4 sm:$0xff]  }
 0x454   :  { %3740 = vmatpush1.bf16.msra.mxu1 %v5850_v35  ;;  %3700 = vmatprep.subr.bf16.mxu0 %v5851_v44  ;;  %v5861_v35 = vld [vmem:[%s10832_s1 + $0x800] ss:$16 sps:$4 sm:$0xff]   ;;  %v5862_v44 = vld [vmem:[%s10832_s1 + $0x8] ss:$16 sps:$4 sm:$0xff]  }
 0x455   :  { %3741 = vmatprep.subr.bf16.mxu1 %v5852_v6  ;;  %v5863_v6 = vld [vmem:[%s10832_s1 + $0x9e4] ss:$16 sps:$4 sm:$0xff]  }
 0x457   :  { %3701 = vmatpush1.bf16.msra.mxu0 %v5853_v1  ;;  %v5864_v1 = vld [vmem:[%s10832_s1 + $0x1ec] ss:$16 sps:$4 sm:$0xff]  }
 0x458   :  { %3742 = vmatpush1.bf16.msra.mxu1 %v5854_v16  ;;  %3702 = vmatprep.subr.bf16.mxu0 %v5855_v46  ;;  %v5865_v16 = vld [vmem:[%s10832_s1 + $0x9e0] ss:$16 sps:$4 sm:$0xff]   ;;  %v5866_v46 = vld [vmem:[%s10832_s1 + $0x1e8] ss:$16 sps:$4 sm:$0xff]  }
 0x459   :  { %3743 = vmatprep.subr.bf16.mxu1 %v5856_v53  ;;  %v5867_v53 = vld [vmem:[%s10832_s1 + $0x9c4] ss:$16 sps:$4 sm:$0xff]  }
 0x45b   :  { %3703 = vmatpush1.bf16.msra.mxu0 %v5857_v33  ;;  %v5868_v33 = vld [vmem:[%s10832_s1 + $0x1cc] ss:$16 sps:$4 sm:$0xff]  }
 0x45c   :  { %3744 = vmatpush1.bf16.msra.mxu1 %v5858_v14  ;;  %3704 = vmatprep.subr.bf16.mxu0 %v5859_v54  ;;  %v5869_v14 = vld [vmem:[%s10832_s1 + $0x9c0] ss:$16 sps:$4 sm:$0xff]   ;;  %v5870_v54 = vld [vmem:[%s10832_s1 + $0x1c8] ss:$16 sps:$4 sm:$0xff]  }
 0x45d   :  { %3745 = vmatprep.subr.bf16.mxu1 %v5860_v24  ;;  %v5871_v24 = vld [vmem:[%s10832_s1 + $0x9a4] ss:$16 sps:$4 sm:$0xff]  }
 0x45f   :  { %3705 = vmatpush1.bf16.msra.mxu0 %v5861_v35  ;;  %v5872_v35 = vld [vmem:[%s10832_s1 + $0x1ac] ss:$16 sps:$4 sm:$0xff]  }
 0x460   :  { %3746 = vmatpush1.bf16.msra.mxu1 %v5862_v44  ;;  %3706 = vmatprep.subr.bf16.mxu0 %v5863_v6  ;;  %v5873_v44 = vld [vmem:[%s10832_s1 + $0x9a0] ss:$16 sps:$4 sm:$0xff]   ;;  %v5874_v6 = vld [vmem:[%s10832_s1 + $0x1a8] ss:$16 sps:$4 sm:$0xff]  }
 0x461   :  { %3747 = vmatprep.subr.bf16.mxu1 %v5864_v1  ;;  %v5875_v1 = vld [vmem:[%s10832_s1 + $0x984] ss:$16 sps:$4 sm:$0xff]  }
 0x463   :  { %3707 = vmatpush2.bf16.msra.mxu0 %v5865_v16  ;;  %v5876_v16 = vld [vmem:[%s10832_s1 + $0x18c] ss:$16 sps:$4 sm:$0xff]  }
 0x464   :  { %3748 = vmatpush2.bf16.msra.mxu1 %v5866_v46  ;;  %3708 = vmatprep.subr.bf16.mxu0 %v5867_v53  ;;  %v5877_v46 = vld [vmem:[%s10832_s1 + $0x980] ss:$16 sps:$4 sm:$0xff]   ;;  %v5878_v53 = vld [vmem:[%s10832_s1 + $0x188] ss:$16 sps:$4 sm:$0xff]  }
 0x465   :  { %3749 = vmatprep.subr.bf16.mxu1 %v5868_v33  ;;  %v5879_v33 = vld [vmem:[%s10832_s1 + $0x964] ss:$16 sps:$4 sm:$0xff]  }
 0x467   :  { %3709 = vmatpush2.bf16.msra.mxu0 %v5869_v14  ;;  %v5880_v14 = vld [vmem:[%s10832_s1 + $0x16c] ss:$16 sps:$4 sm:$0xff]  }
 0x468   :  { %3750 = vmatpush2.bf16.msra.mxu1 %v5870_v54  ;;  %3710 = vmatprep.subr.bf16.mxu0 %v5871_v24  ;;  %v5881_v54 = vld [vmem:[%s10832_s1 + $0x960] ss:$16 sps:$4 sm:$0xff]   ;;  %v5882_v24 = vld [vmem:[%s10832_s1 + $0x168] ss:$16 sps:$4 sm:$0xff]  }
 0x469   :  { %3751 = vmatprep.subr.bf16.mxu1 %v5872_v35  ;;  %v5883_v35 = vld [vmem:[%s10832_s1 + $0x944] ss:$16 sps:$4 sm:$0xff]  }
 0x46b   :  { %3711 = vmatpush2.bf16.msra.mxu0 %v5873_v44  ;;  %v5884_v44 = vld [vmem:[%s10832_s1 + $0x14c] ss:$16 sps:$4 sm:$0xff]  }
 0x46c   :  { %3752 = vmatpush2.bf16.msra.mxu1 %v5874_v6  ;;  %3712 = vmatprep.subr.bf16.mxu0 %v5875_v1  ;;  %v5885_v6 = vld [vmem:[%s10832_s1 + $0x940] ss:$16 sps:$4 sm:$0xff]   ;;  %v5886_v1 = vld [vmem:[%s10832_s1 + $0x148] ss:$16 sps:$4 sm:$0xff]  }
 0x46d   :  { %3753 = vmatprep.subr.bf16.mxu1 %v5876_v16  ;;  %v5887_v16 = vld [vmem:[%s10832_s1 + $0x924] ss:$16 sps:$4 sm:$0xff]  }
 0x46f   :  { %3713 = vmatpush2.bf16.msra.mxu0 %v5877_v46  ;;  %v5888_v46 = vld [vmem:[%s10832_s1 + $0x12c] ss:$16 sps:$4 sm:$0xff]  }
 0x470   :  { %3754 = vmatpush2.bf16.msra.mxu1 %v5878_v53  ;;  %3714 = vmatprep.subr.bf16.mxu0 %v5879_v33  ;;  %v5889_v53 = vld [vmem:[%s10832_s1 + $0x920] ss:$16 sps:$4 sm:$0xff]   ;;  %v5890_v33 = vld [vmem:[%s10832_s1 + $0x128] ss:$16 sps:$4 sm:$0xff]  }
 0x471   :  { %3755 = vmatprep.subr.bf16.mxu1 %v5880_v14  ;;  %v5891_v14 = vld [vmem:[%s10832_s1 + $0x904] ss:$16 sps:$4 sm:$0xff]  }
 0x473   :  { %3715 = vmatpush2.bf16.msra.mxu0 %v5881_v54  ;;  %v5892_v54 = vld [vmem:[%s10832_s1 + $0x10c] ss:$16 sps:$4 sm:$0xff]  }
 0x474   :  { %3756 = vmatpush2.bf16.msra.mxu1 %v5882_v24  ;;  %3716 = vmatprep.subr.bf16.mxu0 %v5883_v35  ;;  %v10434_v24 = vrot.slane %v10207_v4, %v6144_v49  ;;  %v5893_v35 = vld [vmem:[%s10832_s1 + $0x900] ss:$16 sps:$4 sm:$0xff]   ;;  %v5896_v49 = vld [vmem:[%s10832_s1 + $0x4ec] ss:$16 sps:$4 sm:$0xff]  }
 0x475   :  { %3757 = vmatprep.subr.bf16.mxu1 %v5884_v44  ;;  %v5894_v44 = vld [vmem:[%s10832_s1 + $0x108] ss:$16 sps:$4 sm:$0xff]  }
 0x477   :  { %3717 = vmatpush2.bf16.msra.mxu0 %v5885_v6  ;;  %v5895_v6 = vld [vmem:[%s10832_s1 + $0x2ec] ss:$16 sps:$4 sm:$0xff]  }
 0x478   :  { %3758 = vmatpush2.bf16.msra.mxu1 %v5886_v1  ;;  %3718 = vmatprep.subr.bf16.mxu0 %v5887_v16 }
 0x479   :  { %3759 = vmatprep.subr.bf16.mxu1 %v5888_v46  ;;  %v5897_v46 = vld [vmem:[%s10832_s1 + $0x2e8] ss:$16 sps:$4 sm:$0xff]  }
 0x47b   :  { %3719 = vmatpush2.bf16.msra.mxu0 %v5889_v53  ;;  %v5898_v53 = vld [vmem:[%s10832_s1 + $0x4e8] ss:$16 sps:$4 sm:$0xff]  }
 0x47c   :  { %3760 = vmatpush2.bf16.msra.mxu1 %v5890_v33  ;;  %3720 = vmatprep.subr.bf16.mxu0 %v5891_v14 }
 0x47d   :  { %3761 = vmatprep.subr.bf16.mxu1 %v5892_v54  ;;  %v5899_v54 = vld [vmem:[%s10832_s1 + $0x2cc] ss:$16 sps:$4 sm:$0xff]  }
 0x47f   :  { %3721 = vmatpush2.bf16.msra.mxu0 %v5893_v35 }
 0x480   :  { %3762 = vmatpush2.bf16.msra.mxu1 %v5894_v44  ;;  %3772 = vmatprep.subr.bf16.mxu0 %v5895_v6 }
 0x481   :  { %3813 = vmatprep.subr.bf16.mxu1 %v5896_v49  ;;  %v11735_v49 = vmax.f32 %v8575_v31, %v9223_v59  ;;  %v5904_v31 = vld [vmem:[%s10832_s1 + $0x4ac] ss:$16 sps:$4 sm:$0xff]   ;;  %v11736_v59 = vmax.f32 %v8580_v27, %v9230_v38  ;;  %v5909_v38 = vld [vmem:[%s10832_s1 + $0x288] ss:$16 sps:$4 sm:$0xff]  }
 0x482   :  { %v3389_v4 = vpop.f32.mrf.mxu0  ;;  %3723 = vmatmul.mubr.bf16.vlgmr.msra.gmra.mxu0 %v10434_v24  ;;  %v5908_v27 = vld [vmem:[%s10832_s1 + $0x48c] ss:$16 sps:$4 sm:$0xff]  }
 0x483   :  { %v3430_v1 = vpop.f32.mrf.mxu1  ;;  %3764 = vmatmul.mubr.bf16.vlgmr.msra.gmra.mxu1 %v9975_v58  ;;  %v3390_v16 = vadd.f32 %v3389_v4, %v10257_v42  ;;  %3773 = vmatpush1.bf16.msra.mxu0 %v5897_v46  ;;  %v5900_v58 = vld [vmem:[%s10832_s1 + $0x4cc] ss:$16 sps:$4 sm:$0xff]  }
 0x484   :  { %3814 = vmatpush1.bf16.msra.mxu1 %v5898_v53  ;;  %v3391_v33 = vpop.f32.mrf.mxu0  ;;  %3774 = vmatprep.subr.bf16.mxu0 %v5899_v54  ;;  %v5901_v53 = vld [vmem:[%s10832_s1 + $0x2c8] ss:$16 sps:$4 sm:$0xff]   ;;  %v5907_v54 = vld [vmem:[%s10832_s1 + $0x28c] ss:$16 sps:$4 sm:$0xff]  }
 0x485   :  { %v3432_v14 = vpop.f32.mrf.mxu1  ;;  %3815 = vmatprep.subr.bf16.mxu1 %v5900_v58  ;;  %v3431_v42 = vadd.f32 %v3430_v1, %v3390_v16  ;;  %v3392_v35 = vadd.f32 %v3391_v33, %v10262_v56  ;;  %3804 = vmatprep.mubr.bf16.mxu0 %v9786_v41  ;;  %v5902_v56 = vld [vmem:[%s10832_s1 + $0x4c8] ss:$16 sps:$4 sm:$0xff]   ;;  %v5903_v1 = vld [vmem:[%s10832_s1 + $0x2ac] ss:$16 sps:$4 sm:$0xff]  }
 0x486   :  { %3845 = vmatprep.mubr.bf16.mxu1 %v9990_v10  ;;  %v3393_v44 = vpop.f32.mrf.mxu0  ;;  %v5905_v33 = vld [vmem:[%s10832_s1 + $0x2a8] ss:$16 sps:$4 sm:$0xff]  }
 0x487   :  { %v3434_v6 = vpop.f32.mrf.mxu1  ;;  %v10469_v4 = vmax.f32 %v11735_v49, %v3431_v42  ;;  %v3433_v46 = vadd.f32 %v3432_v14, %v3392_v35  ;;  %3775 = vmatpush1.bf16.msra.mxu0 %v5901_v53  ;;  %v5906_v14 = vld [vmem:[%s10832_s1 + $0x4a8] ss:$16 sps:$4 sm:$0xff]   ;;  %v5911_v42 = vld [vmem:[%s10832_s1 + $0x26c] ss:$16 sps:$4 sm:$0xff]  }
 0x488   :  { %3816 = vmatpush1.bf16.msra.mxu1 %v5902_v56  ;;  %v3394_v41 = vpop.f32.mrf.mxu0  ;;  %3776 = vmatprep.subr.bf16.mxu0 %v5903_v1  ;;  %v5910_v58 = vld [vmem:[%s10832_s1 + $0x488] ss:$16 sps:$4 sm:$0xff]   ;;  %v5912_v35 = vld [vmem:[%s10832_s1 + $0x46c] ss:$16 sps:$4 sm:$0xff]  }
 0x489   :  { %v3435_v10 = vpop.f32.mrf.mxu1  ;;  %3817 = vmatprep.subr.bf16.mxu1 %v5904_v31  ;;  %v10486_v16 = vmax.f32 %v11736_v59, %v3433_v46  ;;  %v5913_v44 = vld [vmem:[%s10832_s1 + $0x268] ss:$16 sps:$4 sm:$0xff]   ;;  %v5915_v49 = vld [vmem:[%s10832_s1 + $0x24c] ss:$16 sps:$4 sm:$0xff]  }
 0x48a   :  { %v5914_v6 = vld [vmem:[%s10832_s1 + $0x468] ss:$16 sps:$4 sm:$0xff]   ;;  %v5916_v46 = vld [vmem:[%s10832_s1 + $0x44c] ss:$16 sps:$4 sm:$0xff]  }
 0x48b   :  { %3777 = vmatpush1.bf16.msra.mxu0 %v5905_v33  ;;  %v5917_v53 = vld [vmem:[%s10832_s1 + $0x248] ss:$16 sps:$4 sm:$0xff]   ;;  %v5919_v41 = vld [vmem:[%s10832_s1 + $0x22c] ss:$16 sps:$4 sm:$0xff]  }
 0x48c   :  { %3818 = vmatpush1.bf16.msra.mxu1 %v5906_v14  ;;  %3778 = vmatprep.subr.bf16.mxu0 %v5907_v54  ;;  %v5918_v56 = vld [vmem:[%s10832_s1 + $0x448] ss:$16 sps:$4 sm:$0xff]   ;;  %v5920_v10 = vld [vmem:[%s10832_s1 + $0x42c] ss:$16 sps:$4 sm:$0xff]  }
 0x48d   :  { %3819 = vmatprep.subr.bf16.mxu1 %v5908_v27  ;;  %v5921_v1 = vld [vmem:[%s10832_s1 + $0x228] ss:$16 sps:$4 sm:$0xff]   ;;  %v5923_v59 = vld [vmem:[%s10832_s1 + $0x20c] ss:$16 sps:$4 sm:$0xff]  }
 0x48e   :  { %v5922_v31 = vld [vmem:[%s10832_s1 + $0x428] ss:$16 sps:$4 sm:$0xff]   ;;  %v5924_v33 = vld [vmem:[%s10832_s1 + $0x40c] ss:$16 sps:$4 sm:$0xff]  }
 0x48f   :  { %3779 = vmatpush1.bf16.msra.mxu0 %v5909_v38  ;;  %v5925_v14 = vld [vmem:[%s10832_s1 + $0x208] ss:$16 sps:$4 sm:$0xff]   ;;  %v5927_v27 = vld [vmem:[%s10832_s1 + $0x3ec] ss:$16 sps:$4 sm:$0xff]  }
 0x490   :  { %3820 = vmatpush1.bf16.msra.mxu1 %v5910_v58  ;;  %3780 = vmatprep.subr.bf16.mxu0 %v5911_v42  ;;  %v5926_v54 = vld [vmem:[%s10832_s1 + $0x408] ss:$16 sps:$4 sm:$0xff]   ;;  %v5928_v38 = vld [vmem:[%s10832_s1 + $0x5ec] ss:$16 sps:$4 sm:$0xff]  }
 0x491   :  { %3821 = vmatprep.subr.bf16.mxu1 %v5912_v35  ;;  %v5929_v58 = vld [vmem:[%s10832_s1 + $0x3e8] ss:$16 sps:$4 sm:$0xff]   ;;  %v5931_v35 = vld [vmem:[%s10832_s1 + $0x3cc] ss:$16 sps:$4 sm:$0xff]  }
 0x492   :  { %v5930_v42 = vld [vmem:[%s10832_s1 + $0x5e8] ss:$16 sps:$4 sm:$0xff]  }
 0x493   :  { %3781 = vmatpush1.bf16.msra.mxu0 %v5913_v44  ;;  %v5932_v44 = vld [vmem:[%s10832_s1 + $0x5cc] ss:$16 sps:$4 sm:$0xff]  }
 0x494   :  { %3822 = vmatpush1.bf16.msra.mxu1 %v5914_v6  ;;  %3782 = vmatprep.subr.bf16.mxu0 %v5915_v49  ;;  %v5933_v6 = vld [vmem:[%s10832_s1 + $0x3c8] ss:$16 sps:$4 sm:$0xff]  }
 0x495   :  { %3823 = vmatprep.subr.bf16.mxu1 %v5916_v46  ;;  %v5934_v49 = vld [vmem:[%s10832_s1 + $0x5c8] ss:$16 sps:$4 sm:$0xff]   ;;  %v5935_v46 = vld [vmem:[%s10832_s1 + $0x3ac] ss:$16 sps:$4 sm:$0xff]  }
 0x497   :  { %3783 = vmatpush1.bf16.msra.mxu0 %v5917_v53  ;;  %v5936_v53 = vld [vmem:[%s10832_s1 + $0x5ac] ss:$16 sps:$4 sm:$0xff]  }
 0x498   :  { %3824 = vmatpush1.bf16.msra.mxu1 %v5918_v56  ;;  %3784 = vmatprep.subr.bf16.mxu0 %v5919_v41  ;;  %v5937_v56 = vld [vmem:[%s10832_s1 + $0x3a8] ss:$16 sps:$4 sm:$0xff]  }
 0x499   :  { %3825 = vmatprep.subr.bf16.mxu1 %v5920_v10  ;;  %v5938_v41 = vld [vmem:[%s10832_s1 + $0x5a8] ss:$16 sps:$4 sm:$0xff]   ;;  %v5939_v10 = vld [vmem:[%s10832_s1 + $0x38c] ss:$16 sps:$4 sm:$0xff]  }
 0x49b   :  { %3785 = vmatpush1.bf16.msra.mxu0 %v5921_v1  ;;  %v5940_v1 = vld [vmem:[%s10832_s1 + $0x58c] ss:$16 sps:$4 sm:$0xff]  }
 0x49c   :  { %3826 = vmatpush1.bf16.msra.mxu1 %v5922_v31  ;;  %3786 = vmatprep.subr.bf16.mxu0 %v5923_v59  ;;  %v5941_v31 = vld [vmem:[%s10832_s1 + $0x388] ss:$16 sps:$4 sm:$0xff]  }
 0x49d   :  { %3827 = vmatprep.subr.bf16.mxu1 %v5924_v33  ;;  %v5942_v59 = vld [vmem:[%s10832_s1 + $0x588] ss:$16 sps:$4 sm:$0xff]  }
 0x49e   :  { %v11766_v33 = vld [vmem:[#allocation35_spill] sm:$0xff] }
 0x49f   :  { %3787 = vmatpush1.bf16.msra.mxu0 %v5925_v14  ;;  %v11767_v14 = vld [vmem:[#allocation36_spill] sm:$0xff] }
 0x4a0   :  { %3828 = vmatpush1.bf16.msra.mxu1 %v5926_v54  ;;  %3788 = vmatprep.subr.bf16.mxu0 %v5927_v27  ;;  %v11768_v54 = vld [vmem:[#allocation37_spill] sm:$0xff]  ;;  %v11769_v27 = vld [vmem:[#allocation38_spill] sm:$0xff] }
 0x4a1   :  { %3829 = vmatprep.subr.bf16.mxu1 %v5928_v38  ;;  %v11770_v38 = vld [vmem:[#allocation39_spill] sm:$0xff] }
 0x4a3   :  { %3789 = vmatpush2.bf16.msra.mxu0 %v5929_v58  ;;  %v11771_v58 = vld [vmem:[#allocation40_spill] sm:$0xff] }
 0x4a4   :  { %3830 = vmatpush2.bf16.msra.mxu1 %v5930_v42  ;;  %3790 = vmatprep.subr.bf16.mxu0 %v5931_v35  ;;  %v11772_v42 = vld [vmem:[#allocation41_spill] sm:$0xff]  ;;  %v11773_v35 = vld [vmem:[#allocation42_spill] sm:$0xff] }
 0x4a5   :  { %3831 = vmatprep.subr.bf16.mxu1 %v5932_v44  ;;  %v11774_v44 = vld [vmem:[#allocation43_spill] sm:$0xff] }
 0x4a7   :  { %3791 = vmatpush2.bf16.msra.mxu0 %v5933_v6  ;;  %v11775_v6 = vld [vmem:[#allocation44_spill] sm:$0xff] }
 0x4a8   :  { %3832 = vmatpush2.bf16.msra.mxu1 %v5934_v49  ;;  %3792 = vmatprep.subr.bf16.mxu0 %v5935_v46  ;;  %v11776_v49 = vld [vmem:[#allocation45_spill] sm:$0xff]  ;;  %v11777_v46 = vld [vmem:[#allocation172_spill] sm:$0xff] }
 0x4a9   :  { %3833 = vmatprep.subr.bf16.mxu1 %v5936_v53  ;;  %v11778_v53 = vld [vmem:[#allocation46_spill] sm:$0xff] }
 0x4ab   :  { %3793 = vmatpush2.bf16.msra.mxu0 %v5937_v56  ;;  %v11779_v56 = vld [vmem:[#allocation47_spill] sm:$0xff] }
 0x4ac   :  { %3834 = vmatpush2.bf16.msra.mxu1 %v5938_v41  ;;  %3794 = vmatprep.subr.bf16.mxu0 %v5939_v10  ;;  %v5343_v41 = vld [vmem:[%s10834_s3 + $0x78] sm:$0xff]  }
 0x4ad   :  { %3835 = vmatprep.subr.bf16.mxu1 %v5940_v1  ;;  %v11780_v10 = vld [vmem:[#allocation48_spill] sm:$0xff]  ;;  %v11781_v1 = vld [vmem:[#allocation49_spill] sm:$0xff] }
 0x4af   :  { %3795 = vmatpush2.bf16.msra.mxu0 %v5941_v31  ;;  %v5344_v31 = vld [vmem:[%s10834_s3 + $0x38] sm:$0xff]  }
 0x4b0   :  { %3836 = vmatpush2.bf16.msra.mxu1 %v5942_v59  ;;  %3796 = vmatprep.subr.bf16.mxu0 %v9279_v11  ;;  %v5345_v59 = vld [vmem:[%s10834_s3 + $0x70] sm:$0xff]  }
 0x4b1   :  { %3837 = vmatprep.subr.bf16.mxu1 %v9285_v40 }
 0x4b3   :  { %3797 = vmatpush2.bf16.msra.mxu0 %v9291_v61 }
 0x4b4   :  { %3838 = vmatpush2.bf16.msra.mxu1 %v9297_v29  ;;  %3798 = vmatprep.subr.bf16.mxu0 %v9303_v22 }
 0x4b5   :  { %3839 = vmatprep.subr.bf16.mxu1 %v9309_v17 }
 0x4b7   :  { %3799 = vmatpush2.bf16.msra.mxu0 %v9315_v21 }
 0x4b8   :  { %3840 = vmatpush2.bf16.msra.mxu1 %v9321_v18  ;;  %3800 = vmatprep.subr.bf16.mxu0 %v9327_v63 }
 0x4b9   :  { %3841 = vmatprep.subr.bf16.mxu1 %v9333_v50 }
 0x4bb   :  { %3801 = vmatpush2.bf16.msra.mxu0 %v9339_v20  ;;  %v11737_v20 = vld [vmem:[#allocation6_spill] sm:$0xff] }
 0x4bc   :  { %3842 = vmatpush2.bf16.msra.mxu1 %v9345_v9  ;;  %3802 = vmatprep.subr.bf16.mxu0 %v9351_v43  ;;  %v11738_v9 = vld [vmem:[#allocation7_spill] sm:$0xff]  ;;  %v11739_v43 = vld [vmem:[#allocation8_spill] sm:$0xff] }
 0x4bd   :  { %3843 = vmatprep.subr.bf16.mxu1 %v9357_v34  ;;  %v11740_v34 = vld [vmem:[#allocation9_spill] sm:$0xff] }
 0x4bf   :  { %3803 = vmatpush2.bf16.msra.mxu0 %v9363_v30  ;;  %v11741_v30 = vld [vmem:[#allocation10_spill] sm:$0xff] }
 0x4c0   :  { %3844 = vmatpush2.bf16.msra.mxu1 %v9369_v62  ;;  %3854 = vmatprep.subr.bf16.mxu0 %v9375_v55  ;;  %v11742_v62 = vld [vmem:[#allocation11_spill] sm:$0xff]  ;;  %v11743_v55 = vld [vmem:[#allocation12_spill] sm:$0xff] }
 0x4c1   :  { %3895 = vmatprep.subr.bf16.mxu1 %v9381_v15  ;;  %v11744_v15 = vld [vmem:[#allocation13_spill] sm:$0xff] }
 0x4c2   :  { %v3560_v11 = vpop.f32.mrf.mxu0  ;;  %3805 = vmatmul.mubr.bf16.vlgmr.msra.gmra.mxu0 %v9994_v32  ;;  %v11762_v32 = vld [vmem:[#allocation31_spill] sm:$0xff] }
 0x4c3   :  { %v3601_v40 = vpop.f32.mrf.mxu1  ;;  %3846 = vmatmul.mubr.bf16.vlgmr.msra.gmra.mxu1 %v10202_v52  ;;  %3855 = vmatpush1.bf16.msra.mxu0 %v9391_v28  ;;  %v11745_v28 = vld [vmem:[#allocation14_spill] sm:$0xff]  ;;  %v11764_v52 = vld [vmem:[#allocation33_spill] sm:$0xff] }
 0x4c4   :  { %v10622_v61 = vadd.f32 %v3601_v40, %v3560_v11  ;;  %3896 = vmatpush1.bf16.msra.mxu1 %v9397_v25  ;;  %v3562_v29 = vpop.f32.mrf.mxu0  ;;  %3856 = vmatprep.subr.bf16.mxu0 %v9403_v19  ;;  %v11746_v25 = vld [vmem:[#allocation15_spill] sm:$0xff]  ;;  %v11747_v19 = vld [vmem:[#allocation16_spill] sm:$0xff] }
 0x4c5   :  { %v3603_v22 = vpop.f32.mrf.mxu1  ;;  %3897 = vmatprep.subr.bf16.mxu1 %v9409_v23  ;;  %3886 = vmatprep.mubr.bf16.mxu0 %v10010_v47  ;;  %v11748_v23 = vld [vmem:[#allocation17_spill] sm:$0xff]  ;;  %v11763_v47 = vld [vmem:[#allocation32_spill] sm:$0xff] }
 0x4c6   :  { %v10628_v17 = vadd.f32 %v3603_v22, %v3562_v29  ;;  %3927 = vmatprep.mubr.bf16.mxu1 %v10240_v36  ;;  %v3564_v21 = vpop.f32.mrf.mxu0  ;;  %v11765_v36 = vld [vmem:[#allocation34_spill] sm:$0xff] }
 0x4c7   :  { %v3605_v18 = vpop.f32.mrf.mxu1  ;;  %3857 = vmatpush1.bf16.msra.mxu0 %v9419_v48  ;;  %v11749_v48 = vld [vmem:[#allocation18_spill] sm:$0xff] }
 0x4c8   :  { %3898 = vmatpush1.bf16.msra.mxu1 %v9425_v51  ;;  %v3565_v63 = vpop.f32.mrf.mxu0  ;;  %3858 = vmatprep.subr.bf16.mxu0 %v9431_v60  ;;  %v11750_v51 = vld [vmem:[#allocation19_spill] sm:$0xff]  ;;  %v11751_v60 = vld [vmem:[#allocation20_spill] sm:$0xff] }
 0x4c9   :  { %v3606_v50 = vpop.f32.mrf.mxu1  ;;  %3899 = vmatprep.subr.bf16.mxu1 %v9437_v0  ;;  %v11752_v0 = vld [vmem:[#allocation21_spill] sm:$0xff]  ;;  %v5346_v22 = vld [vmem:[%s10834_s3 + $0x30] sm:$0xff]  }
 0x4ca   :  { %v5347_v63 = vld [vmem:[%s10834_s3 + $0x68] sm:$0xff]  }
 0x4cb   :  { %3859 = vmatpush1.bf16.msra.mxu0 %v9443_v57  ;;  %v11753_v57 = vld [vmem:[#allocation22_spill] sm:$0xff] }
 0x4cc   :  { %3900 = vmatpush1.bf16.msra.mxu1 %v9449_v26  ;;  %3860 = vmatprep.subr.bf16.mxu0 %v9455_v2  ;;  %v11754_v26 = vld [vmem:[#allocation23_spill] sm:$0xff]  ;;  %v11755_v2 = vld [vmem:[#allocation24_spill] sm:$0xff] }
 0x4cd   :  { %3901 = vmatprep.subr.bf16.mxu1 %v9461_v3  ;;  %v11756_v3 = vld [vmem:[#allocation25_spill] sm:$0xff] }
 0x4cf   :  { %3861 = vmatpush1.bf16.msra.mxu0 %v9467_v37  ;;  %v11757_v37 = vld [vmem:[#allocation26_spill] sm:$0xff] }
 0x4d0   :  { %3902 = vmatpush1.bf16.msra.mxu1 %v9473_v5  ;;  %3862 = vmatprep.subr.bf16.mxu0 %v9479_v7  ;;  %v11758_v5 = vld [vmem:[#allocation27_spill] sm:$0xff]  ;;  %v11759_v7 = vld [vmem:[#allocation28_spill] sm:$0xff] }
 0x4d1   :  { %3903 = vmatprep.subr.bf16.mxu1 %v9485_v39  ;;  %v11760_v39 = vld [vmem:[#allocation29_spill] sm:$0xff] }
 0x4d3   :  { %3863 = vmatpush1.bf16.msra.mxu0 %v9491_v8  ;;  %v11761_v8 = vld [vmem:[#allocation30_spill] sm:$0xff] }
 0x4d4   :  { %3904 = vmatpush1.bf16.msra.mxu1 %v11737_v20  ;;  %3864 = vmatprep.subr.bf16.mxu0 %v11738_v9 }
 0x4d5   :  { %3905 = vmatprep.subr.bf16.mxu1 %v11739_v43 }
 0x4d7   :  { %3865 = vmatpush1.bf16.msra.mxu0 %v11740_v34  ;;  %v5359_v34 = vld [vmem:[%s10834_s3 + $0xf8] sm:$0xff]  }
 0x4d8   :  { %3906 = vmatpush1.bf16.msra.mxu1 %v11741_v30  ;;  %3866 = vmatprep.subr.bf16.mxu0 %v11742_v62  ;;  %v5360_v30 = vld [vmem:[%s10834_s3 + $0xb8] sm:$0xff]   ;;  %v5361_v62 = vld [vmem:[%s10834_s3 + $0xf0] sm:$0xff]  }
 0x4d9   :  { %3907 = vmatprep.subr.bf16.mxu1 %v11743_v55  ;;  %v5350_v55 = vld [vmem:[%s10834_s3 + $0x20] sm:$0xff]  }
 0x4db   :  { %3867 = vmatpush1.bf16.msra.mxu0 %v11744_v15  ;;  %v5362_v15 = vld [vmem:[%s10834_s3 + $0xb0] sm:$0xff]  }
 0x4dc   :  { %3908 = vmatpush1.bf16.msra.mxu1 %v11745_v28  ;;  %3868 = vmatprep.subr.bf16.mxu0 %v11746_v25  ;;  %v5351_v28 = vld [vmem:[%s10834_s3 + $0x58] sm:$0xff]   ;;  %v5363_v25 = vld [vmem:[%s10834_s3 + $0xe8] sm:$0xff]  }
 0x4dd   :  { %3909 = vmatprep.subr.bf16.mxu1 %v11747_v19  ;;  %v5352_v19 = vld [vmem:[%s10834_s3 + $0x18] sm:$0xff]  }
 0x4df   :  { %3869 = vmatpush1.bf16.msra.mxu0 %v11748_v23  ;;  %v5364_v23 = vld [vmem:[%s10834_s3 + $0xa8] sm:$0xff]  }
 0x4e0   :  { %3910 = vmatpush1.bf16.msra.mxu1 %v11749_v48  ;;  %3870 = vmatprep.subr.bf16.mxu0 %v11750_v51  ;;  %v5353_v48 = vld [vmem:[%s10834_s3 + $0x50] sm:$0xff]   ;;  %v5365_v51 = vld [vmem:[%s10834_s3 + $0xe0] sm:$0xff]  }
 0x4e1   :  { %3911 = vmatprep.subr.bf16.mxu1 %v11751_v60  ;;  %v5354_v60 = vld [vmem:[%s10834_s3 + $0x10] sm:$0xff]  }
 0x4e3   :  { %3871 = vmatpush2.bf16.msra.mxu0 %v11752_v0  ;;  %v5366_v0 = vld [vmem:[%s10834_s3 + $0xa0] sm:$0xff]  }
 0x4e4   :  { %3912 = vmatpush2.bf16.msra.mxu1 %v11753_v57  ;;  %3872 = vmatprep.subr.bf16.mxu0 %v11754_v26  ;;  %v5355_v57 = vld [vmem:[%s10834_s3 + $0x48] sm:$0xff]  }
 0x4e5   :  { %3913 = vmatprep.subr.bf16.mxu1 %v11755_v2  ;;  %v5356_v26 = vld [vmem:[%s10834_s3 + $0x8] sm:$0xff]   ;;  %v5357_v2 = vld [vmem:[%s10834_s3 + $0x40] sm:$0xff]  }
 0x4e7   :  { %3873 = vmatpush2.bf16.msra.mxu0 %v11756_v3  ;;  %v5358_v3 = vld [vmem:[%s10834_s3] sm:$0xff]  }
 0x4e8   :  { %3914 = vmatpush2.bf16.msra.mxu1 %v11757_v37  ;;  %3874 = vmatprep.subr.bf16.mxu0 %v11758_v5  ;;  %v11782_v5 = vld [vmem:[#allocation5_spill] sm:$0xff] }
 0x4e9   :  { %3915 = vmatprep.subr.bf16.mxu1 %v11759_v7  ;;  %v3944_v7 = vsub.s32 0, %v11782_v5 }
 0x4eb   :  { %3875 = vmatpush2.bf16.msra.mxu0 %v11760_v39  ;;  %v10770_v39 = vld [vmem:[%s10833_s2] sm:$0xf] }
 0x4ec   :  { %3916 = vmatpush2.bf16.msra.mxu1 %v11761_v8  ;;  %3876 = vmatprep.subr.bf16.mxu0 %v11762_v32  ;;  %v5367_v8 = vld [vmem:[%s10834_s3 + $0xd8] sm:$0xff]   ;;  %v3948_v32 = vsub.s32 1, %v11782_v5 }
 0x4ed   :  { %3917 = vmatprep.subr.bf16.mxu1 %v11763_v47  ;;  %v5368_v47 = vld [vmem:[%s10834_s3 + $0x98] sm:$0xff]  }
 0x4ef   :  { %3877 = vmatpush2.bf16.msra.mxu0 %v11764_v52 }
 0x4f0   :  { %3918 = vmatpush2.bf16.msra.mxu1 %v11765_v36  ;;  %3878 = vmatprep.subr.bf16.mxu0 %v11766_v33 }
 0x4f1   :  { %3919 = vmatprep.subr.bf16.mxu1 %v11767_v14  ;;  %v3945_v14 = vrot.slane %v10770_v39, %v3944_v7 }
 0x4f3   :  { %3879 = vmatpush2.bf16.msra.mxu0 %v11768_v54 }
 0x4f4   :  { %3920 = vmatpush2.bf16.msra.mxu1 %v11769_v27  ;;  %3880 = vmatprep.subr.bf16.mxu0 %v11770_v38  ;;  %v5369_v38 = vld [vmem:[%s10834_s3 + $0xd0] sm:$0xff]  }
 0x4f5   :  { %3921 = vmatprep.subr.bf16.mxu1 %v11771_v58 }
 0x4f7   :  { %3881 = vmatpush2.bf16.msra.mxu0 %v11772_v42 }
 0x4f8   :  { %3922 = vmatpush2.bf16.msra.mxu1 %v11773_v35  ;;  %3882 = vmatprep.subr.bf16.mxu0 %v11774_v44  ;;  %v3949_v35 = vrot.slane %v10770_v39, %v3948_v32  ;;  %v5370_v44 = vld [vmem:[%s10834_s3 + $0x90] sm:$0xff]  }
 0x4f9   :  { %3923 = vmatprep.subr.bf16.mxu1 %v11775_v6 }
 0x4fb   :  { %3883 = vmatpush2.bf16.msra.mxu0 %v11776_v49 }
 0x4fc   :  { %3924 = vmatpush2.bf16.msra.mxu1 %v11777_v46  ;;  %3884 = vmatprep.subr.bf16.mxu0 %v11778_v53 }
 0x4fd   :  { %3925 = vmatprep.subr.bf16.mxu1 %v11779_v56 }
 0x4ff   :  { %3885 = vmatpush2.bf16.msra.mxu0 %v11780_v10 }
 0x500   :  { %3926 = vmatpush2.bf16.msra.mxu1 %v11781_v1  ;;  %4794 = vmatprep.subr.bf16.mxu0 %v5343_v41  ;;  %v5372_v1 = vld [vmem:[%s10834_s3 + $0x88] sm:$0xff]  }
 0x501   :  { %4816 = vmatprep.subr.bf16.mxu1 %v5359_v34  ;;  %v5966_v34 = vmov 0.0  }
 0x502   :  { %v3642_v11 = vpop.f32.mrf.mxu0  ;;  %3887 = vmatmul.mubr.bf16.vlgmr.msra.gmra.mxu0 %v10225_v45  ;;  %v5348_v45 = vld [vmem:[%s10834_s3 + $0x28] sm:$0xff]  }
 0x503   :  { %v3683_v40 = vpop.f32.mrf.mxu1  ;;  %3928 = vmatmul.mubr.bf16.vlgmr.msra.gmra.mxu1 %v10434_v24  ;;  %v3643_v29 = vadd.f32 %v3642_v11, %v10622_v61  ;;  %4795 = vmatpush3.bf16.msra.mxu0 %v5344_v31  ;;  %v5349_v24 = vld [vmem:[%s10834_s3 + $0x60] sm:$0xff]  }
 0x504   :  { %v3644_v21 = vpop.f32.mrf.mxu0  ;;  %4796 = vmatprep.subr.bf16.mxu0 %v5345_v59  ;;  %4817 = vmatpush3.bf16.msra.mxu1 %v5360_v30 }
 0x505   :  { %v3685_v18 = vpop.f32.mrf.mxu1  ;;  %v3684_v50 = vadd.f32 %v3683_v40, %v3643_v29  ;;  %4818 = vmatprep.subr.bf16.mxu1 %v5361_v62  ;;  %v3645_v37 = vadd.f32 %v3644_v21, %v10628_v17  ;;  %v5374_v40 = vld [vmem:[%s10834_s3 + $0x80] sm:$0xff]  }
 0x506   :  { %v3646_v20 = vpop.f32.mrf.mxu0 }
 0x507   :  { %v3687_v9 = vpop.f32.mrf.mxu1  ;;  %4797 = vmatpush3.bf16.msra.mxu0 %v5346_v22  ;;  %v3686_v17 = vadd.f32 %v3685_v18, %v3645_v37 }
 0x508   :  { %v3647_v61 = vpop.f32.mrf.mxu0  ;;  %4798 = vmatprep.subr.bf16.mxu0 %v5347_v63  ;;  %4819 = vmatpush3.bf16.msra.mxu1 %v5362_v15 }
 0x509   :  { %v3688_v43 = vpop.f32.mrf.mxu1  ;;  %4820 = vmatprep.subr.bf16.mxu1 %v5363_v25 }
 0x50a   :  { %v5375_v43 = vld [vmem:[%s10836_s5 + $0x18] ss:$0 sps:$4 sm:$0x11]  }
 0x50b   :  { %4799 = vmatpush3.bf16.msra.mxu0 %v5348_v45  ;;  %v4360_v30 = vsel %vm4358_vm0, %v5375_v43, 0 }
 0x50c   :  { %4800 = vmatprep.subr.bf16.mxu0 %v5349_v24  ;;  %4821 = vmatpush3.bf16.msra.mxu1 %v5364_v23  ;;  %v3956_v23 = vsub.s32 3, %v11782_v5 }
 0x50d   :  { %4822 = vmatprep.subr.bf16.mxu1 %v5365_v51 }
 0x50e   :  { %v3957_v7 = vrot.slane %v10770_v39, %v3956_v23 }
 0x50f   :  { %4801 = vmatpush3.bf16.msra.mxu0 %v5350_v55  ;;  %v3952_v55 = vsub.s32 2, %v11782_v5 }
 0x510   :  { %4802 = vmatprep.subr.bf16.mxu0 %v5351_v28  ;;  %4823 = vmatpush3.bf16.msra.mxu1 %v5366_v0 }
 0x511   :  { %4824 = vmatprep.subr.bf16.mxu1 %v5367_v8  ;;  %v3953_v0 = vrot.slane %v10770_v39, %v3952_v55 }
 0x513   :  { %4803 = vmatpush3.bf16.msra.mxu0 %v5352_v19 }
 0x514   :  { %4804 = vmatprep.subr.bf16.mxu0 %v5353_v48  ;;  %4825 = vmatpush3.bf16.msra.mxu1 %v5368_v47 }
 0x515   :  { %4826 = vmatprep.subr.bf16.mxu1 %v5369_v38 }
 0x517   :  { %4805 = vmatpush3.bf16.msra.mxu0 %v5354_v60 }
 0x518   :  { %4806 = vmatprep.subr.bf16.mxu0 %v5355_v57  ;;  %4827 = vmatpush3.bf16.msra.mxu1 %v5370_v44 }
 0x51b   :  { %4807 = vmatpush3.bf16.msra.mxu0 %v5356_v26 }
 0x51c   :  { %4808 = vmatprep.subr.bf16.mxu0 %v5357_v2 }
 0x51f   :  { %4809 = vmatpush3.bf16.msra.mxu0 %v5358_v3 }
 0x520   :  { %4843 = vmatprep.subr.bf16.mxu0 %v5966_v34 }
 0x542   :  { %v3724_v52 = vpop.f32.mrf.mxu0 }
 0x543   :  { %v3765_v36 = vpop.f32.mrf.mxu1  ;;  %v3725_v33 = vadd.f32 %v3724_v52, %v3684_v50 }
 0x544   :  { %v3726_v54 = vpop.f32.mrf.mxu0 }
 0x545   :  { %v3767_v27 = vpop.f32.mrf.mxu1  ;;  %v3936_v58 = vmax.f32 %v10034_v13, %v3725_v33  ;;  %v3727_v42 = vadd.f32 %v3726_v54, %v3686_v17  ;;  %v5371_v13 = vld [vmem:[%s10834_s3 + $0xc8] sm:$0xff]  }
 0x546   :  { %v3728_v6 = vpop.f32.mrf.mxu0  ;;  %4828 = vmatprep.subr.bf16.mxu1 %v5371_v13 }
 0x547   :  { %v3769_v49 = vpop.f32.mrf.mxu1  ;;  %v3962_v46 = vadd.f32 %v3945_v14, %v3936_v58  ;;  %v3937_v53 = vmax.f32 %v10042_v12, %v3727_v42  ;;  %4829 = vmatpush3.bf16.msra.mxu1 %v5372_v1  ;;  %v5373_v12 = vld [vmem:[%s10834_s3 + $0xc0] sm:$0xff]  }
 0x548   :  { %v3729_v56 = vpop.f32.mrf.mxu0  ;;  %4830 = vmatprep.subr.bf16.mxu1 %v5373_v12  ;;  %v5378_v42 = vld [vmem:[%s10836_s5] sm:$0xff]  }
 0x549   :  { %v3770_v41 = vpop.f32.mrf.mxu1  ;;  %v3963_v10 = vadd.f32 %v3949_v35, %v3937_v53  ;;  %v3966_v31 = vmax.f32 %v3962_v46, 0.0  ;;  %v4755_v35 = vld [vmem:[%s10835_s4] ss:$0 sm:$0xff]  ;;  %s5968_s4 = smov [#allocation2]  }
 0x54a   :  { %v4788_v1 = vld [vmem:[%s10837_s6] ss:$0 sm:$0xff]  ;;  %s4423_s6 = sshll.u32 %s5968_s4, 4  ;;  %s4424_s6 = int_to_ptr.vmem [resolvable:$true] %s4423_s6 }
 0x54b   :  { %v3967_v59 = vmax.f32 %v3963_v10, 0.0  ;;  %v3970_v29 = vpack.c.bf16 %v3966_v31, %v3966_v31  ;;  %4831 = vmatpush3.bf16.msra.mxu1 %v5374_v40  ;;  %s5943_s1 = scalar_lea.vmem %s4424_s6, 32  ;;  %p5948_p1 = scmp.lt.s32.totalorder %s4424_s6, %s4424_s6 }
 0x54c   :  { %p5944_p0 = scmp.ne.s32.totalorder %s4424_s6, %s5943_s1  ;;  %p5949_p2 = scmp.lt.s32.totalorder %s5943_s1, %s5943_s1 }
 0x54d   :  { %v3971_v11 = vpack.c.bf16 %v3967_v59, %v3967_v59 }
 0x54e   :  { %p5950_p3 = por %p5949_p2, %p5948_p1 }
 0x54f   :  { %4269 = vmatprep.mubr.bf16.mxu0 %v3971_v11 }
 0x550   :  { %4270 = vmatmul.mubr.bf16.vlgmr.msra.gmra.mxu0 %v3970_v29  ;;  %p5951_p4 = pnand %p5950_p3, %p5944_p0 }
 0x551   :  { %4844 = vmatpush3.bf16.msra.mxu0 %v4360_v30  ;;  %4851 = vmatprep.mubr.msk.bf16.mxu0 %vm5967_vm1, %v5966_v34 }
 0x552   :  { %4845 = vmatprep.subr.bf16.mxu0 %v5966_v34 }
 0x582   :  { %v3806_v22 = vpop.f32.mrf.mxu0 }
 0x583   :  { %v3847_v21 = vpop.f32.mrf.mxu1  ;;  %v3807_v18 = vadd.f32 %v3806_v22, %v3765_v36 }
 0x584   :  { %v3808_v63 = vpop.f32.mrf.mxu0 }
 0x585   :  { %v3849_v50 = vpop.f32.mrf.mxu1  ;;  %v3848_v20 = vadd.f32 %v3847_v21, %v3807_v18  ;;  %v3809_v62 = vadd.f32 %v3808_v63, %v3767_v27 }
 0x586   :  { %v3810_v9 = vpop.f32.mrf.mxu0 }
 0x587   :  { %v3851_v45 = vpop.f32.mrf.mxu1  ;;  %v3850_v25 = vadd.f32 %v3849_v50, %v3809_v62 }
 0x588   :  { %v3811_v24 = vpop.f32.mrf.mxu0 }
 0x589   :  { %v3852_v61 = vpop.f32.mrf.mxu1 }
 0x5c2   :  { %v3888_v15 = vpop.f32.mrf.mxu0 }
 0x5c3   :  { %v3929_v28 = vpop.f32.mrf.mxu1  ;;  %v3889_v19 = vadd.f32 %v3888_v15, %v3848_v20 }
 0x5c4   :  { %v3890_v48 = vpop.f32.mrf.mxu0 }
 0x5c5   :  { %v3931_v51 = vpop.f32.mrf.mxu1  ;;  %v3930_v60 = vadd.f32 %v3929_v28, %v3889_v19  ;;  %v3891_v57 = vadd.f32 %v3890_v48, %v3850_v25 }
 0x5c6   :  { %v3892_v26 = vpop.f32.mrf.mxu0 }
 0x5c7   :  { %v3933_v2 = vpop.f32.mrf.mxu1  ;;  %v3938_v3 = vmax.f32 %v10469_v4, %v3930_v60  ;;  %v3932_v37 = vadd.f32 %v3931_v51, %v3891_v57  ;;  %v5376_v4 = vld [vmem:[%s10836_s5 + $0x10] sm:$0xff]  }
 0x5c8   :  { %v3893_v8 = vpop.f32.mrf.mxu0  ;;  %4846 = vmatpush3.bf16.msra.mxu0 %v5376_v4 }
 0x5c9   :  { %v3934_v32 = vpop.f32.mrf.mxu1  ;;  %v3964_v47 = vadd.f32 %v3953_v0, %v3938_v3  ;;  %v3939_v52 = vmax.f32 %v10486_v16, %v3932_v37  ;;  %4847 = vmatprep.subr.bf16.mxu0 %v5966_v34  ;;  %v5377_v16 = vld [vmem:[%s10836_s5 + $0x8] sm:$0xff]  }
 0x5cb   :  { %v3965_v36 = vadd.f32 %v3957_v7, %v3939_v52  ;;  %v3968_v5 = vmax.f32 %v3964_v47, 0.0 }
 0x5cc   :  { %4848 = vmatpush3.bf16.msra.mxu0 %v5377_v16 }
 0x5cd   :  { %v3969_v17 = vmax.f32 %v3965_v36, 0.0  ;;  %v3972_v14 = vpack.c.bf16 %v3968_v5, %v3968_v5  ;;  %4849 = vmatprep.subr.bf16.mxu0 %v5966_v34 }
 0x5cf   :  { %v3973_v33 = vpack.c.bf16 %v3969_v17, %v3969_v17 }
 0x5d0   :  { %4850 = vmatpush3.bf16.msra.mxu0 %v5378_v42 }
 0x5d1   :  { %4309 = vmatprep.mubr.bf16.mxu1 %v3973_v33 }
 0x5d2   :  { %4310 = vmatmul.mubr.bf16.vlgmr.msra.gmra.mxu1 %v3972_v14 }
 0x610   :  { %v4810_v54 = vpop.f32.mrf.mxu0 }
 0x612   :  { %v4811_v27 = vpop.f32.mrf.mxu0 }
 0x613   :  { %v4812_v39 = vadd.f32 %v4811_v27, %v4810_v54 }
 0x614   :  { %v4813_v38 = vpop.f32.mrf.mxu0 }
 0x615   :  { %v4272_v49 = vadd.f32 %v4812_v39, %v4755_v35 }
 0x616   :  { %v4814_v58 = vpop.f32.mrf.mxu0 }
 0x692   :  { %v4832_v44 = vpop.f32.mrf.mxu1 }
 0x694   :  { %v4833_v6 = vpop.f32.mrf.mxu1 }
 0x695   :  { %v4834_v46 = vadd.f32 %v4833_v6, %v4832_v44 }
 0x696   :  { %v4835_v53 = vpop.f32.mrf.mxu1 }
 0x697   :  { %v4312_v56 = vadd.f32 %v4834_v46, %v4272_v49 }
 0x698   :  { %v4836_v41 = vpop.f32.mrf.mxu1 }
 0x699   :  { %v4317_v13 = vmax.f32 %v4312_v56, 0.0 }
 0x69b   :  { %v4318_v10 = vpack.c.bf16 %v4317_v13, %v4317_v13 }
 0x69d   :  { %4852 = vmatmul.mubr.msk.bf16.vlgmr.msra.gmra.mxu0 %vm4354_vm2, %v4318_v10 }
 0x75d   :  { %v4396_v31 = vpop.f32.mrf.mxu0 }
 0x75e   :  { %v4397_v59 = vadd.f32 %v4788_v1, %v4396_v31 }
 0x75f   :  { %v4853_v12 = vpop.f32.mrf.mxu0 }
 0x760   :  { %v4403_v11 = vsel %vm4402_vm3, %v4397_v59, -inf }
 0x761   :  { %4404 = vmax.xlane.f32.xlu0 %v4403_v11  ;;  %v4399_v40 = vpop.f32.mrf.mxu0 }
 0x763   :  { %v4854_v29 = vpop.f32.mrf.mxu0 }
 0x7ea   :  { %v4405_v22 = vpop.xlane.xlu0 %4404 }
 0x7eb   :  { %v4406_v21 = vsub.f32 %v4397_v59, %v4405_v22 }
 0x7ed   :  { %v4407_v18 = vmul.f32 1.442695, %v4406_v21 }
 0x7ef   :  { %5379 = vpow2.f32 %v4407_v18 }
 0x7fc   :  { %v5380_v63 = vpop.eup %5379 }
 0x7fd   :  { %v4409_v50 = vsel %vm4402_vm3, %v5380_v63, 0.0 }
 0x7fe   :  { %4410 = vadd.xlane.f32.xlu0 %v4409_v50 }
 0x887   :  { %v4411_v20 = vpop.xlane.xlu0 %4410 }
 0x888   :  { %5381 = vlog2.f32 %v4411_v20 }
 0x895   :  { %v5382_v9 = vpop.eup %5381 }
 0x896   :  { %v4413_v45 = vmul.f32 0.6931472, %v5382_v9 }
 0x898   :  { %v4414_v24 = vadd.f32 %v4413_v45, %v4405_v22 }
 0x89a   :  { %v4415_v61 = vsub.f32 %v4397_v59, %v4414_v24 }
 0x89c   :  { %4416 = vst.msk [vmem:[#allocation2] sm:$0x3] %vm4402_vm3, %v4415_v61 }
 0x89d   :  { %5954 = shalt.err (!%p5951_p4)
}
 0x89e   :  { %4426 = dma.vmem_to_hbm [thread:$0]  %s4424_s6, 32, %s10838_s7, [#allocation3]  }
 0x89f   :  { %5963 = dma.done.wait [#allocation3], 32  }
 0x8a0   :  { %5964 = vsyncadd [#allocation3], 4294967264 }
 0x8a1   :  { %4430 = vsyncpa [#allocation3], 1 }

</bundles_post_ra>
